<compile_context>
chip_gen: v7x
topology: tpu7x:2x2x1
jax: 0.10.0
libtpu: 0.0.40
codegen_flags: <defaults>
</compile_context>

<pallas_src>
import functools

import jax
import jax.numpy as jnp
from jax.experimental import pallas as pl
from jax.experimental.pallas import tpu as pltpu


# ----------------------------------------------------------------------------
# Shared in-kernel helpers
# ----------------------------------------------------------------------------
def _conv_same_flat(pm, px, convw_ref, col_idx, *, H, W, KH, KW):
    """'Same'-padded 2-in/1-out KxK conv evaluated on flattened (1, H*W)
    pooled maps via shift-and-accumulate.

    A tap (dy, dx) of the 2-D conv is a lane shift of dy*W + dx of the
    flattened map.  Out-of-row reads land in the zero pad (no mask needed);
    out-of-column reads wrap to the neighbouring row and are killed by the
    per-dx column mask.  Weights come from SMEM; everything runs on the VPU.
    """
    HW = H * W
    ph, pw = KH // 2, KW // 2
    pad = ph * W + pw                                   # max |flat shift|
    zpad = jnp.zeros((1, pad), jnp.float32)
    pmp = jnp.concatenate([zpad, pm, zpad], axis=1)     # (1, HW + 2*pad)
    pxp = jnp.concatenate([zpad, px, zpad], axis=1)

    acc = jnp.zeros((1, HW), jnp.float32)
    for kx in range(KW):
        dx = kx - pw
        ok = (col_idx + dx >= 0) & (col_idx + dx < W)   # column validity (1, HW)
        part = jnp.zeros((1, HW), jnp.float32)
        for ky in range(KH):
            off = pad + (ky - ph) * W + dx              # static lane offset
            wm = convw_ref[ky * KW + kx]                # weight on mean map
            wx = convw_ref[KH * KW + ky * KW + kx]      # weight on max map
            part = part + wm * pmp[:, off:off + HW] + wx * pxp[:, off:off + HW]
        acc = acc + jnp.where(ok, part, 0.0)
    return acc


def _channel_mlp(pooled, w1_ref, b1_ref, w2_ref, b2_ref):
    """Shared Linear->ReLU->Linear on a (C, 2) [avg | max] block; returns
    sigmoid(fc(avg) + fc(max)) as (C, 1).  PyTorch (out, in) weight layout,
    column orientation so no in-kernel transposes."""
    h = jnp.dot(w1_ref[...], pooled, preferred_element_type=jnp.float32) + b1_ref[...]
    h = jnp.maximum(h, 0.0)
    y = jnp.dot(w2_ref[...], h, preferred_element_type=jnp.float32) + b2_ref[...]
    return jax.nn.sigmoid(y[:, 0:1] + y[:, 1:2])


# ----------------------------------------------------------------------------
# Fused kernel (primary path): one grid step per batch element.
# ----------------------------------------------------------------------------
def _cbam_fused_kernel(x_ref, w1_ref, b1_ref, w2_ref, b2_ref, convw_ref, col_ref,
                       o_ref, *, H, W, KH, KW, inv_hw, inv_c):
    x = x_ref[0]                                        # (C, HW), native dtype
    xf = x.astype(jnp.float32)                          # fp32 for the reductions

    # --- channel attention: spatial avg/max pool -> shared MLP -> sigmoid ---
    ch_avg = jnp.sum(xf, axis=1, keepdims=True) * inv_hw          # (C, 1)
    ch_max = jnp.max(xf, axis=1, keepdims=True)                   # (C, 1)
    ca = _channel_mlp(jnp.concatenate([ch_avg, ch_max], axis=1),
                      w1_ref, b1_ref, w2_ref, b2_ref)             # (C, 1)

    # --- spatial attention: channel avg/max pool -> KxK conv -> sigmoid ---
    pm = jnp.sum(xf, axis=0, keepdims=True) * inv_c               # (1, HW)
    px = jnp.max(xf, axis=0, keepdims=True)                       # (1, HW)
    logit = _conv_same_flat(pm, px, convw_ref, col_ref[...],
                            H=H, W=W, KH=KH, KW=KW)
    sa = jax.nn.sigmoid(logit)                                    # (1, HW)

    # --- apply in native dtype (no second fp32 copy of the slab) ---
    o_ref[0] = x * ca.astype(x.dtype) * sa.astype(x.dtype)


# ----------------------------------------------------------------------------
# Fallback path, kernel 1: C-tiled pooling; both attentions finalized at the
# last C tile.  Grid = (B, C // c_tile), B "parallel", C axis "arbitrary".
# ----------------------------------------------------------------------------
def _cbam_pool_kernel(x_ref, w1_ref, b1_ref, w2_ref, b2_ref, convw_ref, col_ref,
                      ca_ref, sa_ref, sp_pool_ref, cp_sum_ref, cp_max_ref,
                      *, c_tile, H, W, KH, KW, inv_hw, inv_c):
    # NOTE (load-bearing): correctness relies on (a) per-core scratch when the
    # parallel b axis is megacore-sharded and (b) the "arbitrary" c axis
    # restarting at 0 for every b — both current Pallas/Mosaic semantics.
    c = pl.program_id(1)
    nc = pl.num_programs(1)

    @pl.when(c == 0)
    def _init():
        cp_sum_ref[...] = jnp.zeros_like(cp_sum_ref)
        cp_max_ref[...] = jnp.full_like(cp_max_ref, -jnp.inf)

    xb = x_ref[0].astype(jnp.float32)                   # (c_tile, HW)

    # Per-channel spatial [sum | max] rows of the (C, 2) table.
    ch = jnp.concatenate([jnp.sum(xb, axis=1, keepdims=True),
                          jnp.max(xb, axis=1, keepdims=True)], axis=1)
    sp_pool_ref[pl.ds(c * c_tile, c_tile), :] = ch

    # Channel-pooling accumulators for the spatial attention.
    cp_sum_ref[...] += jnp.sum(xb, axis=0, keepdims=True)
    cp_max_ref[...] = jnp.maximum(cp_max_ref[...],
                                  jnp.max(xb, axis=0, keepdims=True))

    @pl.when(c == nc - 1)
    def _finalize():
        pool = sp_pool_ref[...]                         # (C, 2) = [sum | max]
        pooled = jnp.concatenate([pool[:, 0:1] * inv_hw, pool[:, 1:2]], axis=1)
        ca_ref[0] = _channel_mlp(pooled, w1_ref, b1_ref, w2_ref, b2_ref)  # (C,1)

        pm = cp_sum_ref[...] * inv_c
        px = cp_max_ref[...]
        logit = _conv_same_flat(pm, px, convw_ref, col_ref[...],
                                H=H, W=W, KH=KH, KW=KW)
        sa_ref[0] = jax.nn.sigmoid(logit)               # (1, HW)


# ----------------------------------------------------------------------------
# Fallback path, kernel 2: elementwise apply, fully parallel, lane-dense.
# ----------------------------------------------------------------------------
def _cbam_apply_kernel(x_ref, ca_ref, sa_ref, o_ref):
    x = x_ref[0]                                        # (c_tile, HW), native
    o_ref[0] = x * ca_ref[0].astype(x.dtype) * sa_ref[0].astype(x.dtype)


# ----------------------------------------------------------------------------
# Wrapper
# ----------------------------------------------------------------------------
def _vmem_limit_bytes():
    """~3/4 of physical VMEM (v5e/v6e: 128 MiB -> 96 MiB; v7x: 64 MiB -> 48 MiB),
    never below 32 MiB, capped at 96 MiB."""
    cap = 64 * 1024 * 1024
    try:
        info = pltpu.get_tpu_info()
        for name in ("vmem_capacity_bytes", "vmem_size_bytes", "vmem_bytes"):
            val = getattr(info, name, None)
            if val:
                cap = int(val)
                break
    except Exception:
        pass
    return max(32 * 1024 * 1024, min(3 * cap // 4, 96 * 1024 * 1024))


def _pick_c_tile(C, HW, itemsize, budget):
    """Largest C tile that divides C, is a multiple of 8 (block rule) and keeps
    the per-step working set comfortably inside `budget`."""
    cands = [d for d in range(8, C + 1, 8) if C % d == 0]
    if not cands:
        return C
    best = cands[0]
    for d in cands:
        need = d * HW * (4 * itemsize + 4) + 16 * HW * 4 + (1 << 20)
        if need <= 0.6 * budget:
            best = d
    return best


def cbam(x, fc1_w, fc1_b, fc2_w, fc2_b, conv_w, *, force_fallback=False, c_tile=None):
    """CBAM forward: out = x * ChannelAttention(x) * SpatialAttention(x).

    x:      (B, C, H, W), fp32 or bf16.
    fc1_w:  (C//r, C), fc1_b: (C//r,)   (PyTorch Linear (out, in) layout)
    fc2_w:  (C, C//r), fc2_b: (C,)
    conv_w: (2, KH, KW) or (1, 2, KH, KW), bias-free; channel 0 -> mean map,
            channel 1 -> max map (PyTorch Conv2d weight layout).
    """
    B, C, H, W = x.shape
    HW = H * W
    conv_w = jnp.asarray(conv_w, jnp.float32).reshape((2,) + conv_w.shape[-2:])
    KH, KW = int(conv_w.shape[-2]), int(conv_w.shape[-1])
    Cr = fc1_w.shape[0]

    x3 = x.reshape(B, C, HW)                            # free view, lane-dense
    w1 = jnp.asarray(fc1_w, jnp.float32)                # (Cr, C)
    b1 = jnp.asarray(fc1_b, jnp.float32).reshape(Cr, 1)
    w2 = jnp.asarray(fc2_w, jnp.float32)                # (C, Cr)
    b2 = jnp.asarray(fc2_b, jnp.float32).reshape(C, 1)
    convw_flat = conv_w.reshape(-1)                     # (2*KH*KW,) -> SMEM
    col_idx = (jnp.arange(HW, dtype=jnp.int32) % W).reshape(1, HW)

    vmem_limit = _vmem_limit_bytes()
    itemsize = x.dtype.itemsize
    # Fused per-step working set: double-buffered in + out native blocks, one
    # fp32 transient slab for the reductions, plus small weights/pads.
    fused_need = C * HW * (4 * itemsize + 4) + 4 * HW * 4 + (2 << 20)
    use_fused = (not force_fallback) and fused_need <= 0.8 * vmem_limit

    common = dict(H=H, W=W, KH=KH, KW=KW, inv_hw=1.0 / HW, inv_c=1.0 / C)
    smem_spec = pl.BlockSpec(memory_space=pltpu.MemorySpace.SMEM)

    if use_fused:
        out = pl.pallas_call(
            functools.partial(_cbam_fused_kernel, **common),
            out_shape=jax.ShapeDtypeStruct((B, C, HW), x.dtype),
            grid=(B,),
            in_specs=[
                pl.BlockSpec((1, C, HW), lambda b: (b, 0, 0)),
                pl.BlockSpec((Cr, C), lambda b: (0, 0)),
                pl.BlockSpec((Cr, 1), lambda b: (0, 0)),
                pl.BlockSpec((C, Cr), lambda b: (0, 0)),
                pl.BlockSpec((C, 1), lambda b: (0, 0)),
                smem_spec,
                pl.BlockSpec((1, HW), lambda b: (0, 0)),
            ],
            out_specs=pl.BlockSpec((1, C, HW), lambda b: (b, 0, 0)),
            compiler_params=pltpu.CompilerParams(
                dimension_semantics=("parallel",),
                vmem_limit_bytes=vmem_limit),
        )(x3, w1, b1, w2, b2, convw_flat, col_idx)
        # TODO(synk): for B == 1 on v7x (2 TensorCores) this grid leaves one
        # core idle; a C-split grid axis on the apply portion would recover it.
        return out.reshape(B, C, H, W)

    # ------------------ fallback: slab does not fit VMEM -------------------
    if c_tile is None:
        c_tile = _pick_c_tile(C, HW, itemsize, vmem_limit)
    assert C % c_tile == 0, "c_tile must divide C"
    nc = C // c_tile
    # TODO(synk): if H*W alone exceeds the VMEM budget (even an 8-channel block
    # does not fit), the conv would need halo-tiled HW blocking — not handled.

    ca, sa = pl.pallas_call(
        functools.partial(_cbam_pool_kernel, c_tile=c_tile, **common),
        out_shape=(jax.ShapeDtypeStruct((B, C, 1), jnp.float32),
                   jax.ShapeDtypeStruct((B, 1, HW), jnp.float32)),
        grid=(B, nc),
        in_specs=[
            pl.BlockSpec((1, c_tile, HW), lambda b, c: (b, c, 0)),
            pl.BlockSpec((Cr, C), lambda b, c: (0, 0)),
            pl.BlockSpec((Cr, 1), lambda b, c: (0, 0)),
            pl.BlockSpec((C, Cr), lambda b, c: (0, 0)),
            pl.BlockSpec((C, 1), lambda b, c: (0, 0)),
            smem_spec,
            pl.BlockSpec((1, HW), lambda b, c: (0, 0)),
        ],
        out_specs=(pl.BlockSpec((1, C, 1), lambda b, c: (b, 0, 0)),
                   pl.BlockSpec((1, 1, HW), lambda b, c: (b, 0, 0))),
        scratch_shapes=[
            pltpu.VMEM((C, 2), jnp.float32),            # per-channel [sum|max]
            pltpu.VMEM((1, HW), jnp.float32),           # channel-sum accumulator
            pltpu.VMEM((1, HW), jnp.float32),           # channel-max accumulator
        ],
        compiler_params=pltpu.CompilerParams(
            dimension_semantics=("parallel", "arbitrary"),
            vmem_limit_bytes=vmem_limit),
    )(x3, w1, b1, w2, b2, convw_flat, col_idx)

    out = pl.pallas_call(
        _cbam_apply_kernel,
        out_shape=jax.ShapeDtypeStruct((B, C, HW), x.dtype),
        grid=(B, nc),
        in_specs=[
            pl.BlockSpec((1, c_tile, HW), lambda b, c: (b, c, 0)),
            pl.BlockSpec((1, c_tile, 1), lambda b, c: (b, c, 0)),
            pl.BlockSpec((1, 1, HW), lambda b, c: (b, 0, 0)),
        ],
        out_specs=pl.BlockSpec((1, c_tile, HW), lambda b, c: (b, c, 0)),
        compiler_params=pltpu.CompilerParams(
            dimension_semantics=("parallel", "parallel"),
            vmem_limit_bytes=vmem_limit),
    )(x3, ca, sa)
    return out.reshape(B, C, H, W)


# ----------------------------------------------------------------------------
# Pure-JAX reference (mirrors the PyTorch CBAM forward).
# ----------------------------------------------------------------------------
def cbam_reference(x, fc1_w, fc1_b, fc2_w, fc2_b, conv_w):
    xf = x.astype(jnp.float32)
    B, C, H, W = x.shape
    KH, KW = conv_w.shape[-2], conv_w.shape[-1]

    avg = jnp.mean(xf, axis=(2, 3))
    mx = jnp.max(xf, axis=(2, 3))

    def fc(v):
        h = jnp.maximum(v @ fc1_w.T + fc1_b, 0.0)
        return h @ fc2_w.T + fc2_b

    ca = jax.nn.sigmoid(fc(avg) + fc(mx)).reshape(B, C, 1, 1)

    pooled = jnp.stack([jnp.mean(xf, axis=1), jnp.max(xf, axis=1)], axis=1)
    conv = jax.lax.conv_general_dilated(
        pooled, conv_w.reshape(1, 2, KH, KW).astype(jnp.float32),
        window_strides=(1, 1),
        padding=((KH // 2, KH // 2), (KW // 2, KW // 2)),
        dimension_numbers=("NCHW", "OIHW", "NCHW"))
    sa = jax.nn.sigmoid(conv)
    return xf * ca * sa


# ----------------------------------------------------------------------------
if __name__ == "__main__":
    def run_case(key, B, C, H, W, reduction, dtype, tol, **kw):
        Cr = max(1, C // reduction)
        ks = jax.random.split(key, 6)
        x = jax.random.normal(ks[0], (B, C, H, W), dtype=jnp.float32).astype(dtype)
        fc1_w = jax.random.normal(ks[1], (Cr, C), dtype=jnp.float32) * 0.2
        fc1_b = jax.random.normal(ks[2], (Cr,), dtype=jnp.float32) * 0.1
        fc2_w = jax.random.normal(ks[3], (C, Cr), dtype=jnp.float32) * 0.2
        fc2_b = jax.random.normal(ks[4], (C,), dtype=jnp.float32) * 0.1
        conv_w = jax.random.normal(ks[5], (2, 7, 7), dtype=jnp.float32) * 0.05

        out = cbam(x, fc1_w, fc1_b, fc2_w, fc2_b, conv_w, **kw)
        out = jax.block_until_ready(out)
        ref = cbam_reference(x, fc1_w, fc1_b, fc2_w, fc2_b, conv_w)

        assert out.shape == (B, C, H, W)
        assert out.dtype == x.dtype
        diff = float(jnp.max(jnp.abs(out.astype(jnp.float32) - ref)))
        assert jnp.allclose(out.astype(jnp.float32), ref, atol=tol, rtol=tol), diff

    k1, k2, k3 = jax.random.split(jax.random.PRNGKey(0), 3)
    # Case 1: fp32, fused single-pass path.
    run_case(k1, B=2, C=64, H=16, W=16, reduction=16, dtype=jnp.float32, tol=1e-4)
    # Case 2: bf16 activations, fused path with non-128-aligned H*W (=400),
    #         exercising the column-masked shift-and-accumulate conv.
    run_case(k2, B=2, C=32, H=20, W=20, reduction=8, dtype=jnp.bfloat16, tol=3e-2)
    # Case 3: forced fallback path (C-tiled pooling kernel + apply kernel),
    #         multi-tile accumulation over C (32 channels in tiles of 8).
    run_case(k3, B=2, C=32, H=16, W=16, reduction=8, dtype=jnp.float32, tol=1e-4,
             force_fallback=True, c_tile=8)

    print("KERNEL_OK")
</pallas_src>

<mosaic_0001>
module attributes {stable_mosaic.version = 11 : i64} {
  func.func @_cbam_fused_kernel(%arg0: i32, %arg1: memref<1x64x256xf32, #tpu.memory_space<vmem>>, %arg2: memref<4x64xf32, #tpu.memory_space<vmem>>, %arg3: memref<4x1xf32, #tpu.memory_space<vmem>>, %arg4: memref<64x4xf32, #tpu.memory_space<vmem>>, %arg5: memref<64x1xf32, #tpu.memory_space<vmem>>, %arg6: memref<98xf32, #tpu.memory_space<smem>>, %arg7: memref<1x256xi32, #tpu.memory_space<vmem>>, %arg8: memref<1x64x256xf32, #tpu.memory_space<vmem>>) attributes {dimension_semantics = [#tpu.dimension_semantics<parallel>], iteration_bounds = array<i64: 2>, scalar_prefetch = 0 : i64, scratch_operands = 0 : i64, tpu.core_type = #tpu.core_type<tc>, window_params = [{transform_indices = @transform_0, window_bounds = array<i64: 1, 64, 256>}, {pipeline_mode = #tpu.pipeline_mode<synchronous>, transform_indices = @transform_1, window_bounds = array<i64: 4, 64>}, {pipeline_mode = #tpu.pipeline_mode<synchronous>, transform_indices = @transform_2, window_bounds = array<i64: 4, 1>}, {pipeline_mode = #tpu.pipeline_mode<synchronous>, transform_indices = @transform_3, window_bounds = array<i64: 64, 4>}, {pipeline_mode = #tpu.pipeline_mode<synchronous>, transform_indices = @transform_4, window_bounds = array<i64: 64, 1>}, {transform_indices = @transform_5, window_bounds = array<i64: 98>}, {pipeline_mode = #tpu.pipeline_mode<synchronous>, transform_indices = @transform_6, window_bounds = array<i64: 1, 256>}, {transform_indices = @transform_7, window_bounds = array<i64: 1, 64, 256>}]} {
    %c0 = arith.constant 0 : index
    %c0_0 = arith.constant 0 : index
    %c0_1 = arith.constant 0 : index
    %0 = vector.load %arg1[%c0, %c0_0, %c0_1] : memref<1x64x256xf32, #tpu.memory_space<vmem>>, vector<1x64x256xf32>
    %1 = vector.shape_cast %0 : vector<1x64x256xf32> to vector<64x256xf32>
    %cst = arith.constant dense<0.000000e+00> : vector<64xf32>
    %2 = vector.multi_reduction <add>, %1, %cst [1] : vector<64x256xf32> to vector<64xf32>
    %3 = vector.shape_cast %2 : vector<64xf32> to vector<64x1xf32>
    %cst_2 = arith.constant 3.906250e-03 : f32
    %4 = vector.broadcast %cst_2 : f32 to vector<64x1xf32>
    %5 = arith.mulf %3, %4 : vector<64x1xf32>
    %cst_3 = arith.constant dense<0xFF800000> : vector<64xf32>
    %6 = vector.multi_reduction <maximumf>, %1, %cst_3 [1] : vector<64x256xf32> to vector<64xf32>
    %7 = vector.shape_cast %6 : vector<64xf32> to vector<64x1xf32>
    %8 = tpu.concatenate %5, %7 in 1 : vector<64x1xf32>, vector<64x1xf32> -> vector<64x2xf32>
    %c0_4 = arith.constant 0 : index
    %c0_5 = arith.constant 0 : index
    %9 = vector.load %arg2[%c0_4, %c0_5] : memref<4x64xf32, #tpu.memory_space<vmem>>, vector<4x64xf32>
    %cst_6 = arith.constant dense<0.000000e+00> : vector<4x2xf32>
    %10 = tpu.matmul %9, %8, %cst_6 {dimension_numbers = #tpu.dot_dimension_numbers<[1], [0], [0], [1], [0, 0, 1, 1], [], []>} : vector<4x64xf32>, vector<64x2xf32>, vector<4x2xf32> -> vector<4x2xf32>
    %c0_7 = arith.constant 0 : index
    %c0_8 = arith.constant 0 : index
    %11 = vector.load %arg3[%c0_7, %c0_8] : memref<4x1xf32, #tpu.memory_space<vmem>>, vector<4x1xf32>
    %12 = vector.broadcast %11 : vector<4x1xf32> to vector<4x2xf32>
    %13 = arith.addf %10, %12 : vector<4x2xf32>
    %cst_9 = arith.constant 0.000000e+00 : f32
    %14 = vector.broadcast %cst_9 : f32 to vector<4x2xf32>
    %15 = arith.maximumf %13, %14 : vector<4x2xf32>
    %c0_10 = arith.constant 0 : index
    %c0_11 = arith.constant 0 : index
    %16 = vector.load %arg4[%c0_10, %c0_11] : memref<64x4xf32, #tpu.memory_space<vmem>>, vector<64x4xf32>
    %cst_12 = arith.constant dense<0.000000e+00> : vector<64x2xf32>
    %17 = tpu.matmul %16, %15, %cst_12 {dimension_numbers = #tpu.dot_dimension_numbers<[1], [0], [0], [1], [0, 0, 1, 1], [], []>} : vector<64x4xf32>, vector<4x2xf32>, vector<64x2xf32> -> vector<64x2xf32>
    %c0_13 = arith.constant 0 : index
    %c0_14 = arith.constant 0 : index
    %18 = vector.load %arg5[%c0_13, %c0_14] : memref<64x1xf32, #tpu.memory_space<vmem>>, vector<64x1xf32>
    %19 = vector.broadcast %18 : vector<64x1xf32> to vector<64x2xf32>
    %20 = arith.addf %17, %19 : vector<64x2xf32>
    %21 = vector.extract_strided_slice %20 {offsets = [0, 0], sizes = [64, 1], strides = [1, 1]} : vector<64x2xf32> to vector<64x1xf32>
    %22 = vector.extract_strided_slice %20 {offsets = [0, 1], sizes = [64, 1], strides = [1, 1]} : vector<64x2xf32> to vector<64x1xf32>
    %23 = arith.addf %21, %22 : vector<64x1xf32>
    %24 = arith.negf %23 : vector<64x1xf32>
    %25 = math.exp %24 : vector<64x1xf32>
    %cst_15 = arith.constant 1.000000e+00 : f32
    %26 = vector.broadcast %cst_15 : f32 to vector<64x1xf32>
    %27 = arith.addf %26, %25 : vector<64x1xf32>
    %28 = arith.divf %26, %27 : vector<64x1xf32>
    %cst_16 = arith.constant dense<0.000000e+00> : vector<256xf32>
    %29 = vector.multi_reduction <add>, %1, %cst_16 [0] : vector<64x256xf32> to vector<256xf32>
    %30 = vector.shape_cast %29 : vector<256xf32> to vector<1x256xf32>
    %cst_17 = arith.constant 1.562500e-02 : f32
    %31 = vector.broadcast %cst_17 : f32 to vector<1x256xf32>
    %32 = arith.mulf %30, %31 : vector<1x256xf32>
    %cst_18 = arith.constant dense<0xFF800000> : vector<256xf32>
    %33 = vector.multi_reduction <maximumf>, %1, %cst_18 [0] : vector<64x256xf32> to vector<256xf32>
    %34 = vector.shape_cast %33 : vector<256xf32> to vector<1x256xf32>
    %c0_19 = arith.constant 0 : index
    %c0_20 = arith.constant 0 : index
    %35 = vector.load %arg7[%c0_19, %c0_20] : memref<1x256xi32, #tpu.memory_space<vmem>>, vector<1x256xi32>
    %cst_21 = arith.constant 0.000000e+00 : f32
    %36 = vector.broadcast %cst_21 : f32 to vector<1x51xf32>
    %37 = tpu.concatenate %36, %32, %36 in 1 : vector<1x51xf32>, vector<1x256xf32>, vector<1x51xf32> -> vector<1x358xf32>
    %38 = tpu.concatenate %36, %34, %36 in 1 : vector<1x51xf32>, vector<1x256xf32>, vector<1x51xf32> -> vector<1x358xf32>
    %cst_22 = arith.constant 0.000000e+00 : f32
    %39 = vector.broadcast %cst_22 : f32 to vector<1x256xf32>
    %c-3_i32 = arith.constant -3 : i32
    %40 = vector.broadcast %c-3_i32 : i32 to vector<1x256xi32>
    %41 = arith.addi %35, %40 : vector<1x256xi32>
    %c0_i32 = arith.constant 0 : i32
    %42 = vector.broadcast %c0_i32 : i32 to vector<1x256xi32>
    %43 = arith.cmpi sge, %41, %42 : vector<1x256xi32>
    %c-3_i32_23 = arith.constant -3 : i32
    %44 = vector.broadcast %c-3_i32_23 : i32 to vector<1x256xi32>
    %45 = arith.addi %35, %44 : vector<1x256xi32>
    %c16_i32 = arith.constant 16 : i32
    %46 = vector.broadcast %c16_i32 : i32 to vector<1x256xi32>
    %47 = arith.cmpi slt, %45, %46 : vector<1x256xi32>
    %48 = arith.andi %43, %47 : vector<1x256xi1>
    %cst_24 = arith.constant 0.000000e+00 : f32
    %49 = vector.broadcast %cst_24 : f32 to vector<1x256xf32>
    %c0_25 = arith.constant 0 : index
    %50 = memref.load %arg6[%c0_25] : memref<98xf32, #tpu.memory_space<smem>>
    %c49 = arith.constant 49 : index
    %51 = memref.load %arg6[%c49] : memref<98xf32, #tpu.memory_space<smem>>
    %52 = vector.extract_strided_slice %37 {offsets = [0, 0], sizes = [1, 256], strides = [1, 1]} : vector<1x358xf32> to vector<1x256xf32>
    %53 = vector.broadcast %50 : f32 to vector<1x256xf32>
    %54 = arith.mulf %53, %52 : vector<1x256xf32>
    %55 = arith.addf %49, %54 : vector<1x256xf32>
    %56 = vector.extract_strided_slice %38 {offsets = [0, 0], sizes = [1, 256], strides = [1, 1]} : vector<1x358xf32> to vector<1x256xf32>
    %57 = vector.broadcast %51 : f32 to vector<1x256xf32>
    %58 = arith.mulf %57, %56 : vector<1x256xf32>
    %59 = arith.addf %55, %58 : vector<1x256xf32>
    %c7 = arith.constant 7 : index
    %60 = memref.load %arg6[%c7] : memref<98xf32, #tpu.memory_space<smem>>
    %c56 = arith.constant 56 : index
    %61 = memref.load %arg6[%c56] : memref<98xf32, #tpu.memory_space<smem>>
    %62 = vector.extract_strided_slice %37 {offsets = [0, 16], sizes = [1, 256], strides = [1, 1]} : vector<1x358xf32> to vector<1x256xf32>
    %63 = vector.broadcast %60 : f32 to vector<1x256xf32>
    %64 = arith.mulf %63, %62 : vector<1x256xf32>
    %65 = arith.addf %59, %64 : vector<1x256xf32>
    %66 = vector.extract_strided_slice %38 {offsets = [0, 16], sizes = [1, 256], strides = [1, 1]} : vector<1x358xf32> to vector<1x256xf32>
    %67 = vector.broadcast %61 : f32 to vector<1x256xf32>
    %68 = arith.mulf %67, %66 : vector<1x256xf32>
    %69 = arith.addf %65, %68 : vector<1x256xf32>
    %c14 = arith.constant 14 : index
    %70 = memref.load %arg6[%c14] : memref<98xf32, #tpu.memory_space<smem>>
    %c63 = arith.constant 63 : index
    %71 = memref.load %arg6[%c63] : memref<98xf32, #tpu.memory_space<smem>>
    %72 = vector.extract_strided_slice %37 {offsets = [0, 32], sizes = [1, 256], strides = [1, 1]} : vector<1x358xf32> to vector<1x256xf32>
    %73 = vector.broadcast %70 : f32 to vector<1x256xf32>
    %74 = arith.mulf %73, %72 : vector<1x256xf32>
    %75 = arith.addf %69, %74 : vector<1x256xf32>
    %76 = vector.extract_strided_slice %38 {offsets = [0, 32], sizes = [1, 256], strides = [1, 1]} : vector<1x358xf32> to vector<1x256xf32>
    %77 = vector.broadcast %71 : f32 to vector<1x256xf32>
    %78 = arith.mulf %77, %76 : vector<1x256xf32>
    %79 = arith.addf %75, %78 : vector<1x256xf32>
    %c21 = arith.constant 21 : index
    %80 = memref.load %arg6[%c21] : memref<98xf32, #tpu.memory_space<smem>>
    %c70 = arith.constant 70 : index
    %81 = memref.load %arg6[%c70] : memref<98xf32, #tpu.memory_space<smem>>
    %82 = vector.extract_strided_slice %37 {offsets = [0, 48], sizes = [1, 256], strides = [1, 1]} : vector<1x358xf32> to vector<1x256xf32>
    %83 = vector.broadcast %80 : f32 to vector<1x256xf32>
    %84 = arith.mulf %83, %82 : vector<1x256xf32>
    %85 = arith.addf %79, %84 : vector<1x256xf32>
    %86 = vector.extract_strided_slice %38 {offsets = [0, 48], sizes = [1, 256], strides = [1, 1]} : vector<1x358xf32> to vector<1x256xf32>
    %87 = vector.broadcast %81 : f32 to vector<1x256xf32>
    %88 = arith.mulf %87, %86 : vector<1x256xf32>
    %89 = arith.addf %85, %88 : vector<1x256xf32>
    %c28 = arith.constant 28 : index
    %90 = memref.load %arg6[%c28] : memref<98xf32, #tpu.memory_space<smem>>
    %c77 = arith.constant 77 : index
    %91 = memref.load %arg6[%c77] : memref<98xf32, #tpu.memory_space<smem>>
    %92 = vector.extract_strided_slice %37 {offsets = [0, 64], sizes = [1, 256], strides = [1, 1]} : vector<1x358xf32> to vector<1x256xf32>
    %93 = vector.broadcast %90 : f32 to vector<1x256xf32>
    %94 = arith.mulf %93, %92 : vector<1x256xf32>
    %95 = arith.addf %89, %94 : vector<1x256xf32>
    %96 = vector.extract_strided_slice %38 {offsets = [0, 64], sizes = [1, 256], strides = [1, 1]} : vector<1x358xf32> to vector<1x256xf32>
    %97 = vector.broadcast %91 : f32 to vector<1x256xf32>
    %98 = arith.mulf %97, %96 : vector<1x256xf32>
    %99 = arith.addf %95, %98 : vector<1x256xf32>
    %c35 = arith.constant 35 : index
    %100 = memref.load %arg6[%c35] : memref<98xf32, #tpu.memory_space<smem>>
    %c84 = arith.constant 84 : index
    %101 = memref.load %arg6[%c84] : memref<98xf32, #tpu.memory_space<smem>>
    %102 = vector.extract_strided_slice %37 {offsets = [0, 80], sizes = [1, 256], strides = [1, 1]} : vector<1x358xf32> to vector<1x256xf32>
    %103 = vector.broadcast %100 : f32 to vector<1x256xf32>
    %104 = arith.mulf %103, %102 : vector<1x256xf32>
    %105 = arith.addf %99, %104 : vector<1x256xf32>
    %106 = vector.extract_strided_slice %38 {offsets = [0, 80], sizes = [1, 256], strides = [1, 1]} : vector<1x358xf32> to vector<1x256xf32>
    %107 = vector.broadcast %101 : f32 to vector<1x256xf32>
    %108 = arith.mulf %107, %106 : vector<1x256xf32>
    %109 = arith.addf %105, %108 : vector<1x256xf32>
    %c42 = arith.constant 42 : index
    %110 = memref.load %arg6[%c42] : memref<98xf32, #tpu.memory_space<smem>>
    %c91 = arith.constant 91 : index
    %111 = memref.load %arg6[%c91] : memref<98xf32, #tpu.memory_space<smem>>
    %112 = vector.extract_strided_slice %37 {offsets = [0, 96], sizes = [1, 256], strides = [1, 1]} : vector<1x358xf32> to vector<1x256xf32>
    %113 = vector.broadcast %110 : f32 to vector<1x256xf32>
    %114 = arith.mulf %113, %112 : vector<1x256xf32>
    %115 = arith.addf %109, %114 : vector<1x256xf32>
    %116 = vector.extract_strided_slice %38 {offsets = [0, 96], sizes = [1, 256], strides = [1, 1]} : vector<1x358xf32> to vector<1x256xf32>
    %117 = vector.broadcast %111 : f32 to vector<1x256xf32>
    %118 = arith.mulf %117, %116 : vector<1x256xf32>
    %119 = arith.addf %115, %118 : vector<1x256xf32>
    %cst_26 = arith.constant 0.000000e+00 : f32
    %120 = vector.broadcast %cst_26 : f32 to vector<1x256xf32>
    %121 = arith.select %48, %119, %120 : vector<1x256xi1>, vector<1x256xf32>
    %122 = arith.addf %39, %121 : vector<1x256xf32>
    %c-2_i32 = arith.constant -2 : i32
    %123 = vector.broadcast %c-2_i32 : i32 to vector<1x256xi32>
    %124 = arith.addi %35, %123 : vector<1x256xi32>
    %c0_i32_27 = arith.constant 0 : i32
    %125 = vector.broadcast %c0_i32_27 : i32 to vector<1x256xi32>
    %126 = arith.cmpi sge, %124, %125 : vector<1x256xi32>
    %c-2_i32_28 = arith.constant -2 : i32
    %127 = vector.broadcast %c-2_i32_28 : i32 to vector<1x256xi32>
    %128 = arith.addi %35, %127 : vector<1x256xi32>
    %c16_i32_29 = arith.constant 16 : i32
    %129 = vector.broadcast %c16_i32_29 : i32 to vector<1x256xi32>
    %130 = arith.cmpi slt, %128, %129 : vector<1x256xi32>
    %131 = arith.andi %126, %130 : vector<1x256xi1>
    %cst_30 = arith.constant 0.000000e+00 : f32
    %132 = vector.broadcast %cst_30 : f32 to vector<1x256xf32>
    %c1 = arith.constant 1 : index
    %133 = memref.load %arg6[%c1] : memref<98xf32, #tpu.memory_space<smem>>
    %c50 = arith.constant 50 : index
    %134 = memref.load %arg6[%c50] : memref<98xf32, #tpu.memory_space<smem>>
    %135 = vector.extract_strided_slice %37 {offsets = [0, 1], sizes = [1, 256], strides = [1, 1]} : vector<1x358xf32> to vector<1x256xf32>
    %136 = vector.broadcast %133 : f32 to vector<1x256xf32>
    %137 = arith.mulf %136, %135 : vector<1x256xf32>
    %138 = arith.addf %132, %137 : vector<1x256xf32>
    %139 = vector.extract_strided_slice %38 {offsets = [0, 1], sizes = [1, 256], strides = [1, 1]} : vector<1x358xf32> to vector<1x256xf32>
    %140 = vector.broadcast %134 : f32 to vector<1x256xf32>
    %141 = arith.mulf %140, %139 : vector<1x256xf32>
    %142 = arith.addf %138, %141 : vector<1x256xf32>
    %c8 = arith.constant 8 : index
    %143 = memref.load %arg6[%c8] : memref<98xf32, #tpu.memory_space<smem>>
    %c57 = arith.constant 57 : index
    %144 = memref.load %arg6[%c57] : memref<98xf32, #tpu.memory_space<smem>>
    %145 = vector.extract_strided_slice %37 {offsets = [0, 17], sizes = [1, 256], strides = [1, 1]} : vector<1x358xf32> to vector<1x256xf32>
    %146 = vector.broadcast %143 : f32 to vector<1x256xf32>
    %147 = arith.mulf %146, %145 : vector<1x256xf32>
    %148 = arith.addf %142, %147 : vector<1x256xf32>
    %149 = vector.extract_strided_slice %38 {offsets = [0, 17], sizes = [1, 256], strides = [1, 1]} : vector<1x358xf32> to vector<1x256xf32>
    %150 = vector.broadcast %144 : f32 to vector<1x256xf32>
    %151 = arith.mulf %150, %149 : vector<1x256xf32>
    %152 = arith.addf %148, %151 : vector<1x256xf32>
    %c15 = arith.constant 15 : index
    %153 = memref.load %arg6[%c15] : memref<98xf32, #tpu.memory_space<smem>>
    %c64 = arith.constant 64 : index
    %154 = memref.load %arg6[%c64] : memref<98xf32, #tpu.memory_space<smem>>
    %155 = vector.extract_strided_slice %37 {offsets = [0, 33], sizes = [1, 256], strides = [1, 1]} : vector<1x358xf32> to vector<1x256xf32>
    %156 = vector.broadcast %153 : f32 to vector<1x256xf32>
    %157 = arith.mulf %156, %155 : vector<1x256xf32>
    %158 = arith.addf %152, %157 : vector<1x256xf32>
    %159 = vector.extract_strided_slice %38 {offsets = [0, 33], sizes = [1, 256], strides = [1, 1]} : vector<1x358xf32> to vector<1x256xf32>
    %160 = vector.broadcast %154 : f32 to vector<1x256xf32>
    %161 = arith.mulf %160, %159 : vector<1x256xf32>
    %162 = arith.addf %158, %161 : vector<1x256xf32>
    %c22 = arith.constant 22 : index
    %163 = memref.load %arg6[%c22] : memref<98xf32, #tpu.memory_space<smem>>
    %c71 = arith.constant 71 : index
    %164 = memref.load %arg6[%c71] : memref<98xf32, #tpu.memory_space<smem>>
    %165 = vector.extract_strided_slice %37 {offsets = [0, 49], sizes = [1, 256], strides = [1, 1]} : vector<1x358xf32> to vector<1x256xf32>
    %166 = vector.broadcast %163 : f32 to vector<1x256xf32>
    %167 = arith.mulf %166, %165 : vector<1x256xf32>
    %168 = arith.addf %162, %167 : vector<1x256xf32>
    %169 = vector.extract_strided_slice %38 {offsets = [0, 49], sizes = [1, 256], strides = [1, 1]} : vector<1x358xf32> to vector<1x256xf32>
    %170 = vector.broadcast %164 : f32 to vector<1x256xf32>
    %171 = arith.mulf %170, %169 : vector<1x256xf32>
    %172 = arith.addf %168, %171 : vector<1x256xf32>
    %c29 = arith.constant 29 : index
    %173 = memref.load %arg6[%c29] : memref<98xf32, #tpu.memory_space<smem>>
    %c78 = arith.constant 78 : index
    %174 = memref.load %arg6[%c78] : memref<98xf32, #tpu.memory_space<smem>>
    %175 = vector.extract_strided_slice %37 {offsets = [0, 65], sizes = [1, 256], strides = [1, 1]} : vector<1x358xf32> to vector<1x256xf32>
    %176 = vector.broadcast %173 : f32 to vector<1x256xf32>
    %177 = arith.mulf %176, %175 : vector<1x256xf32>
    %178 = arith.addf %172, %177 : vector<1x256xf32>
    %179 = vector.extract_strided_slice %38 {offsets = [0, 65], sizes = [1, 256], strides = [1, 1]} : vector<1x358xf32> to vector<1x256xf32>
    %180 = vector.broadcast %174 : f32 to vector<1x256xf32>
    %181 = arith.mulf %180, %179 : vector<1x256xf32>
    %182 = arith.addf %178, %181 : vector<1x256xf32>
    %c36 = arith.constant 36 : index
    %183 = memref.load %arg6[%c36] : memref<98xf32, #tpu.memory_space<smem>>
    %c85 = arith.constant 85 : index
    %184 = memref.load %arg6[%c85] : memref<98xf32, #tpu.memory_space<smem>>
    %185 = vector.extract_strided_slice %37 {offsets = [0, 81], sizes = [1, 256], strides = [1, 1]} : vector<1x358xf32> to vector<1x256xf32>
    %186 = vector.broadcast %183 : f32 to vector<1x256xf32>
    %187 = arith.mulf %186, %185 : vector<1x256xf32>
    %188 = arith.addf %182, %187 : vector<1x256xf32>
    %189 = vector.extract_strided_slice %38 {offsets = [0, 81], sizes = [1, 256], strides = [1, 1]} : vector<1x358xf32> to vector<1x256xf32>
    %190 = vector.broadcast %184 : f32 to vector<1x256xf32>
    %191 = arith.mulf %190, %189 : vector<1x256xf32>
    %192 = arith.addf %188, %191 : vector<1x256xf32>
    %c43 = arith.constant 43 : index
    %193 = memref.load %arg6[%c43] : memref<98xf32, #tpu.memory_space<smem>>
    %c92 = arith.constant 92 : index
    %194 = memref.load %arg6[%c92] : memref<98xf32, #tpu.memory_space<smem>>
    %195 = vector.extract_strided_slice %37 {offsets = [0, 97], sizes = [1, 256], strides = [1, 1]} : vector<1x358xf32> to vector<1x256xf32>
    %196 = vector.broadcast %193 : f32 to vector<1x256xf32>
    %197 = arith.mulf %196, %195 : vector<1x256xf32>
    %198 = arith.addf %192, %197 : vector<1x256xf32>
    %199 = vector.extract_strided_slice %38 {offsets = [0, 97], sizes = [1, 256], strides = [1, 1]} : vector<1x358xf32> to vector<1x256xf32>
    %200 = vector.broadcast %194 : f32 to vector<1x256xf32>
    %201 = arith.mulf %200, %199 : vector<1x256xf32>
    %202 = arith.addf %198, %201 : vector<1x256xf32>
    %cst_31 = arith.constant 0.000000e+00 : f32
    %203 = vector.broadcast %cst_31 : f32 to vector<1x256xf32>
    %204 = arith.select %131, %202, %203 : vector<1x256xi1>, vector<1x256xf32>
    %205 = arith.addf %122, %204 : vector<1x256xf32>
    %c-1_i32 = arith.constant -1 : i32
    %206 = vector.broadcast %c-1_i32 : i32 to vector<1x256xi32>
    %207 = arith.addi %35, %206 : vector<1x256xi32>
    %c0_i32_32 = arith.constant 0 : i32
    %208 = vector.broadcast %c0_i32_32 : i32 to vector<1x256xi32>
    %209 = arith.cmpi sge, %207, %208 : vector<1x256xi32>
    %c-1_i32_33 = arith.constant -1 : i32
    %210 = vector.broadcast %c-1_i32_33 : i32 to vector<1x256xi32>
    %211 = arith.addi %35, %210 : vector<1x256xi32>
    %c16_i32_34 = arith.constant 16 : i32
    %212 = vector.broadcast %c16_i32_34 : i32 to vector<1x256xi32>
    %213 = arith.cmpi slt, %211, %212 : vector<1x256xi32>
    %214 = arith.andi %209, %213 : vector<1x256xi1>
    %cst_35 = arith.constant 0.000000e+00 : f32
    %215 = vector.broadcast %cst_35 : f32 to vector<1x256xf32>
    %c2 = arith.constant 2 : index
    %216 = memref.load %arg6[%c2] : memref<98xf32, #tpu.memory_space<smem>>
    %c51 = arith.constant 51 : index
    %217 = memref.load %arg6[%c51] : memref<98xf32, #tpu.memory_space<smem>>
    %218 = vector.extract_strided_slice %37 {offsets = [0, 2], sizes = [1, 256], strides = [1, 1]} : vector<1x358xf32> to vector<1x256xf32>
    %219 = vector.broadcast %216 : f32 to vector<1x256xf32>
    %220 = arith.mulf %219, %218 : vector<1x256xf32>
    %221 = arith.addf %215, %220 : vector<1x256xf32>
    %222 = vector.extract_strided_slice %38 {offsets = [0, 2], sizes = [1, 256], strides = [1, 1]} : vector<1x358xf32> to vector<1x256xf32>
    %223 = vector.broadcast %217 : f32 to vector<1x256xf32>
    %224 = arith.mulf %223, %222 : vector<1x256xf32>
    %225 = arith.addf %221, %224 : vector<1x256xf32>
    %c9 = arith.constant 9 : index
    %226 = memref.load %arg6[%c9] : memref<98xf32, #tpu.memory_space<smem>>
    %c58 = arith.constant 58 : index
    %227 = memref.load %arg6[%c58] : memref<98xf32, #tpu.memory_space<smem>>
    %228 = vector.extract_strided_slice %37 {offsets = [0, 18], sizes = [1, 256], strides = [1, 1]} : vector<1x358xf32> to vector<1x256xf32>
    %229 = vector.broadcast %226 : f32 to vector<1x256xf32>
    %230 = arith.mulf %229, %228 : vector<1x256xf32>
    %231 = arith.addf %225, %230 : vector<1x256xf32>
    %232 = vector.extract_strided_slice %38 {offsets = [0, 18], sizes = [1, 256], strides = [1, 1]} : vector<1x358xf32> to vector<1x256xf32>
    %233 = vector.broadcast %227 : f32 to vector<1x256xf32>
    %234 = arith.mulf %233, %232 : vector<1x256xf32>
    %235 = arith.addf %231, %234 : vector<1x256xf32>
    %c16 = arith.constant 16 : index
    %236 = memref.load %arg6[%c16] : memref<98xf32, #tpu.memory_space<smem>>
    %c65 = arith.constant 65 : index
    %237 = memref.load %arg6[%c65] : memref<98xf32, #tpu.memory_space<smem>>
    %238 = vector.extract_strided_slice %37 {offsets = [0, 34], sizes = [1, 256], strides = [1, 1]} : vector<1x358xf32> to vector<1x256xf32>
    %239 = vector.broadcast %236 : f32 to vector<1x256xf32>
    %240 = arith.mulf %239, %238 : vector<1x256xf32>
    %241 = arith.addf %235, %240 : vector<1x256xf32>
    %242 = vector.extract_strided_slice %38 {offsets = [0, 34], sizes = [1, 256], strides = [1, 1]} : vector<1x358xf32> to vector<1x256xf32>
    %243 = vector.broadcast %237 : f32 to vector<1x256xf32>
    %244 = arith.mulf %243, %242 : vector<1x256xf32>
    %245 = arith.addf %241, %244 : vector<1x256xf32>
    %c23 = arith.constant 23 : index
    %246 = memref.load %arg6[%c23] : memref<98xf32, #tpu.memory_space<smem>>
    %c72 = arith.constant 72 : index
    %247 = memref.load %arg6[%c72] : memref<98xf32, #tpu.memory_space<smem>>
    %248 = vector.extract_strided_slice %37 {offsets = [0, 50], sizes = [1, 256], strides = [1, 1]} : vector<1x358xf32> to vector<1x256xf32>
    %249 = vector.broadcast %246 : f32 to vector<1x256xf32>
    %250 = arith.mulf %249, %248 : vector<1x256xf32>
    %251 = arith.addf %245, %250 : vector<1x256xf32>
    %252 = vector.extract_strided_slice %38 {offsets = [0, 50], sizes = [1, 256], strides = [1, 1]} : vector<1x358xf32> to vector<1x256xf32>
    %253 = vector.broadcast %247 : f32 to vector<1x256xf32>
    %254 = arith.mulf %253, %252 : vector<1x256xf32>
    %255 = arith.addf %251, %254 : vector<1x256xf32>
    %c30 = arith.constant 30 : index
    %256 = memref.load %arg6[%c30] : memref<98xf32, #tpu.memory_space<smem>>
    %c79 = arith.constant 79 : index
    %257 = memref.load %arg6[%c79] : memref<98xf32, #tpu.memory_space<smem>>
    %258 = vector.extract_strided_slice %37 {offsets = [0, 66], sizes = [1, 256], strides = [1, 1]} : vector<1x358xf32> to vector<1x256xf32>
    %259 = vector.broadcast %256 : f32 to vector<1x256xf32>
    %260 = arith.mulf %259, %258 : vector<1x256xf32>
    %261 = arith.addf %255, %260 : vector<1x256xf32>
    %262 = vector.extract_strided_slice %38 {offsets = [0, 66], sizes = [1, 256], strides = [1, 1]} : vector<1x358xf32> to vector<1x256xf32>
    %263 = vector.broadcast %257 : f32 to vector<1x256xf32>
    %264 = arith.mulf %263, %262 : vector<1x256xf32>
    %265 = arith.addf %261, %264 : vector<1x256xf32>
    %c37 = arith.constant 37 : index
    %266 = memref.load %arg6[%c37] : memref<98xf32, #tpu.memory_space<smem>>
    %c86 = arith.constant 86 : index
    %267 = memref.load %arg6[%c86] : memref<98xf32, #tpu.memory_space<smem>>
    %268 = vector.extract_strided_slice %37 {offsets = [0, 82], sizes = [1, 256], strides = [1, 1]} : vector<1x358xf32> to vector<1x256xf32>
    %269 = vector.broadcast %266 : f32 to vector<1x256xf32>
    %270 = arith.mulf %269, %268 : vector<1x256xf32>
    %271 = arith.addf %265, %270 : vector<1x256xf32>
    %272 = vector.extract_strided_slice %38 {offsets = [0, 82], sizes = [1, 256], strides = [1, 1]} : vector<1x358xf32> to vector<1x256xf32>
    %273 = vector.broadcast %267 : f32 to vector<1x256xf32>
    %274 = arith.mulf %273, %272 : vector<1x256xf32>
    %275 = arith.addf %271, %274 : vector<1x256xf32>
    %c44 = arith.constant 44 : index
    %276 = memref.load %arg6[%c44] : memref<98xf32, #tpu.memory_space<smem>>
    %c93 = arith.constant 93 : index
    %277 = memref.load %arg6[%c93] : memref<98xf32, #tpu.memory_space<smem>>
    %278 = vector.extract_strided_slice %37 {offsets = [0, 98], sizes = [1, 256], strides = [1, 1]} : vector<1x358xf32> to vector<1x256xf32>
    %279 = vector.broadcast %276 : f32 to vector<1x256xf32>
    %280 = arith.mulf %279, %278 : vector<1x256xf32>
    %281 = arith.addf %275, %280 : vector<1x256xf32>
    %282 = vector.extract_strided_slice %38 {offsets = [0, 98], sizes = [1, 256], strides = [1, 1]} : vector<1x358xf32> to vector<1x256xf32>
    %283 = vector.broadcast %277 : f32 to vector<1x256xf32>
    %284 = arith.mulf %283, %282 : vector<1x256xf32>
    %285 = arith.addf %281, %284 : vector<1x256xf32>
    %cst_36 = arith.constant 0.000000e+00 : f32
    %286 = vector.broadcast %cst_36 : f32 to vector<1x256xf32>
    %287 = arith.select %214, %285, %286 : vector<1x256xi1>, vector<1x256xf32>
    %288 = arith.addf %205, %287 : vector<1x256xf32>
    %c0_i32_37 = arith.constant 0 : i32
    %289 = vector.broadcast %c0_i32_37 : i32 to vector<1x256xi32>
    %290 = arith.addi %35, %289 : vector<1x256xi32>
    %c0_i32_38 = arith.constant 0 : i32
    %291 = vector.broadcast %c0_i32_38 : i32 to vector<1x256xi32>
    %292 = arith.cmpi sge, %290, %291 : vector<1x256xi32>
    %c0_i32_39 = arith.constant 0 : i32
    %293 = vector.broadcast %c0_i32_39 : i32 to vector<1x256xi32>
    %294 = arith.addi %35, %293 : vector<1x256xi32>
    %c16_i32_40 = arith.constant 16 : i32
    %295 = vector.broadcast %c16_i32_40 : i32 to vector<1x256xi32>
    %296 = arith.cmpi slt, %294, %295 : vector<1x256xi32>
    %297 = arith.andi %292, %296 : vector<1x256xi1>
    %cst_41 = arith.constant 0.000000e+00 : f32
    %298 = vector.broadcast %cst_41 : f32 to vector<1x256xf32>
    %c3 = arith.constant 3 : index
    %299 = memref.load %arg6[%c3] : memref<98xf32, #tpu.memory_space<smem>>
    %c52 = arith.constant 52 : index
    %300 = memref.load %arg6[%c52] : memref<98xf32, #tpu.memory_space<smem>>
    %301 = vector.extract_strided_slice %37 {offsets = [0, 3], sizes = [1, 256], strides = [1, 1]} : vector<1x358xf32> to vector<1x256xf32>
    %302 = vector.broadcast %299 : f32 to vector<1x256xf32>
    %303 = arith.mulf %302, %301 : vector<1x256xf32>
    %304 = arith.addf %298, %303 : vector<1x256xf32>
    %305 = vector.extract_strided_slice %38 {offsets = [0, 3], sizes = [1, 256], strides = [1, 1]} : vector<1x358xf32> to vector<1x256xf32>
    %306 = vector.broadcast %300 : f32 to vector<1x256xf32>
    %307 = arith.mulf %306, %305 : vector<1x256xf32>
    %308 = arith.addf %304, %307 : vector<1x256xf32>
    %c10 = arith.constant 10 : index
    %309 = memref.load %arg6[%c10] : memref<98xf32, #tpu.memory_space<smem>>
    %c59 = arith.constant 59 : index
    %310 = memref.load %arg6[%c59] : memref<98xf32, #tpu.memory_space<smem>>
    %311 = vector.extract_strided_slice %37 {offsets = [0, 19], sizes = [1, 256], strides = [1, 1]} : vector<1x358xf32> to vector<1x256xf32>
    %312 = vector.broadcast %309 : f32 to vector<1x256xf32>
    %313 = arith.mulf %312, %311 : vector<1x256xf32>
    %314 = arith.addf %308, %313 : vector<1x256xf32>
    %315 = vector.extract_strided_slice %38 {offsets = [0, 19], sizes = [1, 256], strides = [1, 1]} : vector<1x358xf32> to vector<1x256xf32>
    %316 = vector.broadcast %310 : f32 to vector<1x256xf32>
    %317 = arith.mulf %316, %315 : vector<1x256xf32>
    %318 = arith.addf %314, %317 : vector<1x256xf32>
    %c17 = arith.constant 17 : index
    %319 = memref.load %arg6[%c17] : memref<98xf32, #tpu.memory_space<smem>>
    %c66 = arith.constant 66 : index
    %320 = memref.load %arg6[%c66] : memref<98xf32, #tpu.memory_space<smem>>
    %321 = vector.extract_strided_slice %37 {offsets = [0, 35], sizes = [1, 256], strides = [1, 1]} : vector<1x358xf32> to vector<1x256xf32>
    %322 = vector.broadcast %319 : f32 to vector<1x256xf32>
    %323 = arith.mulf %322, %321 : vector<1x256xf32>
    %324 = arith.addf %318, %323 : vector<1x256xf32>
    %325 = vector.extract_strided_slice %38 {offsets = [0, 35], sizes = [1, 256], strides = [1, 1]} : vector<1x358xf32> to vector<1x256xf32>
    %326 = vector.broadcast %320 : f32 to vector<1x256xf32>
    %327 = arith.mulf %326, %325 : vector<1x256xf32>
    %328 = arith.addf %324, %327 : vector<1x256xf32>
    %c24 = arith.constant 24 : index
    %329 = memref.load %arg6[%c24] : memref<98xf32, #tpu.memory_space<smem>>
    %c73 = arith.constant 73 : index
    %330 = memref.load %arg6[%c73] : memref<98xf32, #tpu.memory_space<smem>>
    %331 = vector.extract_strided_slice %37 {offsets = [0, 51], sizes = [1, 256], strides = [1, 1]} : vector<1x358xf32> to vector<1x256xf32>
    %332 = vector.broadcast %329 : f32 to vector<1x256xf32>
    %333 = arith.mulf %332, %331 : vector<1x256xf32>
    %334 = arith.addf %328, %333 : vector<1x256xf32>
    %335 = vector.extract_strided_slice %38 {offsets = [0, 51], sizes = [1, 256], strides = [1, 1]} : vector<1x358xf32> to vector<1x256xf32>
    %336 = vector.broadcast %330 : f32 to vector<1x256xf32>
    %337 = arith.mulf %336, %335 : vector<1x256xf32>
    %338 = arith.addf %334, %337 : vector<1x256xf32>
    %c31 = arith.constant 31 : index
    %339 = memref.load %arg6[%c31] : memref<98xf32, #tpu.memory_space<smem>>
    %c80 = arith.constant 80 : index
    %340 = memref.load %arg6[%c80] : memref<98xf32, #tpu.memory_space<smem>>
    %341 = vector.extract_strided_slice %37 {offsets = [0, 67], sizes = [1, 256], strides = [1, 1]} : vector<1x358xf32> to vector<1x256xf32>
    %342 = vector.broadcast %339 : f32 to vector<1x256xf32>
    %343 = arith.mulf %342, %341 : vector<1x256xf32>
    %344 = arith.addf %338, %343 : vector<1x256xf32>
    %345 = vector.extract_strided_slice %38 {offsets = [0, 67], sizes = [1, 256], strides = [1, 1]} : vector<1x358xf32> to vector<1x256xf32>
    %346 = vector.broadcast %340 : f32 to vector<1x256xf32>
    %347 = arith.mulf %346, %345 : vector<1x256xf32>
    %348 = arith.addf %344, %347 : vector<1x256xf32>
    %c38 = arith.constant 38 : index
    %349 = memref.load %arg6[%c38] : memref<98xf32, #tpu.memory_space<smem>>
    %c87 = arith.constant 87 : index
    %350 = memref.load %arg6[%c87] : memref<98xf32, #tpu.memory_space<smem>>
    %351 = vector.extract_strided_slice %37 {offsets = [0, 83], sizes = [1, 256], strides = [1, 1]} : vector<1x358xf32> to vector<1x256xf32>
    %352 = vector.broadcast %349 : f32 to vector<1x256xf32>
    %353 = arith.mulf %352, %351 : vector<1x256xf32>
    %354 = arith.addf %348, %353 : vector<1x256xf32>
    %355 = vector.extract_strided_slice %38 {offsets = [0, 83], sizes = [1, 256], strides = [1, 1]} : vector<1x358xf32> to vector<1x256xf32>
    %356 = vector.broadcast %350 : f32 to vector<1x256xf32>
    %357 = arith.mulf %356, %355 : vector<1x256xf32>
    %358 = arith.addf %354, %357 : vector<1x256xf32>
    %c45 = arith.constant 45 : index
    %359 = memref.load %arg6[%c45] : memref<98xf32, #tpu.memory_space<smem>>
    %c94 = arith.constant 94 : index
    %360 = memref.load %arg6[%c94] : memref<98xf32, #tpu.memory_space<smem>>
    %361 = vector.extract_strided_slice %37 {offsets = [0, 99], sizes = [1, 256], strides = [1, 1]} : vector<1x358xf32> to vector<1x256xf32>
    %362 = vector.broadcast %359 : f32 to vector<1x256xf32>
    %363 = arith.mulf %362, %361 : vector<1x256xf32>
    %364 = arith.addf %358, %363 : vector<1x256xf32>
    %365 = vector.extract_strided_slice %38 {offsets = [0, 99], sizes = [1, 256], strides = [1, 1]} : vector<1x358xf32> to vector<1x256xf32>
    %366 = vector.broadcast %360 : f32 to vector<1x256xf32>
    %367 = arith.mulf %366, %365 : vector<1x256xf32>
    %368 = arith.addf %364, %367 : vector<1x256xf32>
    %cst_42 = arith.constant 0.000000e+00 : f32
    %369 = vector.broadcast %cst_42 : f32 to vector<1x256xf32>
    %370 = arith.select %297, %368, %369 : vector<1x256xi1>, vector<1x256xf32>
    %371 = arith.addf %288, %370 : vector<1x256xf32>
    %c1_i32 = arith.constant 1 : i32
    %372 = vector.broadcast %c1_i32 : i32 to vector<1x256xi32>
    %373 = arith.addi %35, %372 : vector<1x256xi32>
    %c0_i32_43 = arith.constant 0 : i32
    %374 = vector.broadcast %c0_i32_43 : i32 to vector<1x256xi32>
    %375 = arith.cmpi sge, %373, %374 : vector<1x256xi32>
    %c1_i32_44 = arith.constant 1 : i32
    %376 = vector.broadcast %c1_i32_44 : i32 to vector<1x256xi32>
    %377 = arith.addi %35, %376 : vector<1x256xi32>
    %c16_i32_45 = arith.constant 16 : i32
    %378 = vector.broadcast %c16_i32_45 : i32 to vector<1x256xi32>
    %379 = arith.cmpi slt, %377, %378 : vector<1x256xi32>
    %380 = arith.andi %375, %379 : vector<1x256xi1>
    %cst_46 = arith.constant 0.000000e+00 : f32
    %381 = vector.broadcast %cst_46 : f32 to vector<1x256xf32>
    %c4 = arith.constant 4 : index
    %382 = memref.load %arg6[%c4] : memref<98xf32, #tpu.memory_space<smem>>
    %c53 = arith.constant 53 : index
    %383 = memref.load %arg6[%c53] : memref<98xf32, #tpu.memory_space<smem>>
    %384 = vector.extract_strided_slice %37 {offsets = [0, 4], sizes = [1, 256], strides = [1, 1]} : vector<1x358xf32> to vector<1x256xf32>
    %385 = vector.broadcast %382 : f32 to vector<1x256xf32>
    %386 = arith.mulf %385, %384 : vector<1x256xf32>
    %387 = arith.addf %381, %386 : vector<1x256xf32>
    %388 = vector.extract_strided_slice %38 {offsets = [0, 4], sizes = [1, 256], strides = [1, 1]} : vector<1x358xf32> to vector<1x256xf32>
    %389 = vector.broadcast %383 : f32 to vector<1x256xf32>
    %390 = arith.mulf %389, %388 : vector<1x256xf32>
    %391 = arith.addf %387, %390 : vector<1x256xf32>
    %c11 = arith.constant 11 : index
    %392 = memref.load %arg6[%c11] : memref<98xf32, #tpu.memory_space<smem>>
    %c60 = arith.constant 60 : index
    %393 = memref.load %arg6[%c60] : memref<98xf32, #tpu.memory_space<smem>>
    %394 = vector.extract_strided_slice %37 {offsets = [0, 20], sizes = [1, 256], strides = [1, 1]} : vector<1x358xf32> to vector<1x256xf32>
    %395 = vector.broadcast %392 : f32 to vector<1x256xf32>
    %396 = arith.mulf %395, %394 : vector<1x256xf32>
    %397 = arith.addf %391, %396 : vector<1x256xf32>
    %398 = vector.extract_strided_slice %38 {offsets = [0, 20], sizes = [1, 256], strides = [1, 1]} : vector<1x358xf32> to vector<1x256xf32>
    %399 = vector.broadcast %393 : f32 to vector<1x256xf32>
    %400 = arith.mulf %399, %398 : vector<1x256xf32>
    %401 = arith.addf %397, %400 : vector<1x256xf32>
    %c18 = arith.constant 18 : index
    %402 = memref.load %arg6[%c18] : memref<98xf32, #tpu.memory_space<smem>>
    %c67 = arith.constant 67 : index
    %403 = memref.load %arg6[%c67] : memref<98xf32, #tpu.memory_space<smem>>
    %404 = vector.extract_strided_slice %37 {offsets = [0, 36], sizes = [1, 256], strides = [1, 1]} : vector<1x358xf32> to vector<1x256xf32>
    %405 = vector.broadcast %402 : f32 to vector<1x256xf32>
    %406 = arith.mulf %405, %404 : vector<1x256xf32>
    %407 = arith.addf %401, %406 : vector<1x256xf32>
    %408 = vector.extract_strided_slice %38 {offsets = [0, 36], sizes = [1, 256], strides = [1, 1]} : vector<1x358xf32> to vector<1x256xf32>
    %409 = vector.broadcast %403 : f32 to vector<1x256xf32>
    %410 = arith.mulf %409, %408 : vector<1x256xf32>
    %411 = arith.addf %407, %410 : vector<1x256xf32>
    %c25 = arith.constant 25 : index
    %412 = memref.load %arg6[%c25] : memref<98xf32, #tpu.memory_space<smem>>
    %c74 = arith.constant 74 : index
    %413 = memref.load %arg6[%c74] : memref<98xf32, #tpu.memory_space<smem>>
    %414 = vector.extract_strided_slice %37 {offsets = [0, 52], sizes = [1, 256], strides = [1, 1]} : vector<1x358xf32> to vector<1x256xf32>
    %415 = vector.broadcast %412 : f32 to vector<1x256xf32>
    %416 = arith.mulf %415, %414 : vector<1x256xf32>
    %417 = arith.addf %411, %416 : vector<1x256xf32>
    %418 = vector.extract_strided_slice %38 {offsets = [0, 52], sizes = [1, 256], strides = [1, 1]} : vector<1x358xf32> to vector<1x256xf32>
    %419 = vector.broadcast %413 : f32 to vector<1x256xf32>
    %420 = arith.mulf %419, %418 : vector<1x256xf32>
    %421 = arith.addf %417, %420 : vector<1x256xf32>
    %c32 = arith.constant 32 : index
    %422 = memref.load %arg6[%c32] : memref<98xf32, #tpu.memory_space<smem>>
    %c81 = arith.constant 81 : index
    %423 = memref.load %arg6[%c81] : memref<98xf32, #tpu.memory_space<smem>>
    %424 = vector.extract_strided_slice %37 {offsets = [0, 68], sizes = [1, 256], strides = [1, 1]} : vector<1x358xf32> to vector<1x256xf32>
    %425 = vector.broadcast %422 : f32 to vector<1x256xf32>
    %426 = arith.mulf %425, %424 : vector<1x256xf32>
    %427 = arith.addf %421, %426 : vector<1x256xf32>
    %428 = vector.extract_strided_slice %38 {offsets = [0, 68], sizes = [1, 256], strides = [1, 1]} : vector<1x358xf32> to vector<1x256xf32>
    %429 = vector.broadcast %423 : f32 to vector<1x256xf32>
    %430 = arith.mulf %429, %428 : vector<1x256xf32>
    %431 = arith.addf %427, %430 : vector<1x256xf32>
    %c39 = arith.constant 39 : index
    %432 = memref.load %arg6[%c39] : memref<98xf32, #tpu.memory_space<smem>>
    %c88 = arith.constant 88 : index
    %433 = memref.load %arg6[%c88] : memref<98xf32, #tpu.memory_space<smem>>
    %434 = vector.extract_strided_slice %37 {offsets = [0, 84], sizes = [1, 256], strides = [1, 1]} : vector<1x358xf32> to vector<1x256xf32>
    %435 = vector.broadcast %432 : f32 to vector<1x256xf32>
    %436 = arith.mulf %435, %434 : vector<1x256xf32>
    %437 = arith.addf %431, %436 : vector<1x256xf32>
    %438 = vector.extract_strided_slice %38 {offsets = [0, 84], sizes = [1, 256], strides = [1, 1]} : vector<1x358xf32> to vector<1x256xf32>
    %439 = vector.broadcast %433 : f32 to vector<1x256xf32>
    %440 = arith.mulf %439, %438 : vector<1x256xf32>
    %441 = arith.addf %437, %440 : vector<1x256xf32>
    %c46 = arith.constant 46 : index
    %442 = memref.load %arg6[%c46] : memref<98xf32, #tpu.memory_space<smem>>
    %c95 = arith.constant 95 : index
    %443 = memref.load %arg6[%c95] : memref<98xf32, #tpu.memory_space<smem>>
    %444 = vector.extract_strided_slice %37 {offsets = [0, 100], sizes = [1, 256], strides = [1, 1]} : vector<1x358xf32> to vector<1x256xf32>
    %445 = vector.broadcast %442 : f32 to vector<1x256xf32>
    %446 = arith.mulf %445, %444 : vector<1x256xf32>
    %447 = arith.addf %441, %446 : vector<1x256xf32>
    %448 = vector.extract_strided_slice %38 {offsets = [0, 100], sizes = [1, 256], strides = [1, 1]} : vector<1x358xf32> to vector<1x256xf32>
    %449 = vector.broadcast %443 : f32 to vector<1x256xf32>
    %450 = arith.mulf %449, %448 : vector<1x256xf32>
    %451 = arith.addf %447, %450 : vector<1x256xf32>
    %cst_47 = arith.constant 0.000000e+00 : f32
    %452 = vector.broadcast %cst_47 : f32 to vector<1x256xf32>
    %453 = arith.select %380, %451, %452 : vector<1x256xi1>, vector<1x256xf32>
    %454 = arith.addf %371, %453 : vector<1x256xf32>
    %c2_i32 = arith.constant 2 : i32
    %455 = vector.broadcast %c2_i32 : i32 to vector<1x256xi32>
    %456 = arith.addi %35, %455 : vector<1x256xi32>
    %c0_i32_48 = arith.constant 0 : i32
    %457 = vector.broadcast %c0_i32_48 : i32 to vector<1x256xi32>
    %458 = arith.cmpi sge, %456, %457 : vector<1x256xi32>
    %c2_i32_49 = arith.constant 2 : i32
    %459 = vector.broadcast %c2_i32_49 : i32 to vector<1x256xi32>
    %460 = arith.addi %35, %459 : vector<1x256xi32>
    %c16_i32_50 = arith.constant 16 : i32
    %461 = vector.broadcast %c16_i32_50 : i32 to vector<1x256xi32>
    %462 = arith.cmpi slt, %460, %461 : vector<1x256xi32>
    %463 = arith.andi %458, %462 : vector<1x256xi1>
    %cst_51 = arith.constant 0.000000e+00 : f32
    %464 = vector.broadcast %cst_51 : f32 to vector<1x256xf32>
    %c5 = arith.constant 5 : index
    %465 = memref.load %arg6[%c5] : memref<98xf32, #tpu.memory_space<smem>>
    %c54 = arith.constant 54 : index
    %466 = memref.load %arg6[%c54] : memref<98xf32, #tpu.memory_space<smem>>
    %467 = vector.extract_strided_slice %37 {offsets = [0, 5], sizes = [1, 256], strides = [1, 1]} : vector<1x358xf32> to vector<1x256xf32>
    %468 = vector.broadcast %465 : f32 to vector<1x256xf32>
    %469 = arith.mulf %468, %467 : vector<1x256xf32>
    %470 = arith.addf %464, %469 : vector<1x256xf32>
    %471 = vector.extract_strided_slice %38 {offsets = [0, 5], sizes = [1, 256], strides = [1, 1]} : vector<1x358xf32> to vector<1x256xf32>
    %472 = vector.broadcast %466 : f32 to vector<1x256xf32>
    %473 = arith.mulf %472, %471 : vector<1x256xf32>
    %474 = arith.addf %470, %473 : vector<1x256xf32>
    %c12 = arith.constant 12 : index
    %475 = memref.load %arg6[%c12] : memref<98xf32, #tpu.memory_space<smem>>
    %c61 = arith.constant 61 : index
    %476 = memref.load %arg6[%c61] : memref<98xf32, #tpu.memory_space<smem>>
    %477 = vector.extract_strided_slice %37 {offsets = [0, 21], sizes = [1, 256], strides = [1, 1]} : vector<1x358xf32> to vector<1x256xf32>
    %478 = vector.broadcast %475 : f32 to vector<1x256xf32>
    %479 = arith.mulf %478, %477 : vector<1x256xf32>
    %480 = arith.addf %474, %479 : vector<1x256xf32>
    %481 = vector.extract_strided_slice %38 {offsets = [0, 21], sizes = [1, 256], strides = [1, 1]} : vector<1x358xf32> to vector<1x256xf32>
    %482 = vector.broadcast %476 : f32 to vector<1x256xf32>
    %483 = arith.mulf %482, %481 : vector<1x256xf32>
    %484 = arith.addf %480, %483 : vector<1x256xf32>
    %c19 = arith.constant 19 : index
    %485 = memref.load %arg6[%c19] : memref<98xf32, #tpu.memory_space<smem>>
    %c68 = arith.constant 68 : index
    %486 = memref.load %arg6[%c68] : memref<98xf32, #tpu.memory_space<smem>>
    %487 = vector.extract_strided_slice %37 {offsets = [0, 37], sizes = [1, 256], strides = [1, 1]} : vector<1x358xf32> to vector<1x256xf32>
    %488 = vector.broadcast %485 : f32 to vector<1x256xf32>
    %489 = arith.mulf %488, %487 : vector<1x256xf32>
    %490 = arith.addf %484, %489 : vector<1x256xf32>
    %491 = vector.extract_strided_slice %38 {offsets = [0, 37], sizes = [1, 256], strides = [1, 1]} : vector<1x358xf32> to vector<1x256xf32>
    %492 = vector.broadcast %486 : f32 to vector<1x256xf32>
    %493 = arith.mulf %492, %491 : vector<1x256xf32>
    %494 = arith.addf %490, %493 : vector<1x256xf32>
    %c26 = arith.constant 26 : index
    %495 = memref.load %arg6[%c26] : memref<98xf32, #tpu.memory_space<smem>>
    %c75 = arith.constant 75 : index
    %496 = memref.load %arg6[%c75] : memref<98xf32, #tpu.memory_space<smem>>
    %497 = vector.extract_strided_slice %37 {offsets = [0, 53], sizes = [1, 256], strides = [1, 1]} : vector<1x358xf32> to vector<1x256xf32>
    %498 = vector.broadcast %495 : f32 to vector<1x256xf32>
    %499 = arith.mulf %498, %497 : vector<1x256xf32>
    %500 = arith.addf %494, %499 : vector<1x256xf32>
    %501 = vector.extract_strided_slice %38 {offsets = [0, 53], sizes = [1, 256], strides = [1, 1]} : vector<1x358xf32> to vector<1x256xf32>
    %502 = vector.broadcast %496 : f32 to vector<1x256xf32>
    %503 = arith.mulf %502, %501 : vector<1x256xf32>
    %504 = arith.addf %500, %503 : vector<1x256xf32>
    %c33 = arith.constant 33 : index
    %505 = memref.load %arg6[%c33] : memref<98xf32, #tpu.memory_space<smem>>
    %c82 = arith.constant 82 : index
    %506 = memref.load %arg6[%c82] : memref<98xf32, #tpu.memory_space<smem>>
    %507 = vector.extract_strided_slice %37 {offsets = [0, 69], sizes = [1, 256], strides = [1, 1]} : vector<1x358xf32> to vector<1x256xf32>
    %508 = vector.broadcast %505 : f32 to vector<1x256xf32>
    %509 = arith.mulf %508, %507 : vector<1x256xf32>
    %510 = arith.addf %504, %509 : vector<1x256xf32>
    %511 = vector.extract_strided_slice %38 {offsets = [0, 69], sizes = [1, 256], strides = [1, 1]} : vector<1x358xf32> to vector<1x256xf32>
    %512 = vector.broadcast %506 : f32 to vector<1x256xf32>
    %513 = arith.mulf %512, %511 : vector<1x256xf32>
    %514 = arith.addf %510, %513 : vector<1x256xf32>
    %c40 = arith.constant 40 : index
    %515 = memref.load %arg6[%c40] : memref<98xf32, #tpu.memory_space<smem>>
    %c89 = arith.constant 89 : index
    %516 = memref.load %arg6[%c89] : memref<98xf32, #tpu.memory_space<smem>>
    %517 = vector.extract_strided_slice %37 {offsets = [0, 85], sizes = [1, 256], strides = [1, 1]} : vector<1x358xf32> to vector<1x256xf32>
    %518 = vector.broadcast %515 : f32 to vector<1x256xf32>
    %519 = arith.mulf %518, %517 : vector<1x256xf32>
    %520 = arith.addf %514, %519 : vector<1x256xf32>
    %521 = vector.extract_strided_slice %38 {offsets = [0, 85], sizes = [1, 256], strides = [1, 1]} : vector<1x358xf32> to vector<1x256xf32>
    %522 = vector.broadcast %516 : f32 to vector<1x256xf32>
    %523 = arith.mulf %522, %521 : vector<1x256xf32>
    %524 = arith.addf %520, %523 : vector<1x256xf32>
    %c47 = arith.constant 47 : index
    %525 = memref.load %arg6[%c47] : memref<98xf32, #tpu.memory_space<smem>>
    %c96 = arith.constant 96 : index
    %526 = memref.load %arg6[%c96] : memref<98xf32, #tpu.memory_space<smem>>
    %527 = vector.extract_strided_slice %37 {offsets = [0, 101], sizes = [1, 256], strides = [1, 1]} : vector<1x358xf32> to vector<1x256xf32>
    %528 = vector.broadcast %525 : f32 to vector<1x256xf32>
    %529 = arith.mulf %528, %527 : vector<1x256xf32>
    %530 = arith.addf %524, %529 : vector<1x256xf32>
    %531 = vector.extract_strided_slice %38 {offsets = [0, 101], sizes = [1, 256], strides = [1, 1]} : vector<1x358xf32> to vector<1x256xf32>
    %532 = vector.broadcast %526 : f32 to vector<1x256xf32>
    %533 = arith.mulf %532, %531 : vector<1x256xf32>
    %534 = arith.addf %530, %533 : vector<1x256xf32>
    %cst_52 = arith.constant 0.000000e+00 : f32
    %535 = vector.broadcast %cst_52 : f32 to vector<1x256xf32>
    %536 = arith.select %463, %534, %535 : vector<1x256xi1>, vector<1x256xf32>
    %537 = arith.addf %454, %536 : vector<1x256xf32>
    %c3_i32 = arith.constant 3 : i32
    %538 = vector.broadcast %c3_i32 : i32 to vector<1x256xi32>
    %539 = arith.addi %35, %538 : vector<1x256xi32>
    %c0_i32_53 = arith.constant 0 : i32
    %540 = vector.broadcast %c0_i32_53 : i32 to vector<1x256xi32>
    %541 = arith.cmpi sge, %539, %540 : vector<1x256xi32>
    %c3_i32_54 = arith.constant 3 : i32
    %542 = vector.broadcast %c3_i32_54 : i32 to vector<1x256xi32>
    %543 = arith.addi %35, %542 : vector<1x256xi32>
    %c16_i32_55 = arith.constant 16 : i32
    %544 = vector.broadcast %c16_i32_55 : i32 to vector<1x256xi32>
    %545 = arith.cmpi slt, %543, %544 : vector<1x256xi32>
    %546 = arith.andi %541, %545 : vector<1x256xi1>
    %cst_56 = arith.constant 0.000000e+00 : f32
    %547 = vector.broadcast %cst_56 : f32 to vector<1x256xf32>
    %c6 = arith.constant 6 : index
    %548 = memref.load %arg6[%c6] : memref<98xf32, #tpu.memory_space<smem>>
    %c55 = arith.constant 55 : index
    %549 = memref.load %arg6[%c55] : memref<98xf32, #tpu.memory_space<smem>>
    %550 = vector.extract_strided_slice %37 {offsets = [0, 6], sizes = [1, 256], strides = [1, 1]} : vector<1x358xf32> to vector<1x256xf32>
    %551 = vector.broadcast %548 : f32 to vector<1x256xf32>
    %552 = arith.mulf %551, %550 : vector<1x256xf32>
    %553 = arith.addf %547, %552 : vector<1x256xf32>
    %554 = vector.extract_strided_slice %38 {offsets = [0, 6], sizes = [1, 256], strides = [1, 1]} : vector<1x358xf32> to vector<1x256xf32>
    %555 = vector.broadcast %549 : f32 to vector<1x256xf32>
    %556 = arith.mulf %555, %554 : vector<1x256xf32>
    %557 = arith.addf %553, %556 : vector<1x256xf32>
    %c13 = arith.constant 13 : index
    %558 = memref.load %arg6[%c13] : memref<98xf32, #tpu.memory_space<smem>>
    %c62 = arith.constant 62 : index
    %559 = memref.load %arg6[%c62] : memref<98xf32, #tpu.memory_space<smem>>
    %560 = vector.extract_strided_slice %37 {offsets = [0, 22], sizes = [1, 256], strides = [1, 1]} : vector<1x358xf32> to vector<1x256xf32>
    %561 = vector.broadcast %558 : f32 to vector<1x256xf32>
    %562 = arith.mulf %561, %560 : vector<1x256xf32>
    %563 = arith.addf %557, %562 : vector<1x256xf32>
    %564 = vector.extract_strided_slice %38 {offsets = [0, 22], sizes = [1, 256], strides = [1, 1]} : vector<1x358xf32> to vector<1x256xf32>
    %565 = vector.broadcast %559 : f32 to vector<1x256xf32>
    %566 = arith.mulf %565, %564 : vector<1x256xf32>
    %567 = arith.addf %563, %566 : vector<1x256xf32>
    %c20 = arith.constant 20 : index
    %568 = memref.load %arg6[%c20] : memref<98xf32, #tpu.memory_space<smem>>
    %c69 = arith.constant 69 : index
    %569 = memref.load %arg6[%c69] : memref<98xf32, #tpu.memory_space<smem>>
    %570 = vector.extract_strided_slice %37 {offsets = [0, 38], sizes = [1, 256], strides = [1, 1]} : vector<1x358xf32> to vector<1x256xf32>
    %571 = vector.broadcast %568 : f32 to vector<1x256xf32>
    %572 = arith.mulf %571, %570 : vector<1x256xf32>
    %573 = arith.addf %567, %572 : vector<1x256xf32>
    %574 = vector.extract_strided_slice %38 {offsets = [0, 38], sizes = [1, 256], strides = [1, 1]} : vector<1x358xf32> to vector<1x256xf32>
    %575 = vector.broadcast %569 : f32 to vector<1x256xf32>
    %576 = arith.mulf %575, %574 : vector<1x256xf32>
    %577 = arith.addf %573, %576 : vector<1x256xf32>
    %c27 = arith.constant 27 : index
    %578 = memref.load %arg6[%c27] : memref<98xf32, #tpu.memory_space<smem>>
    %c76 = arith.constant 76 : index
    %579 = memref.load %arg6[%c76] : memref<98xf32, #tpu.memory_space<smem>>
    %580 = vector.extract_strided_slice %37 {offsets = [0, 54], sizes = [1, 256], strides = [1, 1]} : vector<1x358xf32> to vector<1x256xf32>
    %581 = vector.broadcast %578 : f32 to vector<1x256xf32>
    %582 = arith.mulf %581, %580 : vector<1x256xf32>
    %583 = arith.addf %577, %582 : vector<1x256xf32>
    %584 = vector.extract_strided_slice %38 {offsets = [0, 54], sizes = [1, 256], strides = [1, 1]} : vector<1x358xf32> to vector<1x256xf32>
    %585 = vector.broadcast %579 : f32 to vector<1x256xf32>
    %586 = arith.mulf %585, %584 : vector<1x256xf32>
    %587 = arith.addf %583, %586 : vector<1x256xf32>
    %c34 = arith.constant 34 : index
    %588 = memref.load %arg6[%c34] : memref<98xf32, #tpu.memory_space<smem>>
    %c83 = arith.constant 83 : index
    %589 = memref.load %arg6[%c83] : memref<98xf32, #tpu.memory_space<smem>>
    %590 = vector.extract_strided_slice %37 {offsets = [0, 70], sizes = [1, 256], strides = [1, 1]} : vector<1x358xf32> to vector<1x256xf32>
    %591 = vector.broadcast %588 : f32 to vector<1x256xf32>
    %592 = arith.mulf %591, %590 : vector<1x256xf32>
    %593 = arith.addf %587, %592 : vector<1x256xf32>
    %594 = vector.extract_strided_slice %38 {offsets = [0, 70], sizes = [1, 256], strides = [1, 1]} : vector<1x358xf32> to vector<1x256xf32>
    %595 = vector.broadcast %589 : f32 to vector<1x256xf32>
    %596 = arith.mulf %595, %594 : vector<1x256xf32>
    %597 = arith.addf %593, %596 : vector<1x256xf32>
    %c41 = arith.constant 41 : index
    %598 = memref.load %arg6[%c41] : memref<98xf32, #tpu.memory_space<smem>>
    %c90 = arith.constant 90 : index
    %599 = memref.load %arg6[%c90] : memref<98xf32, #tpu.memory_space<smem>>
    %600 = vector.extract_strided_slice %37 {offsets = [0, 86], sizes = [1, 256], strides = [1, 1]} : vector<1x358xf32> to vector<1x256xf32>
    %601 = vector.broadcast %598 : f32 to vector<1x256xf32>
    %602 = arith.mulf %601, %600 : vector<1x256xf32>
    %603 = arith.addf %597, %602 : vector<1x256xf32>
    %604 = vector.extract_strided_slice %38 {offsets = [0, 86], sizes = [1, 256], strides = [1, 1]} : vector<1x358xf32> to vector<1x256xf32>
    %605 = vector.broadcast %599 : f32 to vector<1x256xf32>
    %606 = arith.mulf %605, %604 : vector<1x256xf32>
    %607 = arith.addf %603, %606 : vector<1x256xf32>
    %c48 = arith.constant 48 : index
    %608 = memref.load %arg6[%c48] : memref<98xf32, #tpu.memory_space<smem>>
    %c97 = arith.constant 97 : index
    %609 = memref.load %arg6[%c97] : memref<98xf32, #tpu.memory_space<smem>>
    %610 = vector.extract_strided_slice %37 {offsets = [0, 102], sizes = [1, 256], strides = [1, 1]} : vector<1x358xf32> to vector<1x256xf32>
    %611 = vector.broadcast %608 : f32 to vector<1x256xf32>
    %612 = arith.mulf %611, %610 : vector<1x256xf32>
    %613 = arith.addf %607, %612 : vector<1x256xf32>
    %614 = vector.extract_strided_slice %38 {offsets = [0, 102], sizes = [1, 256], strides = [1, 1]} : vector<1x358xf32> to vector<1x256xf32>
    %615 = vector.broadcast %609 : f32 to vector<1x256xf32>
    %616 = arith.mulf %615, %614 : vector<1x256xf32>
    %617 = arith.addf %613, %616 : vector<1x256xf32>
    %cst_57 = arith.constant 0.000000e+00 : f32
    %618 = vector.broadcast %cst_57 : f32 to vector<1x256xf32>
    %619 = arith.select %546, %617, %618 : vector<1x256xi1>, vector<1x256xf32>
    %620 = arith.addf %537, %619 : vector<1x256xf32>
    %621 = arith.negf %620 : vector<1x256xf32>
    %622 = math.exp %621 : vector<1x256xf32>
    %cst_58 = arith.constant 1.000000e+00 : f32
    %623 = vector.broadcast %cst_58 : f32 to vector<1x256xf32>
    %624 = arith.addf %623, %622 : vector<1x256xf32>
    %625 = arith.divf %623, %624 : vector<1x256xf32>
    %626 = vector.broadcast %28 : vector<64x1xf32> to vector<64x256xf32>
    %627 = arith.mulf %1, %626 : vector<64x256xf32>
    %628 = vector.broadcast %625 : vector<1x256xf32> to vector<64x256xf32>
    %629 = arith.mulf %627, %628 : vector<64x256xf32>
    %c0_59 = arith.constant 0 : index
    %c0_60 = arith.constant 0 : index
    %c0_61 = arith.constant 0 : index
    %630 = vector.load %arg8[%c0_59, %c0_60, %c0_61] : memref<1x64x256xf32, #tpu.memory_space<vmem>>, vector<1x64x256xf32>
    %631 = vector.shape_cast %630 : vector<1x64x256xf32> to vector<64x256xf32>
    %632 = vector.shape_cast %629 : vector<64x256xf32> to vector<1x64x256xf32>
    tpu.vector_store %arg8[%c0_59, %c0_60, %c0_61], %632 {strides = array<i32>} : memref<1x64x256xf32, #tpu.memory_space<vmem>>, vector<1x64x256xf32>,
    return
  }
  func.func @transform_0(%arg0: i32) -> (i32, i32, i32) {
    %c0_i32 = arith.constant 0 : i32
    %c0_i32_0 = arith.constant 0 : i32
    %c0_i32_1 = arith.constant 0 : i32
    return %arg0, %c0_i32, %c0_i32_0 : i32, i32, i32
  }
  func.func @transform_1(%arg0: i32) -> (i32, i32) {
    %c0_i32 = arith.constant 0 : i32
    %c0_i32_0 = arith.constant 0 : i32
    %c0_i32_1 = arith.constant 0 : i32
    return %c0_i32, %c0_i32_0 : i32, i32
  }
  func.func @transform_2(%arg0: i32) -> (i32, i32) {
    %c0_i32 = arith.constant 0 : i32
    %c0_i32_0 = arith.constant 0 : i32
    %c0_i32_1 = arith.constant 0 : i32
    return %c0_i32, %c0_i32_0 : i32, i32
  }
  func.func @transform_3(%arg0: i32) -> (i32, i32) {
    %c0_i32 = arith.constant 0 : i32
    %c0_i32_0 = arith.constant 0 : i32
    %c0_i32_1 = arith.constant 0 : i32
    return %c0_i32, %c0_i32_0 : i32, i32
  }
  func.func @transform_4(%arg0: i32) -> (i32, i32) {
    %c0_i32 = arith.constant 0 : i32
    %c0_i32_0 = arith.constant 0 : i32
    %c0_i32_1 = arith.constant 0 : i32
    return %c0_i32, %c0_i32_0 : i32, i32
  }
  func.func @transform_5(%arg0: i32) -> i32 {
    %c0_i32 = arith.constant 0 : i32
    %c0_i32_0 = arith.constant 0 : i32
    return %c0_i32 : i32
  }
  func.func @transform_6(%arg0: i32) -> (i32, i32) {
    %c0_i32 = arith.constant 0 : i32
    %c0_i32_0 = arith.constant 0 : i32
    %c0_i32_1 = arith.constant 0 : i32
    return %c0_i32, %c0_i32_0 : i32, i32
  }
  func.func @transform_7(%arg0: i32) -> (i32, i32, i32) {
    %c0_i32 = arith.constant 0 : i32
    %c0_i32_0 = arith.constant 0 : i32
    %c0_i32_1 = arith.constant 0 : i32
    return %arg0, %c0_i32, %c0_i32_0 : i32, i32, i32
  }
}

</mosaic_0001>

<bundles_post_ra>
// kernel: tpu_custom_call.1
= control target key start
LH: loop header
LB: loop body
LE: loop exit
PB: predicated region body
PF: predicated region fallthrough
CT: control target
= control target key end

     0   :  { %s6183_s0 = inlined_call_operand.hbm [shape: f32[2,64,256], index: 0, kind: input, shape index: {}]   ;;  %s6184_s1 = inlined_call_operand.vmem [shape: f32[4,64], index: 1, kind: input, shape index: {}]   ;;  %s6185_s2 = inlined_call_operand.vmem [shape: f32[4,1], index: 2, kind: input, shape index: {}]   ;;  %s6186_s3 = inlined_call_operand.vmem [shape: f32[64,4], index: 3, kind: input, shape index: {}]   ;;  %s6187_s4 = inlined_call_operand.vmem [shape: f32[64,1], index: 4, kind: input, shape index: {}]   ;;  %s6188_s5 = inlined_call_operand.vmem [shape: f32[98], index: 5, kind: input, shape index: {}]   ;;  %s6189_s6 = inlined_call_operand.vmem [shape: s32[1,256], index: 6, kind: input, shape index: {}]   ;;  %s6190_s7 = inlined_call_operand.hbm [shape: f32[2,64,256], index: 7, kind: output, shape index: {}]  }
   0x1   :  { %6329 = sst [smem:[#allocation170_spill]] %s6183_s0 }
   0x2   :  { %6330 = sst [smem:[#allocation171_spill]] %s6184_s1 }
   0x3   :  { %6331 = sst [smem:[#allocation172_spill]] %s6185_s2 }
   0x4   :  { %6332 = sst [smem:[#allocation173_spill]] %s6187_s4 }
   0x5   :  { %6333 = sst [smem:[#allocation174_spill]] %s6188_s5 }
   0x6   :  { %6334 = sst [smem:[#allocation175_spill]] %s6190_s7 }
   0x7   :  { %12 = vsyncpa [#allocation3], 0 }
   0x8   :  { %14 = vsyncpa [#allocation3 + $0x1], 0 }
   0x9   :  { %15 = vsyncpa [#allocation5], 0 }
   0xa   :  { %16 = vsyncpa [#allocation4], 0 }
   0xb   :  { %18 = vsyncpa [#allocation4 + $0x1], 0  ;;  %s3736_s24 = smov 0   ;;  %s3738_s25 = smov 0  }
   0xc   :  { %s3740_s26 = smov 0   ;;  %s3742_s27 = smov 0  }
   0xd LB: > { %6335 = sst [smem:[#allocation11_spill]] %s3657_s24  ;;  %s3757_s28 = sadd.s32 4294967295, %s3669_s27   ;;  %s3669_s27 = sphi %s3742_s27, %s6706_s27   ;;  %s3665_s26 = sphi %s3740_s26, %s6709_s26   ;;  %s3661_s25 = sphi %s3738_s25, %s6708_s25   ;;  %s3657_s24 = sphi %s3736_s24, %s6707_s24  }
   0xe   : > { %6336 = sst [smem:[#allocation12_spill]] %s3661_s25  ;;  %s3224_s29 = sadd.s32 4294967294, %s3669_s27  }
   0xf   : > { %6337 = sst [smem:[#allocation13_spill]] %s3665_s26  ;;  %s3761_s30 = sadd.s32 1, %s3669_s27  }
  0x10   : > { %6338 = sst [smem:[#allocation14_spill]] %s3669_s27  ;;  %s31_s8 = sadd.s32 1, %s3665_s26 }
  0x11   : > { %6339 = sst [smem:[#allocation15_spill]] %s3761_s30  ;;  %s28_s9 = ssub.s32 %s3669_s27, %s3761_s30 }
  0x12   : > { %p38_p0 = scmp.ne.s32.totalorder %s3665_s26, %s3661_s25  ;;  %p29_p1 = scmp.eq.s32.totalorder %s28_s9, 0 }
  0x13   : > { %p39_p2 = scmp.eq.s32.totalorder %s3669_s27, 0  ;;  %p44_p3 = scmp.ne.s32.totalorder %s3661_s25, %s3657_s24 }
  0x14   : > { %p6192_p4 = scmp.eq.s32.totalorder %s3757_s28, 0  ;;  %p194_p7 = scmp.eq.s32.totalorder %s3757_s28, 1 }
  0x15   : > { %s3773_s10 = scalar_select %p29_p1, %s3665_s26, %s31_s8  }
  0x16   : > { %p3775_p5 = por %p39_p2, %p38_p0  ;;  %p3781_p6 = por %p6192_p4, %p44_p3 }
  0x17   : > { %6340 = sst [smem:[#allocation16_spill]] %s3773_s10  ;;  %p200_p8 = scmp.eq.s32.totalorder %s3224_s29, 1 }
  0x18   : > { %s6342_s12 = scalar_select %p3781_p6, 1, 0 }
  0x19   : > { %p3225_p9 = scmp.ge.s32.totalorder %s3669_s27, 1  ;;  %p207_p10 = scmp.lt.s32.totalorder %s3669_s27, 3 }
  0x1a   : > { %p3788_p11 = por %p194_p7, %p38_p0  ;;  %p3792_p12 = por %p200_p8, %p44_p3 }
  0x1b   : > { %p3796_p13 = pnand %p3225_p9, %p207_p10  ;;  %s6348_s5 = sld [smem:[#allocation174_spill]] }
  0x1c   : > { %s6343_s13 = scalar_select %p3788_p11, 1, 0 }
  0x1d   : > { %s6345_s14 = scalar_select %p3792_p12, 1, 0 }
  0x1e   : > { %6344 = sst [smem:[#allocation17_spill]] %s6343_s13  ;;  %p3429_p1 = pneg %p3796_p13 }
  0x1f   : > { %6346 = sst [smem:[#allocation18_spill]] %s6345_s14  ;;  %p3442_p2 = scmp.lt.s32.totalorder %s3669_s27, 2 }
  0x20   : > { %p3809_p7 = pnand %p3429_p1, %p6192_p4  ;;  %s246_s20 = sand.u32 1, %s3665_s26  }
  0x21   : > { %s232_s18 = sshll.u32 %s6348_s5, 4  ;;  %p3816_p3 = pnand %p3442_p2, %p3775_p5  ;;  %s233_s18 = int_to_ptr.vmem [resolvable:$true] %s232_s18 }
  0x22   : > { %s3228_s22 = sshll.u32 %s246_s20, 7  ;;  %s3554_s23 = scalar_lea.vmem %s233_s18, 16 }
  0x23   : > { %p3555_p8 = scmp.ne.s32.totalorder %s233_s18, %s3554_s23  ;;  %p3556_p9 = pneg %p3809_p7 }
  0x24   : > { %p3562_p12 = scmp.lt.s32.totalorder %s233_s18, %s233_s18  ;;  %p3563_p11 = scmp.lt.s32.totalorder %s3554_s23, %s3554_s23 }
  0x25   : > { %p3557_p10 = pnand %p3556_p9, %p3555_p8 }
  0x26   : > { %p3564_p1 = por %p3563_p11, %p3562_p12 }
  0x27   : > { %p3558_p0 = pneg %p3557_p10 }
  0x29   : > { %p3565_p4 = pnand %p3564_p1, %p3558_p0 }
  0x2b   : > { %3568 = shalt.err (!%p3565_p4)
}
  0x2c   : > { %s3671_s29 = smov [#allocation6]   ;;  %s3356_s8 = sshll.u32 %s3669_s27, 11 }
  0x2d   : > { %3432 = dma.vmem_to_smem (!%p3809_p7), %s233_s18, 16, %s3671_s29, [#allocation5]  }
  0x2e   : > { %s250_s9 = scalar_lea.vmem [#allocation2], %s3228_s22  ;;  %s6351_s0 = sld [smem:[#allocation170_spill]] }
  0x2f   : > { %s257_s11 = sshll.u32 %s250_s9, 4  ;;  %s3832_s23 = scalar_lea.sflag [#allocation3], %s246_s20  ;;  %s3830_s11 = int_to_ptr.vmem [resolvable:$true] %s257_s11 }
  0x30   : > { %p3571_p5 = pneg %p3816_p3 }
  0x34   : > { %s3828_s5 = scalar_lea.hbm %s6351_s0, %s3356_s8  ;;  %s3574_s29 = scalar_lea.hbm %s6351_s0, 4096 }
  0x35   : > { %s3569_s19 = scalar_lea.hbm %s3828_s5, 2048  ;;  %p3575_p0 = scmp.lt.u32.totalorder %s3828_s5, %s6351_s0 }
  0x36   : > { %p3570_p4 = scmp.ne.s32.totalorder %s3828_s5, %s3569_s19  ;;  %p3576_p2 = scmp.lt.u32.totalorder %s3574_s29, %s3569_s19 }
  0x37   : > { %p3578_p8 = scmp.lt.u32.totalorder %s3569_s19, %s3828_s5 }
  0x38   : > { %p3572_p11 = pnand %p3571_p5, %p3570_p4  ;;  %p3577_p7 = por %p3576_p2, %p3575_p0 }
  0x3a   : > { %p3573_p12 = pneg %p3572_p11  ;;  %p3579_p9 = por %p3578_p8, %p3577_p7 }
  0x3c   : > { %p3580_p10 = pnand %p3579_p9, %p3573_p12 }
  0x3e   : > { %3583 = shalt.err (!%p3580_p10)
}
  0x3f   : > { %s3584_s20 = scalar_lea.vmem %s3830_s11, 2048  ;;  %s3672_s16 = smov [#allocation2]  }
  0x40   : > { %p3585_p1 = scmp.ne.s32.totalorder %s3830_s11, %s3584_s20  ;;  %s3589_s17 = sshll.u32 %s3672_s16, 4  ;;  %s3590_s17 = int_to_ptr.vmem [resolvable:$false] %s3589_s17 }
  0x41   : > { %s3591_s18 = scalar_lea.vmem %s3590_s17, 4096  ;;  %p3592_p6 = scmp.lt.s32.totalorder %s3830_s11, %s3590_s17 }
  0x42   : > { %p3587_p4 = pnand %p3585_p1, %p3571_p5  ;;  %p3593_p0 = scmp.lt.s32.totalorder %s3591_s18, %s3584_s20 }
  0x44   : > { %p3588_p11 = pneg %p3587_p4  ;;  %p3594_p2 = por %p3593_p0, %p3592_p6 }
  0x46   : > { %p3595_p7 = pnand %p3594_p2, %p3588_p11 }
  0x48   : > { %3598 = shalt.err (!%p3595_p7)
}
  0x49   : > { %s3673_s19 = smov 256   ;;  %s3674_s22 = smov 16  }
  0x4a   : > { %3436 = dma.hbm_to_vmem [thread:$0]  (!%p3816_p3), %s3828_s5, 2048, %s3830_s11, %s3832_s23, %s3673_s19, %s3673_s19, %s3674_s22  }
  0x4b   : > { %269 = sbr.rel (%p3796_p13) target bundleno = 1439 (0x59f), region = 48 }
  0x52   : > { %s3863_s29 = sand.u32 1, %s3661_s25   ;;  %p6353_p6 = scmp.ne.s32.totalorder %s6342_s12, 0 }
  0x53   : > { %6352 = sst [smem:[#allocation19_spill]] %s3863_s29  ;;  %s6194_s8 = sshll.u32 %s3863_s29, 7 }
  0x54   : > { %s272_s9 = scalar_lea.sflag [#allocation3], %s3863_s29  ;;  %s3869_s20 = scalar_lea.vmem [#allocation2], %s6194_s8 }
  0x55   : > { %3644 = dma.done.wait (%p6353_p6), %s272_s9, 2048  }
  0x56   : > { %3646 = vsyncadd (%p6353_p6), %s272_s9, 4294965248  ;;  %p6354_p3 = scmp.eq.s32.totalorder %s3757_s28, 0 }
  0x58   : > { %3648 = dma.done.wait (%p6354_p3), [#allocation5], 16   ;;  %p6355_p13 = pmov %p6354_p3 }
  0x5a   : > { %3650 = vsyncadd (%p6355_p13), [#allocation5], 4294967280 }
  0x5b   : > { %284 = sfence }
  0x5c   : > { %v311_v0 = vld [vmem:[%s3869_s20] sm:$0xff]  ;;  %v3881_v1 = vld [vmem:[%s3869_s20 + $0x8] sm:$0xff]  ;;  %v313_v2 = vld [vmem:[%s3869_s20 + $0x10] sm:$0xff]  ;;  %v3675_v7 = vmov 0   ;;  %v3676_v43 = vmov 0.0|0.0   ;;  %s6356_s4 = sld [smem:[#allocation173_spill]] }
  0x5d   : > { %v359_v3 = vmax.f32 %v311_v0, %v3881_v1  ;;  %v327_v4 = vadd.f32 %v3881_v1, %v311_v0  ;;  %v3887_v5 = vld [vmem:[%s3869_s20 + $0x18] sm:$0xff]  ;;  %v752_v6 = vadd.f32 %v313_v2, %v311_v0  ;;  %3501 = vset.pattern.permute.xlu1 %v3675_v7  ;;  %3500 = vset.pattern.permute.xlu0 %v3675_v7  ;;  %v317_v10 = vld [vmem:[%s3869_s20 + $0x30] sm:$0xff]  ;;  %v315_v12 = vld [vmem:[%s3869_s20 + $0x20] sm:$0xff]  ;;  %vm3677_vm0 = vmmov 0   ;;  %s6357_s2 = sld [smem:[#allocation172_spill]]  ;;  %s3679_s22 = smov 51  }
  0x5e   : > { %v362_v8 = vmax.f32 %v313_v2, %v3887_v5  ;;  %v330_v9 = vadd.f32 %v3887_v5, %v313_v2  ;;  %v3893_v11 = vld [vmem:[%s3869_s20 + $0x38] sm:$0xff]  ;;  %v3897_v13 = vld [vmem:[%s3869_s20 + $0x28] sm:$0xff]  ;;  %v321_v20 = vld [vmem:[%s3869_s20 + $0x50] sm:$0xff]  ;;  %v781_v34 = vmax.f32 %v313_v2, %v317_v10  ;;  %v780_v35 = vmax.f32 %v311_v0, %v315_v12  ;;  %3409 = vmatprep.subr.bf16.mxu0 %v3676_v43  ;;  %s6359_s1 = sld [smem:[#allocation171_spill]]  ;;  %s3255_s19 = sld [smem:[#allocation6 + $0x38]] }
  0x5f   : > { %360 = vmax.xlane.f32.xlu1 %v359_v3  ;;  %328 = vadd.xlane.f32.xlu0 %v327_v4  ;;  %v753_v14 = vadd.f32 %v752_v6, %v315_v12  ;;  %v336_v15 = vadd.f32 %v3893_v11, %v317_v10  ;;  %v333_v16 = vadd.f32 %v3897_v13, %v315_v12  ;;  %v322_v21 = vld [vmem:[%s3869_s20 + $0x58] sm:$0xff]  ;;  %v319_v22 = vld [vmem:[%s3869_s20 + $0x40] sm:$0xff]  ;;  %v320_v23 = vld [vmem:[%s3869_s20 + $0x48] sm:$0xff]  ;;  %vm383_vm1 = vcmask 7168   ;;  %s3257_s9 = sld [smem:[#allocation6 + $0x3f]]  ;;  %s3259_s5 = sld [smem:[#allocation6 + $0x46]] }
  0x60   : > { %v368_v18 = vmax.f32 %v317_v10, %v3893_v11  ;;  %v365_v19 = vmax.f32 %v315_v12, %v3897_v13  ;;  %v342_v25 = vadd.f32 %v322_v21, %v321_v20  ;;  %v339_v26 = vadd.f32 %v320_v23, %v319_v22  ;;  %v325_v30 = vld [vmem:[%s3869_s20 + $0x70] sm:$0xff]  ;;  %v3909_v31 = vld [vmem:[%s3869_s20 + $0x78] sm:$0xff]  ;;  %v323_v32 = vld [vmem:[%s3869_s20 + $0x60] sm:$0xff]  ;;  %s3993_s12 = sld [smem:[#allocation6 + $0x7]]  ;;  %s3995_s15 = sld [smem:[#allocation6 + $0xe]] }
  0x61   : > { %v754_v17 = vadd.f32 %v753_v14, %v317_v10  ;;  %v374_v28 = vmax.f32 %v321_v20, %v322_v21  ;;  %v371_v29 = vmax.f32 %v319_v22, %v320_v23  ;;  %v324_v33 = vld [vmem:[%s3869_s20 + $0x68] sm:$0xff]  ;;  %v348_v37 = vadd.f32 %v3909_v31, %v325_v30  ;;  %s3997_s21 = sld [smem:[#allocation6 + $0x15]]  ;;  %s4005_s11 = sld [smem:[#allocation6 + $0x1c]] }
  0x62   : > { %v345_v38 = vadd.f32 %v324_v33, %v323_v32  ;;  %v765_v39 = vadd.f32 %v3887_v5, %v3881_v1  ;;  %v782_v41 = vmax.f32 %v780_v35, %v319_v22  ;;  %v783_v42 = vmax.f32 %v781_v34, %v321_v20  ;;  %v482_v62 = vld [vmem:[%s6356_s4] sm:$0xff]  ;;  %v483_v6 = vld [vmem:[%s6356_s4 + $0x8] sm:$0xff]  ;;  %v484_v12 = vld [vmem:[%s6356_s4 + $0x10] sm:$0xff]  ;;  %s4007_s23 = sld [smem:[#allocation6]]  ;;  %s3261_s16 = sld [smem:[#allocation6 + $0x4d]] }
  0x63   : > { %363 = vmax.xlane.f32.xlu1 %v362_v8  ;;  %331 = vadd.xlane.f32.xlu0 %v330_v9  ;;  %v755_v24 = vadd.f32 %v754_v17, %v319_v22  ;;  %v380_v44 = vmax.f32 %v325_v30, %v3909_v31  ;;  %v377_v45 = vmax.f32 %v323_v32, %v324_v33  ;;  %v393_v8 = vld [vmem:[%s6357_s2] sm:$0xf]  ;;  %v485_v17 = vld [vmem:[%s6356_s4 + $0x18] sm:$0xff]  ;;  %vm399_vm2 = vcmask 523264   ;;  %s4011_s17 = sld [smem:[#allocation6 + $0x23]]  ;;  %s4013_s18 = sld [smem:[#allocation6 + $0x54]] }
  0x64   : > { %v766_v46 = vadd.f32 %v765_v39, %v3897_v13  ;;  %v784_v48 = vmax.f32 %v782_v41, %v323_v32  ;;  %v785_v49 = vmax.f32 %v783_v42, %v325_v30  ;;  %v793_v59 = vmax.f32 %v3881_v1, %v3897_v13  ;;  %s4019_s8 = sld [smem:[#allocation6 + $0x1]]  ;;  %s4021_s0 = sld [smem:[#allocation6 + $0x32]] }
  0x65   : > { %v756_v27 = vadd.f32 %v755_v24, %v321_v20  ;;  %v794_v60 = vmax.f32 %v3887_v5, %v3893_v11  ;;  %v3678_v5 = vmov 0.0   ;;  %v487_v24 = vld [vmem:[%s6356_s4 + $0x28] sm:$0xff]  ;;  %vm813_vm3 = vcmask 416768   ;;  %s4029_s2 = sld [smem:[#allocation6 + $0x5d]]  ;;  %s4035_s10 = sld [smem:[#allocation6 + $0x11]] }
  0x66   : > { %v767_v50 = vadd.f32 %v766_v46, %v3893_v11  ;;  %v786_v52 = vmax.f32 %v784_v48, %v785_v49  ;;  %v795_v2 = vmax.f32 %v793_v59, %v320_v23  ;;  %3392 = vmatprep.mubr.msk.f32.mxu0 %vm3677_vm0, %v3678_v5  ;;  %s4037_s26 = sld [smem:[#allocation6 + $0x18]]  ;;  %s4046_s25 = sld [smem:[#allocation6 + $0x26]]  ;;  %vm530_vm4 = vcmask 31744  }
  0x67   : > { %337 = vadd.xlane.f32.xlu1 %v336_v15  ;;  %334 = vadd.xlane.f32.xlu0 %v333_v16  ;;  %v757_v36 = vadd.f32 %v756_v27, %v323_v32  ;;  %v796_v4 = vmax.f32 %v794_v60, %v322_v21  ;;  %v488_v27 = vld [vmem:[%s6356_s4 + $0x30] sm:$0xff]  ;;  %s4061_s30 = sld [smem:[#allocation6 + $0x42]]  ;;  %s6369_s27 = smov 96   ;;  %vm555_vm5 = vcmask 1043456   ;;  %vm863_vm6 = vcmask 916480  }
  0x68   : > { %v768_v53 = vadd.f32 %v767_v50, %v320_v23  ;;  %v787_v55 = vrot.slane %v786_v52, 4  ;;  %v797_v10 = vmax.f32 %v795_v2, %v324_v33  ;;  %s6205_s14 = smov 80   ;;  %s6387_s24 = smov 64   ;;  %vm904_vm7 = vcmask 785408  }
  0x69   : > { %v758_v40 = vadd.f32 %v757_v36, %v325_v30  ;;  %v798_v11 = vmax.f32 %v796_v4, %v3909_v31  ;;  %v489_v30 = vld [vmem:[%s6356_s4 + $0x38] sm:$0xff]  ;;  %s4321_s13 = sld [smem:[#allocation6 + $0x45]]  ;;  %s4323_s7 = sld [smem:[#allocation6 + $0x4b]]  ;;  %vm945_vm8 = vcmask 654336   ;;  %vm1026_vm9 = vcmask 392192  }
  0x6a   : > { %v769_v56 = vadd.f32 %v768_v53, %v322_v21  ;;  %v788_v58 = vmax.f32 %v786_v52, %v787_v55  ;;  %v486_v21 = vld [vmem:[%s6356_s4 + $0x20] sm:$0xff]  ;;  %s4031_s4 = sld [smem:[#allocation6 + $0xa]]  ;;  %s4337_s29 = sld [smem:[#allocation6 + $0x1b]]  ;;  %vm1067_vm10 = vcmask 261120   ;;  %vm1426_vm15 = vcmask 1039360  }
  0x6b   : > { %369 = vmax.xlane.f32.xlu1 %v368_v18  ;;  %366 = vmax.xlane.f32.xlu0 %v365_v19  ;;  %v759_v47 = vrot.slane %v758_v40, 4  ;;  %v799_v16 = vmax.f32 %v797_v10, %v798_v11  ;;  %vm1744_vm0 = vcmask 1031168  }
  0x6c   : > { %v770_v61 = vadd.f32 %v769_v56, %v324_v33  ;;  %v789_v0 = vrot.slane %v788_v58, 2 }
  0x6d   : > { %v760_v51 = vadd.f32 %v759_v47, %v758_v40  ;;  %v800_v20 = vrot.slane %v799_v16, 4 }
  0x6e   : > { %v771_v3 = vadd.f32 %v770_v61, %v3909_v31  ;;  %v790_v7 = vmax.f32 %v788_v58, %v789_v0 }
  0x6f   : > { %343 = vadd.xlane.f32.xlu1 %v342_v25  ;;  %340 = vadd.xlane.f32.xlu0 %v339_v26  ;;  %v761_v54 = vrot.slane %v760_v51, 2  ;;  %v801_v23 = vmax.f32 %v799_v16, %v800_v20 }
  0x70   : > { %v772_v9 = vrot.slane %v771_v3, 4  ;;  %v791_v14 = vrot.slane %v790_v7, 1 }
  0x71   : > { %v762_v57 = vadd.f32 %v761_v54, %v760_v51  ;;  %v802_v26 = vrot.slane %v801_v23, 2 }
  0x72   : > { %v773_v15 = vadd.f32 %v772_v9, %v771_v3  ;;  %v792_v18 = vmax.f32 %v790_v7, %v791_v14 }
  0x73   : > { %375 = vmax.xlane.f32.xlu1 %v374_v28  ;;  %372 = vmax.xlane.f32.xlu0 %v371_v29  ;;  %v763_v63 = vrot.slane %v762_v57, 1  ;;  %v803_v29 = vmax.f32 %v801_v23, %v802_v26 }
  0x74   : > { %v774_v19 = vrot.slane %v773_v15, 2 }
  0x75   : > { %v764_v1 = vadd.f32 %v763_v63, %v762_v57  ;;  %v804_v32 = vrot.slane %v803_v29, 1 }
  0x76   : > { %v775_v22 = vadd.f32 %v774_v19, %v773_v15 }
  0x77   : > { %349 = vadd.xlane.f32.xlu1 %v348_v37  ;;  %346 = vadd.xlane.f32.xlu0 %v345_v38  ;;  %v778_v13 = vmul.f32 0.015625, %v764_v1  ;;  %v805_v33 = vmax.f32 %v803_v29, %v804_v32  ;;  %v6213_v32 = vstv %s4007_s23 }
  0x78   : > { %v776_v25 = vrot.slane %v775_v22, 1 }
  0x7a   : > { %v777_v28 = vadd.f32 %v776_v25, %v775_v22 }
  0x7b   : > { %381 = vmax.xlane.f32.xlu1 %v380_v44  ;;  %378 = vmax.xlane.f32.xlu0 %v377_v45 }
  0x7c   : > { %v779_v31 = vmul.f32 0.015625, %v777_v28 }
  0x8c   : > { %492 = vperm.xlu1 %3501, %v482_v62  }
  0x90   : > { %497 = vperm.xlu1 %3501, %v483_v6  }
  0x91   : > { %396 = vperm.xlu0 %3500, %v393_v8   ;;  %v392_v8 = vld [vmem:[%s6359_s1] sm:$0xf]  ;;  %s4025_s1 = sld [smem:[#allocation6 + $0x2]] }
  0x94   : > { %502 = vperm.xlu1 %3501, %v484_v12   ;;  %v870_v12 = vstv %s3255_s19  ;;  %s4015_s19 = sld [smem:[#allocation6 + $0x31]] }
  0x95   : > { %809 = vrot.lane.b32.xlu0 %v778_v13, %s3679_s22 }
  0x98   : > { %507 = vperm.xlu1 %3501, %v485_v17  }
  0x99   : > { %822 = vrot.lane.b32.xlu0 %v792_v18, %s3679_s22 }
  0x9c   : > { %512 = vperm.xlu1 %3501, %v486_v21  }
  0xa0   : > { %517 = vperm.xlu1 %3501, %v487_v24  }
  0xa4   : > { %522 = vperm.xlu1 %3501, %v488_v27   ;;  %v911_v27 = vstv %s3257_s9  ;;  %s4027_s9 = sld [smem:[#allocation6 + $0x33]] }
  0xa8   : > { %527 = vperm.xlu1 %3501, %v489_v30   ;;  %v952_v30 = vstv %s3259_s5  ;;  %s4044_s5 = sld [smem:[#allocation6 + $0x1f]] }
  0xac   : > { %811 = vrot.lane.b32.xlu1 %v779_v31, %s3679_s22 }
  0xb0   : > { %824 = vrot.lane.b32.xlu1 %v805_v33, %s3679_s22  ;;  %s6195_s22 = smov 112  }
  0xec   : > { %v361_v34 = vpop.xlane.xlu1 %360  ;;  %v329_v35 = vpop.xlane.xlu0 %328 }
  0xed   : > { %v351_v36 = vmul.f32 0.00390625, %v329_v35  ;;  %v4052_v35 = vstv %s3261_s16  ;;  %s4121_s16 = sld [smem:[#allocation6 + $0x34]] }
  0xef   : > { %v384_v40 = vsel %vm383_vm1, %v351_v36, %v361_v34  ;;  %v4055_v36 = vstv %s3993_s12  ;;  %s4077_s12 = sld [smem:[#allocation6 + $0x49]] }
  0xf0   : > { %v364_v37 = vpop.xlane.xlu1 %363  ;;  %v332_v38 = vpop.xlane.xlu0 %331 }
  0xf1   : > { %v352_v39 = vmul.f32 0.00390625, %v332_v38  ;;  %v6209_v38 = vstv %s4015_s19 }
  0xf3   : > { %v385_v41 = vsel %vm383_vm1, %v352_v39, %v364_v37  ;;  %v4058_v37 = vstv %s3995_s15  ;;  %v4066_v39 = vstv %s3997_s21  ;;  %s4079_s15 = sld [smem:[#allocation6 + $0x2d]]  ;;  %s4093_s21 = sld [smem:[#allocation6 + $0x50]] }
  0xf4   : > { %v338_v42 = vpop.xlane.xlu1 %337  ;;  %v335_v44 = vpop.xlane.xlu0 %334  ;;  %v3410_v45 = vpack.c.bf16 %v385_v41, %v384_v40  ;;  %v4069_v40 = vstv %s4005_s11  ;;  %s4095_s11 = sld [smem:[#allocation6 + $0x3]] }
  0xf5   : > { %v353_v46 = vmul.f32 0.00390625, %v335_v44  ;;  %v354_v47 = vmul.f32 0.00390625, %v338_v42  ;;  %v4082_v44 = vstv %s4013_s18  ;;  %s6210_s18 = smov 64  }
  0xf6   : > { %3411 = vmatpush3.bf16.msra.mxu0 %v3410_v45  ;;  %v4085_v45 = vstv %s4011_s17  ;;  %s4123_s17 = sld [smem:[#allocation6 + $0xb]] }
  0xf7   : > { %3412 = vmatprep.subr.bf16.mxu0 %v3676_v43 }
  0xf8   : > { %v370_v48 = vpop.xlane.xlu1 %369  ;;  %v367_v49 = vpop.xlane.xlu0 %366 }
  0xf9   : > { %v387_v50 = vsel %vm383_vm1, %v354_v47, %v370_v48  ;;  %v386_v51 = vsel %vm383_vm1, %v353_v46, %v367_v49  ;;  %v4088_v46 = vstv %s4019_s8  ;;  %v4091_v47 = vstv %s4021_s0  ;;  %s4105_s8 = sld [smem:[#allocation6 + $0x57]]  ;;  %s4107_s0 = sld [smem:[#allocation6 + $0x5e]] }
  0xfa   : > { %v3413_v52 = vpack.c.bf16 %v387_v50, %v386_v51 }
  0xfc   : > { %v344_v53 = vpop.xlane.xlu1 %343  ;;  %3414 = vmatpush3.bf16.msra.mxu0 %v3413_v52  ;;  %v341_v54 = vpop.xlane.xlu0 %340  ;;  %v4110_v52 = vstv %s4029_s2  ;;  %s4157_s2 = sld [smem:[#allocation6 + $0x19]] }
  0xfd   : > { %v355_v55 = vmul.f32 0.00390625, %v341_v54  ;;  %3415 = vmatprep.subr.bf16.mxu0 %v3676_v43  ;;  %v356_v56 = vmul.f32 0.00390625, %v344_v53  ;;  %v4113_v53 = vstv %s4025_s1  ;;  %v4116_v54 = vstv %s4027_s9  ;;  %s4137_s1 = sld [smem:[#allocation6 + $0x12]] }
  0xfe   : > { %s4190_s9 = sld [smem:[#allocation6 + $0x4a]] }
 0x100   : > { %v376_v57 = vpop.xlane.xlu1 %375  ;;  %v373_v58 = vpop.xlane.xlu0 %372 }
 0x101   : > { %v389_v59 = vsel %vm383_vm1, %v356_v56, %v376_v57  ;;  %v388_v60 = vsel %vm383_vm1, %v355_v55, %v373_v58  ;;  %v4119_v55 = vstv %s4031_s4  ;;  %v4132_v58 = vstv %s4035_s10  ;;  %s4159_s4 = sld [smem:[#allocation6 + $0x20]]  ;;  %s6207_s10 = smov 48  }
 0x102   : > { %v3416_v61 = vpack.c.bf16 %v389_v59, %v388_v60  ;;  %v4135_v59 = vstv %s4037_s26  ;;  %s4173_s26 = sld [smem:[#allocation6 + $0x27]] }
 0x104   : > { %v350_v62 = vpop.xlane.xlu1 %349  ;;  %3417 = vmatpush3.bf16.msra.mxu0 %v3416_v61  ;;  %v347_v63 = vpop.xlane.xlu0 %346 }
 0x105   : > { %v357_v0 = vmul.f32 0.00390625, %v347_v63  ;;  %3418 = vmatprep.subr.bf16.mxu0 %v3676_v43  ;;  %v358_v2 = vmul.f32 0.00390625, %v350_v62  ;;  %v4144_v62 = vstv %s4044_s5  ;;  %v4147_v63 = vstv %s4046_s25  ;;  %s4171_s25 = sld [smem:[#allocation6 + $0x3c]]  ;;  %s4203_s5 = sld [smem:[#allocation6 + $0x51]] }
 0x108   : > { %v382_v3 = vpop.xlane.xlu1 %381  ;;  %v379_v4 = vpop.xlane.xlu0 %378 }
 0x109   : > { %v391_v6 = vsel %vm383_vm1, %v358_v2, %v382_v3  ;;  %v390_v1 = vsel %vm383_vm1, %v357_v0, %v379_v4 }
 0x10a   : > { %v3419_v7 = vpack.c.bf16 %v391_v6, %v390_v1 }
 0x10c   : > { %v3964_v5 = vpop.permute.xlu1 %492  ;;  %3420 = vmatpush3.bf16.msra.mxu0 %v3419_v7 }
 0x10d   : > { %6358 = vst [vmem:[#allocation20_spill] sm:$0xff] %v3964_v5 }
 0x10f   : > { %3393 = vmatmul.mubr.msk.f32.vlgmr.msra.gmra.mrb[0].mxu0 %vm399_vm2, %v392_v8 }
 0x110   : > { %v3970_v43 = vpop.permute.xlu1 %497  ;;  %v3972_v9 = vpop.permute.xlu0 %396 }
 0x111   : > { %6360 = vst [vmem:[#allocation21_spill] sm:$0xff] %v3970_v43 }
 0x114   : > { %v3974_v10 = vpop.permute.xlu1 %502  ;;  %v3976_v11 = vpop.permute.xlu0 %809 }
 0x115   : > { %6361 = vst [vmem:[#allocation22_spill] sm:$0xff] %v3974_v10  ;;  %v4163_v6 = vsel %vm813_vm3, 0.0, %v3976_v11 }
 0x116   : > { %v892_v5 = vmul.f32 %v4058_v37, %v4163_v6 }
 0x118   : > { %v3978_v13 = vpop.permute.xlu1 %507  ;;  %v823_v14 = vpop.permute.xlu0 %822 }
 0x119   : > { %6362 = vst [vmem:[#allocation23_spill] sm:$0xff] %v3978_v13  ;;  %v3981_v15 = vsel %vm813_vm3, 0.0, %v823_v14  ;;  %v4350_v13 = vstv %s4203_s5  ;;  %s4393_s5 = sld [smem:[#allocation6 + $0x59]] }
 0x11a   : > { %v871_v16 = vmul.f32 %v870_v12, %v3981_v15  ;;  %v912_v28 = vmul.f32 %v911_v27, %v3981_v15  ;;  %v953_v49 = vmul.f32 %v952_v30, %v3981_v15  ;;  %v1034_v10 = vmul.f32 %v4082_v44, %v3981_v15  ;;  %6396 = vst [vmem:[#allocation54_spill] sm:$0xff] %v4350_v13 }
 0x11c   : > { %v3984_v17 = vpop.permute.xlu1 %512  ;;  %877 = vrot.lane.b32.xlu1 %v871_v16, %s6195_s22  ;;  %v4186_v16 = vstv %s4061_s30  ;;  %s4216_s30 = sld [smem:[#allocation6 + $0x58]] }
 0x11d   : > { %6363 = vst [vmem:[#allocation24_spill] sm:$0xff] %v3984_v17  ;;  %v4335_v17 = vstv %s4173_s26  ;;  %s6400_s26 = smov 48  }
 0x11e   : > { %6395 = vst [vmem:[#allocation53_spill] sm:$0xff] %v4335_v17 }
 0x120   : > { %v3987_v18 = vpop.permute.xlu1 %517 }
 0x121   : > { %6364 = vst [vmem:[#allocation25_spill] sm:$0xff] %v3987_v18 }
 0x122   : > { %v4353_v43 = vstv %s4216_s30  ;;  %s4416_s30 = sld [smem:[#allocation6 + $0x29]] }
 0x123   : > { %6397 = vst [vmem:[#allocation55_spill] sm:$0xff] %v4353_v43 }
 0x124   : > { %v3989_v19 = vpop.permute.xlu1 %522 }
 0x125   : > { %6365 = vst [vmem:[#allocation26_spill] sm:$0xff] %v3989_v19  ;;  %v4332_v19 = vstv %s4190_s9  ;;  %s4391_s9 = sld [smem:[#allocation6 + $0x53]] }
 0x126   : > { %6394 = vst [vmem:[#allocation52_spill] sm:$0xff] %v4332_v19 }
 0x128   : > { %v3991_v20 = vpop.permute.xlu1 %527 }
 0x129   : > { %6366 = vst [vmem:[#allocation27_spill] sm:$0xff] %v3991_v20 }
 0x12c   : > { %v812_v21 = vpop.permute.xlu1 %811 }
 0x12d   : > { %v4041_v31 = vsel %vm813_vm3, %v3976_v11, %v812_v21  ;;  %v4098_v48 = vsel %vm813_vm3, %v812_v21, 0.0 }
 0x12e   : > { %6368 = vst [vmem:[#allocation29_spill] sm:$0xff] %v4041_v31  ;;  %v840_v41 = vmul.f32 %v6213_v32, %v4041_v31  ;;  %v1121_v56 = vmul.f32 %v4088_v46, %v4041_v31  ;;  %v1122_v60 = vmul.f32 %v4088_v46, %v4098_v48  ;;  %v1440_v7 = vmul.f32 %v4113_v53, %v4098_v48 }
 0x12f   : > { %v1439_v11 = vmul.f32 %v4113_v53, %v4041_v31  ;;  %v4316_v32 = vstv %s4157_s2  ;;  %s4339_s2 = sld [smem:[#allocation6 + $0x21]] }
 0x130   : > { %v825_v22 = vpop.permute.xlu1 %824  ;;  %6390 = vst [vmem:[#allocation48_spill] sm:$0xff] %v4316_v32 }
 0x131   : > { %v4000_v23 = vsel %vm813_vm3, %v823_v14, %v825_v22  ;;  %v4003_v24 = vsel %vm813_vm3, %v825_v22, 0.0  ;;  %v4195_v22 = vstv %s4077_s12  ;;  %s4218_s12 = sld [smem:[#allocation6 + $0xc]] }
 0x132   : > { %6367 = vst [vmem:[#allocation28_spill] sm:$0xff] %v4003_v24  ;;  %v873_v25 = vmul.f32 %v870_v12, %v4003_v24  ;;  %v872_v26 = vmul.f32 %v870_v12, %v4000_v23  ;;  %v913_v29 = vmul.f32 %v911_v27, %v4000_v23  ;;  %v914_v33 = vmul.f32 %v911_v27, %v4003_v24 }
 0x133   : > { %v954_v34 = vmul.f32 %v952_v30, %v4000_v23  ;;  %v845_v42 = vmul.f32 %v6209_v38, %v4000_v23  ;;  %v994_v50 = vmul.f32 %v4052_v35, %v4000_v23  ;;  %v1128_v57 = vmul.f32 %v4091_v47, %v4000_v23 }
 0x134   : > { %881 = vrot.lane.b32.xlu1 %v873_v25, %s6195_s22  ;;  %879 = vrot.lane.b32.xlu0 %v872_v26, %s6195_s22  ;;  %s6199_s22 = smov 96   ;;  %v1129_v61 = vmul.f32 %v4091_v47, %v4003_v24  ;;  %v955_v0 = vmul.f32 %v952_v30, %v4003_v24  ;;  %v1035_v2 = vmul.f32 %v4082_v44, %v4000_v23  ;;  %v4198_v25 = vstv %s4079_s15  ;;  %s4232_s15 = sld [smem:[#allocation6 + $0x3d]] }
 0x135   : > { %v4103_v51 = vadd.f32 %v845_v42, %v840_v41  ;;  %v4152_v3 = vadd.f32 %v1128_v57, %v1121_v56  ;;  %v1447_v8 = vmul.f32 %v4116_v54, %v4003_v24  ;;  %v1446_v12 = vmul.f32 %v4116_v54, %v4000_v23 }
 0x136   : > { %v4165_v1 = vadd.f32 %v1129_v61, %v1122_v60  ;;  %v4183_v14 = vmul.f32 %v4110_v52, %v4003_v24  ;;  %v4201_v26 = vstv %s4095_s11  ;;  %v993_v27 = vmul.f32 %v4052_v35, %v3981_v15  ;;  %s4234_s11 = sld [smem:[#allocation6 + $0xd]] }
 0x137   : > { %6370 = vst [vmem:[#allocation30_spill] sm:$0xff] %v4103_v51  ;;  %v4192_v21 = vadd.f32 %v1447_v8, %v1440_v7  ;;  %6371 = vst [vmem:[#allocation31_spill] sm:$0xff] %v4201_v26  ;;  %v4214_v30 = vstv %s4093_s21  ;;  %v4227_v41 = vstv %s4121_s16  ;;  %v4230_v42 = vstv %s4123_s17  ;;  %s6374_s21 = smov 112   ;;  %s4265_s16 = sld [smem:[#allocation6 + $0x3e]] }
 0x138   : > { %918 = vrot.lane.b32.xlu1 %v912_v28, %s6199_s22  ;;  %920 = vrot.lane.b32.xlu0 %v913_v29, %s6199_s22  ;;  %s4050_s22 = sld [smem:[#allocation6 + $0x3b]]  ;;  %v851_v28 = vmul.f32 %v4055_v36, %v4163_v6  ;;  %v4211_v29 = vadd.f32 %v1446_v12, %v1439_v11  ;;  %6372 = vst [vmem:[#allocation32_spill] sm:$0xff] %v4227_v41  ;;  %6373 = vst [vmem:[#allocation33_spill] sm:$0xff] %v4230_v42  ;;  %v4245_v57 = vstv %s4137_s1  ;;  %s4267_s17 = sld [smem:[#allocation6 + $0x44]] }
 0x139   : > { %v1757_v56 = vmul.f32 %v4201_v26, %v4098_v48  ;;  %6375 = vst [vmem:[#allocation34_spill] sm:$0xff] %v4245_v57  ;;  %v1764_v60 = vmul.f32 %v4227_v41, %v4003_v24  ;;  %v4255_v61 = vmul.f32 %v4119_v55, %v4041_v31  ;;  %v4275_v7 = vmul.f32 %v4135_v59, %v4041_v31  ;;  %s4285_s1 = sld [smem:[#allocation6 + $0x14]] }
 0x13a   : > { %v4279_v8 = vmul.f32 %v4195_v22, %v4003_v24  ;;  %v4283_v11 = vmul.f32 %v4144_v62, %v4041_v31  ;;  %v4319_v51 = vstv %s4159_s4  ;;  %v1756_v20 = vmul.f32 %v4201_v26, %v4041_v31  ;;  %s4361_s4 = sld [smem:[#allocation6 + $0x4c]] }
 0x13b   : > { %6376 = vst [vmem:[#allocation35_spill] sm:$0xff] %v4255_v61  ;;  %6380 = vst [vmem:[#allocation39_spill] sm:$0xff] %v4275_v7  ;;  %v4289_v12 = vadd.f32 %v1764_v60, %v1757_v56  ;;  %v4309_v56 = vmul.f32 %v4198_v25, %v4041_v31  ;;  %v1763_v18 = vmul.f32 %v4227_v41, %v4000_v23  ;;  %v4370_v26 = vstv %s4232_s15  ;;  %s4512_s15 = sld [smem:[#allocation6 + $0x36]] }
 0x13c   : > { %922 = vrot.lane.b32.xlu1 %v914_v33, %s6369_s27  ;;  %961 = vrot.lane.b32.xlu0 %v954_v34, %s6205_s14  ;;  %v4221_v33 = vstv %s4105_s8  ;;  %v4224_v34 = vstv %s4107_s0  ;;  %s4247_s8 = sld [smem:[#allocation6 + $0x13]]  ;;  %s4249_s0 = sld [smem:[#allocation6 + $0x4]]  ;;  %6381 = vst [vmem:[#allocation40_spill] sm:$0xff] %v4279_v8  ;;  %6382 = vst [vmem:[#allocation41_spill] sm:$0xff] %v4283_v11 }
 0x13d   : > { %6383 = vst [vmem:[#allocation42_spill] sm:$0xff] %v4289_v12  ;;  %v4301_v38 = vmul.f32 %v4221_v33, %v4003_v24  ;;  %6388 = vst [vmem:[#allocation46_spill] sm:$0xff] %v4309_v56  ;;  %v4313_v60 = vmul.f32 %v4224_v34, %v4003_v24  ;;  %v4367_v41 = vadd.f32 %v1763_v18, %v1756_v20 }
 0x13e   : > { %v4155_v4 = vstv %s4050_s22  ;;  %s4188_s22 = sld [smem:[#allocation6 + $0x43]]  ;;  %6391 = vst [vmem:[#allocation49_spill] sm:$0xff] %v4319_v51  ;;  %6402 = vst [vmem:[#allocation59_spill] sm:$0xff] %v4370_v26  ;;  %v1036_v18 = vmul.f32 %v4082_v44, %v4003_v24  ;;  %v894_v20 = vmul.f32 %v4058_v37, %v4098_v48  ;;  %v4414_v44 = vmul.f32 %v4230_v42, %v4041_v31 }
 0x13f   : > { %6386 = vst [vmem:[#allocation45_spill] sm:$0xff] %v4301_v38  ;;  %6389 = vst [vmem:[#allocation47_spill] sm:$0xff] %v4313_v60  ;;  %v4359_v60 = vstv %s4218_s12  ;;  %v4380_v38 = vstv %s4234_s11  ;;  %v4432_v42 = vmul.f32 %v4245_v57, %v4041_v31  ;;  %s4496_s12 = sld [smem:[#allocation6 + $0x5]]  ;;  %s4526_s11 = sld [smem:[#allocation6 + $0x6]] }
 0x140   : > { %959 = vrot.lane.b32.xlu1 %v953_v49, %s6205_s14  ;;  %1001 = vrot.lane.b32.xlu0 %v994_v50, %s6210_s18  ;;  %v995_v49 = vmul.f32 %v4052_v35, %v4003_v24  ;;  %v853_v50 = vmul.f32 %v4055_v36, %v4098_v48  ;;  %v4259_v35 = vmul.f32 %v4155_v4, %v4003_v24 }
 0x141   : > { %6399 = vst [vmem:[#allocation57_spill] sm:$0xff] %v4359_v60  ;;  %6401 = vst [vmem:[#allocation58_spill] sm:$0xff] %v4367_v41  ;;  %v4400_v41 = vstv %s4285_s1  ;;  %s4646_s1 = sld [smem:[#allocation6 + $0x5b]] }
 0x142   : > { %6377 = vst [vmem:[#allocation36_spill] sm:$0xff] %v4259_v35  ;;  %v4373_v56 = vstv %s4249_s0  ;;  %6404 = vst [vmem:[#allocation61_spill] sm:$0xff] %v4380_v38  ;;  %s4553_s0 = sld [smem:[#allocation6 + $0x61]] }
 0x143   : > { %6403 = vst [vmem:[#allocation60_spill] sm:$0xff] %v4373_v56  ;;  %6408 = vst [vmem:[#allocation65_spill] sm:$0xff] %v4400_v41  ;;  %v2075_v8 = vmul.f32 %v4373_v56, %v4098_v48 }
 0x144   : > { %963 = vrot.lane.b32.xlu1 %v955_v0, %s6205_s14  ;;  %1042 = vrot.lane.b32.xlu0 %v1035_v2, %s6207_s10  ;;  %s4205_s14 = sld [smem:[#allocation6 + $0x2e]]  ;;  %v4263_v0 = vmul.f32 %v4132_v58, %v4041_v31  ;;  %v4271_v2 = vmul.f32 %v4186_v16, %v4003_v24  ;;  %s4287_s10 = sld [smem:[#allocation6 + $0x35]]  ;;  %6411 = vst [vmem:[#allocation68_spill] sm:$0xff] %v4414_v44  ;;  %6415 = vst [vmem:[#allocation72_spill] sm:$0xff] %v4432_v42  ;;  %v4444_v44 = vstv %s4339_s2 }
 0x145   : > { %6418 = vst [vmem:[#allocation75_spill] sm:$0xff] %v4444_v44  ;;  %v933_v42 = vmul.f32 %v4066_v39, %v4163_v6  ;;  %s3287_s2 = sld [smem:[#allocation6 + $0x48]] }
 0x146   : > { %6378 = vst [vmem:[#allocation37_spill] sm:$0xff] %v4263_v0  ;;  %6379 = vst [vmem:[#allocation38_spill] sm:$0xff] %v4271_v2  ;;  %v4421_v2 = vstv %s4321_s13  ;;  %v4424_v0 = vstv %s4323_s7  ;;  %s4476_s7 = sld [smem:[#allocation6 + $0x5a]]  ;;  %s6426_s13 = smov 80  }
 0x147   : > { %6412 = vst [vmem:[#allocation69_spill] sm:$0xff] %v4421_v2  ;;  %6413 = vst [vmem:[#allocation70_spill] sm:$0xff] %v4424_v0 }
 0x148   : > { %999 = vrot.lane.b32.xlu1 %v993_v27, %s6210_s18  ;;  %857 = vrot.lane.b32.xlu0 %v851_v28, %s6374_s21  ;;  %v4293_v27 = vmul.f32 %v4214_v30, %v4003_v24  ;;  %v4297_v28 = vmul.f32 %v4147_v63, %v4041_v31  ;;  %s4303_s18 = sld [smem:[#allocation6 + $0x1a]] }
 0x14a   : > { %6384 = vst [vmem:[#allocation43_spill] sm:$0xff] %v4293_v27  ;;  %6385 = vst [vmem:[#allocation44_spill] sm:$0xff] %v4297_v28  ;;  %v4356_v12 = vstv %s4205_s14  ;;  %s4375_s14 = sld [smem:[#allocation6 + $0x22]]  ;;  %v4383_v28 = vstv %s4247_s8  ;;  %v4403_v27 = vstv %s4287_s10  ;;  %s4436_s10 = sld [smem:[#allocation6 + $0x2f]] }
 0x14b   : > { %6398 = vst [vmem:[#allocation56_spill] sm:$0xff] %v4356_v12  ;;  %6405 = vst [vmem:[#allocation62_spill] sm:$0xff] %v4383_v28  ;;  %v2082_v7 = vmul.f32 %v4403_v27, %v4003_v24  ;;  %s4551_s8 = sld [smem:[#allocation6 + $0x30]] }
 0x14c   : > { %1003 = vrot.lane.b32.xlu1 %v995_v49, %s6387_s24  ;;  %861 = vrot.lane.b32.xlu0 %v853_v50, %s6374_s21  ;;  %v4326_v49 = vstv %s4171_s25  ;;  %v4329_v50 = vstv %s4188_s22  ;;  %s4363_s25 = sld [smem:[#allocation6 + $0x52]]  ;;  %s4377_s22 = sld [smem:[#allocation6 + $0x28]]  ;;  %6409 = vst [vmem:[#allocation66_spill] sm:$0xff] %v4403_v27 }
 0x14d   : > { %6392 = vst [vmem:[#allocation50_spill] sm:$0xff] %v4326_v49  ;;  %6393 = vst [vmem:[#allocation51_spill] sm:$0xff] %v4329_v50  ;;  %v4428_v35 = vmul.f32 %v4326_v49, %v4003_v24  ;;  %v4448_v49 = vmul.f32 %v4329_v50, %v4003_v24 }
 0x14e   : > { %v4406_v11 = vstv %s4303_s18  ;;  %s4434_s18 = sld [smem:[#allocation6 + $0x5f]] }
 0x14f   : > { %6410 = vst [vmem:[#allocation67_spill] sm:$0xff] %v4406_v11  ;;  %6414 = vst [vmem:[#allocation71_spill] sm:$0xff] %v4428_v35  ;;  %v852_v35 = vmul.f32 %v4055_v36, %v4041_v31  ;;  %v4470_v36 = vmul.f32 %v4319_v51, %v4041_v31 }
 0x150   : > { %1040 = vrot.lane.b32.xlu1 %v1034_v10, %s6400_s26  ;;  %898 = vrot.lane.b32.xlu0 %v892_v5, %s6369_s27  ;;  %v4386_v10 = vstv %s4265_s16  ;;  %v4389_v5 = vstv %s4267_s17  ;;  %6419 = vst [vmem:[#allocation76_spill] sm:$0xff] %v4448_v49  ;;  %v4474_v49 = vmul.f32 %v4350_v13, %v4003_v24  ;;  %s4573_s16 = sld [smem:[#allocation6 + $0x37]]  ;;  %s4589_s17 = sld [smem:[#allocation6 + $0x2a]] }
 0x151   : > { %6406 = vst [vmem:[#allocation63_spill] sm:$0xff] %v4386_v10  ;;  %6407 = vst [vmem:[#allocation64_spill] sm:$0xff] %v4389_v5 }
 0x152   : > { %v4466_v50 = vstv %s4363_s25  ;;  %6424 = vst [vmem:[#allocation81_spill] sm:$0xff] %v4470_v36  ;;  %6425 = vst [vmem:[#allocation82_spill] sm:$0xff] %v4474_v49  ;;  %v4492_v36 = vmul.f32 %v4353_v43, %v4003_v24  ;;  %v4506_v49 = vmul.f32 %v4356_v12, %v4041_v31  ;;  %v935_v43 = vmul.f32 %v4066_v39, %v4098_v48  ;;  %s3268_s25 = sld [smem:[#allocation6 + $0x8]] }
 0x153   : > { %6423 = vst [vmem:[#allocation80_spill] sm:$0xff] %v4466_v50  ;;  %v4524_v12 = vmul.f32 %v4380_v38, %v4098_v48 }
 0x154   : > { %1044 = vrot.lane.b32.xlu1 %v1036_v18, %s6400_s26  ;;  %902 = vrot.lane.b32.xlu0 %v894_v20, %s6369_s27  ;;  %v4438_v18 = vadd.f32 %v2082_v7, %v2075_v8  ;;  %v4441_v20 = vstv %s4337_s29  ;;  %v4456_v7 = vmul.f32 %v4316_v32, %v4041_v31  ;;  %v4460_v8 = vmul.f32 %v4332_v19, %v4003_v24  ;;  %s4494_s29 = sld [smem:[#allocation6 + $0x60]] }
 0x155   : > { %6417 = vst [vmem:[#allocation74_spill] sm:$0xff] %v4441_v20  ;;  %v4488_v19 = vmul.f32 %v4335_v17, %v4041_v31  ;;  %6430 = vst [vmem:[#allocation86_spill] sm:$0xff] %v4492_v36  ;;  %v893_v36 = vmul.f32 %v4058_v37, %v4041_v31  ;;  %v4520_v17 = vmul.f32 %v4370_v26, %v4000_v23 }
 0x156   : > { %6416 = vst [vmem:[#allocation73_spill] sm:$0xff] %v4438_v18  ;;  %6420 = vst [vmem:[#allocation77_spill] sm:$0xff] %v4456_v7  ;;  %v4463_v18 = vstv %s4361_s4  ;;  %v4481_v7 = vstv %s4375_s14  ;;  %v4537_v37 = vmul.f32 %v4386_v10, %v4003_v24  ;;  %v4541_v26 = vmul.f32 %v4389_v5, %v4000_v23  ;;  %s3685_s14 = smov 32   ;;  %s3288_s4 = sld [smem:[#allocation6 + $0x1e]] }
 0x157   : > { %6421 = vst [vmem:[#allocation78_spill] sm:$0xff] %v4460_v8  ;;  %6422 = vst [vmem:[#allocation79_spill] sm:$0xff] %v4463_v18  ;;  %v4484_v8 = vstv %s4377_s22  ;;  %v4571_v5 = vmul.f32 %v4421_v2, %v4003_v24  ;;  %s3269_s22 = sld [smem:[#allocation6 + $0x39]]  ;;  %v1127_v10 = vmul.f32 %v4091_v47, %v3981_v15 }
 0x158   : > { %859 = vrot.lane.b32.xlu1 %v852_v35, %s6374_s21  ;;  %939 = vrot.lane.b32.xlu0 %v933_v42, %s6426_s13  ;;  %6427 = vst [vmem:[#allocation83_spill] sm:$0xff] %v4481_v7  ;;  %6428 = vst [vmem:[#allocation84_spill] sm:$0xff] %v4484_v8  ;;  %v4499_v35 = vstv %s4391_s9  ;;  %v4502_v42 = vstv %s4393_s5  ;;  %s3270_s9 = sld [smem:[#allocation6 + $0xf]]  ;;  %s3271_s5 = sld [smem:[#allocation6 + $0x40]] }
 0x159   : > { %6429 = vst [vmem:[#allocation85_spill] sm:$0xff] %v4488_v19  ;;  %6431 = vst [vmem:[#allocation87_spill] sm:$0xff] %v4499_v35  ;;  %v4510_v19 = vmul.f32 %v4359_v60, %v4098_v48 }
 0x15a   : > { %6432 = vst [vmem:[#allocation88_spill] sm:$0xff] %v4502_v42  ;;  %6433 = vst [vmem:[#allocation89_spill] sm:$0xff] %v4506_v49  ;;  %v4529_v49 = vstv %s4416_s30  ;;  %s3272_s30 = sld [smem:[#allocation6 + $0x16]] }
 0x15b   : > { %6434 = vst [vmem:[#allocation90_spill] sm:$0xff] %v4510_v19  ;;  %6435 = vst [vmem:[#allocation91_spill] sm:$0xff] %v4520_v17  ;;  %v4533_v19 = vmul.f32 %v4383_v28, %v4041_v31  ;;  %v4549_v17 = vstv %s4436_s10  ;;  %s3274_s10 = sld [smem:[#allocation6 + $0x1d]] }
 0x15c   : > { %6436 = vst [vmem:[#allocation92_spill] sm:$0xff] %v4524_v12  ;;  %6437 = vst [vmem:[#allocation93_spill] sm:$0xff] %v4529_v49  ;;  %900 = vrot.lane.b32.xlu1 %v893_v36, %s6369_s27  ;;  %943 = vrot.lane.b32.xlu0 %v935_v43, %s6426_s13  ;;  %v4546_v12 = vstv %s4434_s18  ;;  %v974_v43 = vmul.f32 %v4069_v40, %v4163_v6  ;;  %v2074_v36 = vmul.f32 %v4373_v56, %v4041_v31  ;;  %s3273_s18 = sld [smem:[#allocation6 + $0x47]] }
 0x15d   : > { %6438 = vst [vmem:[#allocation94_spill] sm:$0xff] %v4533_v19  ;;  %6439 = vst [vmem:[#allocation95_spill] sm:$0xff] %v4537_v37  ;;  %v4557_v37 = vmul.f32 %v4400_v41, %v4098_v48  ;;  %v2081_v19 = vmul.f32 %v4403_v27, %v4000_v23  ;;  %v4583_v56 = vmul.f32 %v4441_v20, %v4098_v48 }
 0x15e   : > { %6440 = vst [vmem:[#allocation96_spill] sm:$0xff] %v4541_v26  ;;  %6441 = vst [vmem:[#allocation97_spill] sm:$0xff] %v4546_v12  ;;  %v4561_v26 = vmul.f32 %v4406_v11, %v4041_v31  ;;  %v4587_v27 = vmul.f32 %v4444_v44, %v4041_v31  ;;  %v1120_v41 = vmul.f32 %v4088_v46, %v4163_v6 }
 0x15f   : > { %6442 = vst [vmem:[#allocation98_spill] sm:$0xff] %v4549_v17  ;;  %6443 = vst [vmem:[#allocation99_spill] sm:$0xff] %v4557_v37  ;;  %v4579_v37 = vmul.f32 %v4424_v0, %v4000_v23  ;;  %v4594_v2 = vadd.f32 %v2081_v19, %v2074_v36  ;;  %v4615_v19 = vmul.f32 %v4484_v8, %v4041_v31  ;;  %v4618_v36 = vstv %s4496_s12  ;;  %s3277_s12 = sld [smem:[#allocation6 + $0x55]] }
 0x160   : > { %6444 = vst [vmem:[#allocation100_spill] sm:$0xff] %v4561_v26  ;;  %6445 = vst [vmem:[#allocation101_spill] sm:$0xff] %v4571_v5  ;;  %v934_v26 = vmul.f32 %v4066_v39, %v4041_v31  ;;  %v4592_v5 = vstv %s4476_s7  ;;  %v4598_v39 = vmul.f32 %v4463_v18, %v4003_v24  ;;  %980 = vrot.lane.b32.xlu0 %v974_v43, %s6387_s24  ;;  %s3275_s7 = sld [smem:[#allocation6 + $0x4e]] }
 0x161   : > { %6446 = vst [vmem:[#allocation102_spill] sm:$0xff] %v4579_v37  ;;  %6447 = vst [vmem:[#allocation103_spill] sm:$0xff] %v4583_v56  ;;  %v4602_v37 = vmul.f32 %v4466_v50, %v4000_v23  ;;  %v4611_v56 = vmul.f32 %v4481_v7, %v4098_v48  ;;  %v4630_v43 = vmul.f32 %v4529_v49, %v4098_v48 }
 0x162   : > { %6448 = vst [vmem:[#allocation104_spill] sm:$0xff] %v4587_v27  ;;  %6449 = vst [vmem:[#allocation105_spill] sm:$0xff] %v4592_v5  ;;  %941 = vrot.lane.b32.xlu1 %v934_v26, %s6426_s13  ;;  %v4607_v27 = vstv %s4494_s29  ;;  %v4626_v26 = vmul.f32 %v4502_v42, %v4000_v23  ;;  %v4666_v42 = vmul.f32 %v4549_v17, %v4098_v48  ;;  %s3276_s29 = sld [smem:[#allocation6 + $0x24]] }
 0x163   : > { %6450 = vst [vmem:[#allocation106_spill] sm:$0xff] %v4594_v2  ;;  %6451 = vst [vmem:[#allocation107_spill] sm:$0xff] %v4598_v39  ;;  %v4622_v2 = vmul.f32 %v4499_v35, %v4003_v24  ;;  %v4644_v39 = vstv %s4526_s11  ;;  %s3279_s11 = sld [smem:[#allocation6 + $0x5c]]  ;;  %v1130_v60 = vadd.f32 %v1127_v10, %v1120_v41 }
 0x164   : > { %6452 = vst [vmem:[#allocation108_spill] sm:$0xff] %v4602_v37  ;;  %6453 = vst [vmem:[#allocation109_spill] sm:$0xff] %v4607_v27  ;;  %v976_v37 = vmul.f32 %v4069_v40, %v4098_v48  ;;  %v2710_v17 = vmul.f32 %v4644_v39, %v4041_v31 }
 0x165   : > { %6454 = vst [vmem:[#allocation110_spill] sm:$0xff] %v4611_v56  ;;  %6455 = vst [vmem:[#allocation111_spill] sm:$0xff] %v4615_v19  ;;  %v4633_v56 = vstv %s4512_s15  ;;  %v975_v19 = vmul.f32 %v4069_v40, %v4041_v31  ;;  %s3278_s15 = sld [smem:[#allocation6 + $0x2b]] }
 0x166   : > { %6456 = vst [vmem:[#allocation112_spill] sm:$0xff] %v4618_v36  ;;  %6457 = vst [vmem:[#allocation113_spill] sm:$0xff] %v4622_v2  ;;  %v4641_v2 = vmul.f32 %v4546_v12, %v4000_v23  ;;  %v2399_v49 = vmul.f32 %v4633_v56, %v4000_v23  ;;  %v2400_v40 = vmul.f32 %v4633_v56, %v4003_v24  ;;  %984 = vrot.lane.b32.xlu0 %v976_v37, %s6387_s24 }
 0x167   : > { %6458 = vst [vmem:[#allocation114_spill] sm:$0xff] %v4626_v26  ;;  %6459 = vst [vmem:[#allocation115_spill] sm:$0xff] %v4630_v43  ;;  %v2392_v43 = vmul.f32 %v4618_v36, %v4041_v31  ;;  %v2393_v26 = vmul.f32 %v4618_v36, %v4098_v48  ;;  %982 = vrot.lane.b32.xlu1 %v975_v19, %s6387_s24  ;;  %v4662_v12 = vstv %s4553_s0  ;;  %s3283_s0 = sld [smem:[#allocation6 + $0x3a]] }
 0x168   : > { %6460 = vst [vmem:[#allocation116_spill] sm:$0xff] %v4633_v56  ;;  %6461 = vst [vmem:[#allocation117_spill] sm:$0xff] %v4641_v2  ;;  %v4659_v2 = vstv %s4551_s8  ;;  %v1014_v36 = vmul.f32 %v4085_v45, %v4163_v6  ;;  %v4675_v56 = vstv %s4573_s16  ;;  %v1015_v37 = vmul.f32 %v4085_v45, %v4041_v31  ;;  %s3282_s8 = sld [smem:[#allocation6 + $0x9]]  ;;  %s3284_s16 = sld [smem:[#allocation6 + $0x10]] }
 0x169   : > { %6462 = vst [vmem:[#allocation118_spill] sm:$0xff] %v4644_v39  ;;  %6463 = vst [vmem:[#allocation119_spill] sm:$0xff] %v4659_v2  ;;  %v4670_v35 = vadd.f32 %v2399_v49, %v2392_v43  ;;  %v4672_v8 = vadd.f32 %v2400_v40, %v2393_v26  ;;  %v4681_v19 = vmul.f32 %v4592_v5, %v4000_v23  ;;  %v1054_v49 = vstv %s4589_s17  ;;  %s3285_s17 = sld [smem:[#allocation6 + $0x41]] }
 0x16a   : > { %6464 = vst [vmem:[#allocation120_spill] sm:$0xff] %v4662_v12  ;;  %6465 = vst [vmem:[#allocation121_spill] sm:$0xff] %v4666_v42  ;;  %v2717_v42 = vmul.f32 %v4675_v56, %v4000_v23  ;;  %v2711_v26 = vmul.f32 %v4644_v39, %v4098_v48  ;;  %v2718_v43 = vmul.f32 %v4675_v56, %v4003_v24  ;;  %1020 = vrot.lane.b32.xlu0 %v1014_v36, %s6400_s26  ;;  %v474_v39 = vld [vmem:[%s6186_s3] sm:$0xff] }
 0x16b   : > { %6466 = vst [vmem:[#allocation122_spill] sm:$0xff] %v4670_v35  ;;  %6467 = vst [vmem:[#allocation123_spill] sm:$0xff] %v4672_v8  ;;  %v4694_v40 = vmul.f32 %v4607_v27, %v4003_v24  ;;  %1022 = vrot.lane.b32.xlu1 %v1015_v37, %s6400_s26  ;;  %v4702_v35 = vmul.f32 %v4659_v2, %v4041_v31  ;;  %v1056_v37 = vmul.f32 %v1054_v49, %v4041_v31 }
 0x16c   : > { %6468 = vst [vmem:[#allocation124_spill] sm:$0xff] %v4675_v56  ;;  %6469 = vst [vmem:[#allocation125_spill] sm:$0xff] %v4681_v19  ;;  %v4698_v19 = vadd.f32 %v2717_v42, %v2710_v17  ;;  %v4707_v56 = vadd.f32 %v2718_v43, %v2711_v26  ;;  %v1016_v17 = vmul.f32 %v4085_v45, %v4098_v48  ;;  %3397 = vmatprep.mubr.msk.f32.mxu1 %vm530_vm4, %v474_v39 }
 0x16d   : > { %6470 = vst [vmem:[#allocation126_spill] sm:$0xff] %v4694_v40  ;;  %6472 = vst [vmem:[#allocation128_spill] sm:$0xff] %v4702_v35  ;;  %v4711_v40 = vmul.f32 %v4662_v12, %v4003_v24  ;;  %v1074_v42 = vstv %s4646_s1  ;;  %v1055_v26 = vmul.f32 %v1054_v49, %v4163_v6  ;;  %v1057_v39 = vmul.f32 %v1054_v49, %v4098_v48  ;;  %s3286_s1 = sld [smem:[#allocation6 + $0x17]] }
 0x16e   : > { %6471 = vst [vmem:[#allocation127_spill] sm:$0xff] %v4698_v19  ;;  %6473 = vst [vmem:[#allocation129_spill] sm:$0xff] %v4707_v56  ;;  %1024 = vrot.lane.b32.xlu0 %v1016_v17, %s6400_s26  ;;  %v1075_v36 = vmul.f32 %v1074_v42, %v3981_v15  ;;  %v1077_v45 = vmul.f32 %v1074_v42, %v4003_v24  ;;  %v1135_v43 = vstv %s3268_s25  ;;  %s3289_s25 = sld [smem:[#allocation6 + $0x4f]] }
 0x16f   : > { %6474 = vst [vmem:[#allocation130_spill] sm:$0xff] %v4711_v40  ;;  %1063 = vrot.lane.b32.xlu1 %v1056_v37, %s3685_s14  ;;  %v1137_v37 = vmul.f32 %v1135_v43, %v4041_v31  ;;  %v1076_v17 = vmul.f32 %v1074_v42, %v4000_v23  ;;  %v1156_v40 = vstv %s3269_s22  ;;  %v1179_v42 = vstv %s3270_s9  ;;  %s3290_s22 = sld [smem:[#allocation6 + $0x25]] }
 0x170   : > { %v1159_v49 = vmul.f32 %v1156_v40, %v4003_v24 }
 0x172   : > { %1061 = vrot.lane.b32.xlu0 %v1055_v26, %s3685_s14  ;;  %v1136_v26 = vmul.f32 %v1135_v43, %v4163_v6 }
 0x173   : > { %1081 = vrot.lane.b32.xlu1 %v1075_v36, %s3685_s14  ;;  %v1157_v36 = vmul.f32 %v1156_v40, %v3981_v15 }
 0x176   : > { %1065 = vrot.lane.b32.xlu0 %v1057_v39, %s3685_s14  ;;  %v1181_v39 = vmul.f32 %v1179_v42, %v4041_v31 }
 0x177   : > { %1085 = vrot.lane.b32.xlu1 %v1077_v45, %s3685_s14  ;;  %v1138_v45 = vmul.f32 %v1135_v43, %v4098_v48 }
 0x17a   : > { %1083 = vrot.lane.b32.xlu0 %v1076_v17, %s3685_s14  ;;  %v1200_v17 = vstv %s3271_s5 }
 0x17b   : > { %1144 = vrot.lane.b32.xlu1 %v1137_v37, %s6374_s21  ;;  %v1158_v37 = vmul.f32 %v1156_v40, %v4000_v23  ;;  %v1203_v43 = vmul.f32 %v1200_v17, %v4003_v24  ;;  %v1223_v40 = vstv %s3272_s30  ;;  %s6698_s30 = sld [smem:[#allocation175_spill]] }
 0x17e   : > { %1142 = vrot.lane.b32.xlu0 %v1136_v26, %s6374_s21  ;;  %v1180_v26 = vmul.f32 %v1179_v42, %v4163_v6 }
 0x17f   : > { %1163 = vrot.lane.b32.xlu1 %v1157_v36, %s6374_s21  ;;  %v1201_v36 = vmul.f32 %v1200_v17, %v3981_v15 }
 0x182   : > { %1146 = vrot.lane.b32.xlu0 %v1138_v45, %s6374_s21  ;;  %v1225_v45 = vmul.f32 %v1223_v40, %v4041_v31 }
 0x183   : > { %1167 = vrot.lane.b32.xlu1 %v1159_v49, %s6374_s21  ;;  %v1182_v49 = vmul.f32 %v1179_v42, %v4098_v48 }
 0x186   : > { %1165 = vrot.lane.b32.xlu0 %v1158_v37, %s6374_s21  ;;  %v1244_v37 = vstv %s3273_s18 }
 0x187   : > { %1188 = vrot.lane.b32.xlu1 %v1181_v39, %s6369_s27  ;;  %v1202_v39 = vmul.f32 %v1200_v17, %v4000_v23  ;;  %v1247_v42 = vmul.f32 %v1244_v37, %v4003_v24  ;;  %v1267_v17 = vstv %s3274_s10  ;;  %s6699_s10 = sld [smem:[#allocation17_spill]] }
 0x18a   : > { %1186 = vrot.lane.b32.xlu0 %v1180_v26, %s6369_s27  ;;  %v1224_v26 = vmul.f32 %v1223_v40, %v4163_v6 }
 0x18b   : > { %1207 = vrot.lane.b32.xlu1 %v1201_v36, %s6369_s27  ;;  %v1245_v36 = vmul.f32 %v1244_v37, %v3981_v15 }
 0x18d   : > { %p6700_p12 = scmp.ne.s32.totalorder %s6699_s10, 0 }
 0x18e   : > { %1190 = vrot.lane.b32.xlu0 %v1182_v49, %s6369_s27  ;;  %v1269_v49 = vmul.f32 %v1267_v17, %v4041_v31 }
 0x18f   : > { %1211 = vrot.lane.b32.xlu1 %v1203_v43, %s6369_s27  ;;  %v1226_v43 = vmul.f32 %v1223_v40, %v4098_v48  ;;  %v4772_v40 = vpop.permute.xlu1 %877 }
 0x190   : > { %6475 = vst [vmem:[#allocation131_spill] sm:$0xff] %v4772_v40 }
 0x192   : > { %1209 = vrot.lane.b32.xlu0 %v1202_v39, %s6369_s27  ;;  %v1288_v39 = vstv %s3275_s7 }
 0x193   : > { %1232 = vrot.lane.b32.xlu1 %v1225_v45, %s6426_s13  ;;  %v1246_v45 = vmul.f32 %v1244_v37, %v4000_v23  ;;  %v1270_v37 = vmul.f32 %v1267_v17, %v4098_v48 }
 0x196   : > { %1230 = vrot.lane.b32.xlu0 %v1224_v26, %s6426_s13  ;;  %v1268_v26 = vmul.f32 %v1267_v17, %v4163_v6 }
 0x197   : > { %1251 = vrot.lane.b32.xlu1 %v1245_v36, %s6426_s13  ;;  %v1289_v36 = vmul.f32 %v1288_v39, %v3981_v15 }
 0x19a   : > { %1234 = vrot.lane.b32.xlu0 %v1226_v43, %s6426_s13  ;;  %v1311_v43 = vstv %s3276_s29 }
 0x19b   : > { %1255 = vrot.lane.b32.xlu1 %v1247_v42, %s6426_s13  ;;  %v1291_v42 = vmul.f32 %v1288_v39, %v4003_v24  ;;  %v1313_v35 = vmul.f32 %v1311_v43, %v4041_v31 }
 0x19e   : > { %1253 = vrot.lane.b32.xlu0 %v1246_v45, %s6426_s13 }
 0x19f   : > { %1276 = vrot.lane.b32.xlu1 %v1269_v49, %s6387_s24 }
 0x1a2   : > { %1274 = vrot.lane.b32.xlu0 %v1268_v26, %s6387_s24  ;;  %v1332_v26 = vstv %s3277_s12  ;;  %s3693_s12 = smov [#allocation7]  }
 0x1a3   : > { %1295 = vrot.lane.b32.xlu1 %v1289_v36, %s6387_s24  ;;  %v1290_v36 = vmul.f32 %v1288_v39, %v4000_v23 }
 0x1a6   : > { %1278 = vrot.lane.b32.xlu0 %v1270_v37, %s6387_s24  ;;  %v4778_v49 = vpop.permute.xlu1 %881  ;;  %v4780_v45 = vpop.permute.xlu0 %879  ;;  %v1312_v37 = vmul.f32 %v1311_v43, %v4163_v6 }
 0x1a7   : > { %1299 = vrot.lane.b32.xlu1 %v1291_v42, %s6387_s24  ;;  %6476 = vst [vmem:[#allocation132_spill] sm:$0xff] %v4778_v49  ;;  %6477 = vst [vmem:[#allocation133_spill] sm:$0xff] %v4780_v45  ;;  %v1333_v42 = vmul.f32 %v1332_v26, %v3981_v15 }
 0x1aa   : > { %1297 = vrot.lane.b32.xlu0 %v1290_v36, %s6387_s24  ;;  %v4786_v17 = vpop.permute.xlu1 %918  ;;  %v4788_v40 = vpop.permute.xlu0 %920  ;;  %v1314_v36 = vmul.f32 %v1311_v43, %v4098_v48 }
 0x1ab   : > { %1320 = vrot.lane.b32.xlu1 %v1313_v35, %s6400_s26  ;;  %6478 = vst [vmem:[#allocation134_spill] sm:$0xff] %v4786_v17  ;;  %6479 = vst [vmem:[#allocation135_spill] sm:$0xff] %v4788_v40  ;;  %v1335_v35 = vmul.f32 %v1332_v26, %v4003_v24  ;;  %v1355_v17 = vstv %s3278_s15  ;;  %s3291_s15 = sld [smem:[#allocation6 + $0x56]] }
 0x1ae   : > { %1318 = vrot.lane.b32.xlu0 %v1312_v37, %s6400_s26  ;;  %v4794_v39 = vpop.permute.xlu1 %922  ;;  %v4796_v49 = vpop.permute.xlu0 %961  ;;  %v1334_v37 = vmul.f32 %v1332_v26, %v4000_v23 }
 0x1af   : > { %1339 = vrot.lane.b32.xlu1 %v1333_v42, %s6400_s26  ;;  %6480 = vst [vmem:[#allocation136_spill] sm:$0xff] %v4794_v39  ;;  %6481 = vst [vmem:[#allocation137_spill] sm:$0xff] %v4796_v49  ;;  %v1357_v42 = vmul.f32 %v1355_v17, %v4041_v31  ;;  %v1376_v39 = vstv %s3279_s11 }
 0x1b1   : > { %v1650_v56 = vstv %s3291_s15  ;;  %s3603_s15 = sshll.u32 %s3693_s12, 4  ;;  %s3604_s15 = int_to_ptr.vmem [resolvable:$false] %s3603_s15 }
 0x1b2   : > { %1322 = vrot.lane.b32.xlu0 %v1314_v36, %s6400_s26  ;;  %v4802_v40 = vpop.permute.xlu1 %959  ;;  %v4804_v45 = vpop.permute.xlu0 %1001  ;;  %v1356_v36 = vmul.f32 %v1355_v17, %v4163_v6  ;;  %s3605_s11 = scalar_lea.vmem %s3604_s15, 4096 }
 0x1b3   : > { %1343 = vrot.lane.b32.xlu1 %v1335_v35, %s6400_s26  ;;  %6482 = vst [vmem:[#allocation138_spill] sm:$0xff] %v4802_v40  ;;  %6483 = vst [vmem:[#allocation139_spill] sm:$0xff] %v4804_v45  ;;  %v1377_v35 = vmul.f32 %v1376_v39, %v3981_v15  ;;  %v1453_v40 = vstv %s3282_s8 }
 0x1b6   : > { %1341 = vrot.lane.b32.xlu0 %v1334_v37, %s6400_s26  ;;  %v4810_v43 = vpop.permute.xlu1 %963  ;;  %v4812_v49 = vpop.permute.xlu0 %1042  ;;  %v1358_v37 = vmul.f32 %v1355_v17, %v4098_v48 }
 0x1b7   : > { %1364 = vrot.lane.b32.xlu1 %v1357_v42, %s3685_s14  ;;  %6484 = vst [vmem:[#allocation140_spill] sm:$0xff] %v4810_v43  ;;  %6485 = vst [vmem:[#allocation141_spill] sm:$0xff] %v4812_v49  ;;  %v1379_v42 = vmul.f32 %v1376_v39, %v4003_v24 }
 0x1ba   : > { %1362 = vrot.lane.b32.xlu0 %v1356_v36, %s3685_s14  ;;  %v4818_v45 = vpop.permute.xlu1 %999  ;;  %v4820_v26 = vpop.permute.xlu0 %857  ;;  %v1378_v36 = vmul.f32 %v1376_v39, %v4000_v23 }
 0x1bb   : > { %1383 = vrot.lane.b32.xlu1 %v1377_v35, %s3685_s14  ;;  %6486 = vst [vmem:[#allocation142_spill] sm:$0xff] %v4818_v45  ;;  %6487 = vst [vmem:[#allocation143_spill] sm:$0xff] %v4820_v26  ;;  %v1454_v35 = vmul.f32 %v1453_v40, %v4163_v6  ;;  %v1518_v26 = vstv %s3285_s17  ;;  %s3292_s17 = sld [smem:[#allocation6 + $0x2c]] }
 0x1be   : > { %1366 = vrot.lane.b32.xlu0 %v1358_v37, %s3685_s14  ;;  %v4826_v49 = vpop.permute.xlu1 %1003  ;;  %v4828_v43 = vpop.permute.xlu0 %861  ;;  %v1455_v37 = vmul.f32 %v1453_v40, %v4041_v31 }
 0x1bf   : > { %1387 = vrot.lane.b32.xlu1 %v1379_v42, %s3685_s14  ;;  %6488 = vst [vmem:[#allocation144_spill] sm:$0xff] %v4826_v49  ;;  %6489 = vst [vmem:[#allocation145_spill] sm:$0xff] %v4828_v43  ;;  %v1456_v42 = vmul.f32 %v1453_v40, %v4098_v48  ;;  %v1474_v49 = vstv %s3283_s0 }
 0x1c1   : > { %v1673_v8 = vstv %s3292_s17 }
 0x1c2   : > { %1385 = vrot.lane.b32.xlu0 %v1378_v36, %s3685_s14  ;;  %v4834_v17 = vpop.permute.xlu1 %1040  ;;  %v4836_v45 = vpop.permute.xlu0 %898  ;;  %v1475_v36 = vmul.f32 %v1474_v49, %v3981_v15  ;;  %v1675_v5 = vmul.f32 %v1673_v8, %v4041_v31 }
 0x1c3   : > { %1460 = vrot.lane.b32.xlu1 %v1454_v35, %s6374_s21  ;;  %6490 = vst [vmem:[#allocation146_spill] sm:$0xff] %v4834_v17  ;;  %6491 = vst [vmem:[#allocation147_spill] sm:$0xff] %v4836_v45  ;;  %v1476_v35 = vmul.f32 %v1474_v49, %v4000_v23  ;;  %v1497_v17 = vstv %s3284_s16 }
 0x1c6   : > { %1462 = vrot.lane.b32.xlu0 %v1455_v37, %s6374_s21  ;;  %v4842_v43 = vpop.permute.xlu1 %1044  ;;  %v4844_v39 = vpop.permute.xlu0 %902  ;;  %v1477_v37 = vmul.f32 %v1474_v49, %v4003_v24 }
 0x1c7   : > { %1464 = vrot.lane.b32.xlu1 %v1456_v42, %s6374_s21  ;;  %6492 = vst [vmem:[#allocation148_spill] sm:$0xff] %v4842_v43  ;;  %6493 = vst [vmem:[#allocation149_spill] sm:$0xff] %v4844_v39  ;;  %v1498_v42 = vmul.f32 %v1497_v17, %v4163_v6 }
 0x1ca   : > { %1481 = vrot.lane.b32.xlu0 %v1475_v36, %s6374_s21  ;;  %v4850_v40 = vpop.permute.xlu1 %859  ;;  %v4852_v45 = vpop.permute.xlu0 %939  ;;  %v1499_v36 = vmul.f32 %v1497_v17, %v4041_v31 }
 0x1cb   : > { %1483 = vrot.lane.b32.xlu1 %v1476_v35, %s6374_s21  ;;  %6494 = vst [vmem:[#allocation150_spill] sm:$0xff] %v4850_v40  ;;  %6495 = vst [vmem:[#allocation151_spill] sm:$0xff] %v4852_v45  ;;  %v1500_v35 = vmul.f32 %v1497_v17, %v4098_v48 }
 0x1ce   : > { %1485 = vrot.lane.b32.xlu0 %v1477_v37, %s6374_s21  ;;  %v4858_v43 = vpop.permute.xlu1 %900  ;;  %v4860_v39 = vpop.permute.xlu0 %943  ;;  %v1519_v37 = vmul.f32 %v1518_v26, %v3981_v15 }
 0x1cf   : > { %1504 = vrot.lane.b32.xlu1 %v1498_v42, %s6369_s27  ;;  %6496 = vst [vmem:[#allocation152_spill] sm:$0xff] %v4858_v43  ;;  %6497 = vst [vmem:[#allocation153_spill] sm:$0xff] %v4860_v39  ;;  %v1520_v42 = vmul.f32 %v1518_v26, %v4000_v23  ;;  %v1541_v43 = vstv %s3286_s1 }
 0x1d2   : > { %1506 = vrot.lane.b32.xlu0 %v1499_v36, %s6369_s27  ;;  %v4868_v49 = vpop.permute.xlu0 %980  ;;  %v1521_v36 = vmul.f32 %v1518_v26, %v4003_v24 }
 0x1d3   : > { %1508 = vrot.lane.b32.xlu1 %v1500_v35, %s6369_s27  ;;  %6499 = vst [vmem:[#allocation155_spill] sm:$0xff] %v4868_v49  ;;  %v1542_v35 = vmul.f32 %v1541_v43, %v4163_v6 }
 0x1d4   : > { %v4866_v45 = vpop.permute.xlu1 %941 }
 0x1d5   : > { %6498 = vst [vmem:[#allocation154_spill] sm:$0xff] %v4866_v45 }
 0x1d6   : > { %1525 = vrot.lane.b32.xlu0 %v1519_v37, %s6369_s27  ;;  %v1543_v37 = vmul.f32 %v1541_v43, %v4041_v31 }
 0x1d7   : > { %1527 = vrot.lane.b32.xlu1 %v1520_v42, %s6369_s27  ;;  %v1544_v42 = vmul.f32 %v1541_v43, %v4098_v48 }
 0x1d8   : > { %v4876_v39 = vpop.permute.xlu0 %984 }
 0x1d9   : > { %v4874_v17 = vpop.permute.xlu1 %982  ;;  %6501 = vst [vmem:[#allocation157_spill] sm:$0xff] %v4876_v39 }
 0x1da   : > { %6500 = vst [vmem:[#allocation156_spill] sm:$0xff] %v4874_v17  ;;  %1529 = vrot.lane.b32.xlu0 %v1521_v36, %s6369_s27  ;;  %v1562_v17 = vstv %s3287_s2 }
 0x1db   : > { %1548 = vrot.lane.b32.xlu1 %v1542_v35, %s6426_s13  ;;  %v1564_v35 = vmul.f32 %v1562_v17, %v4000_v23  ;;  %v1563_v36 = vmul.f32 %v1562_v17, %v3981_v15 }
 0x1dc   : > { %v4884_v45 = vpop.permute.xlu0 %1020 }
 0x1dd   : > { %v4882_v49 = vpop.permute.xlu1 %1022  ;;  %6503 = vst [vmem:[#allocation159_spill] sm:$0xff] %v4884_v45 }
 0x1de   : > { %6502 = vst [vmem:[#allocation158_spill] sm:$0xff] %v4882_v49  ;;  %1550 = vrot.lane.b32.xlu0 %v1543_v37, %s6426_s13  ;;  %v1585_v49 = vstv %s3288_s4  ;;  %v1565_v37 = vmul.f32 %v1562_v17, %v4003_v24  ;;  %v475_v17 = vld [vmem:[%s6186_s3 + $0x8] sm:$0xff]  ;;  %s3687_s4 = smov 127  }
 0x1df   : > { %1552 = vrot.lane.b32.xlu1 %v1544_v42, %s6426_s13  ;;  %v1586_v42 = vmul.f32 %v1585_v49, %v4163_v6 }
 0x1e0   : > { %v4892_v26 = vpop.permute.xlu0 %1024 }
 0x1e1   : > { %v4890_v39 = vpop.permute.xlu1 %1063  ;;  %6505 = vst [vmem:[#allocation161_spill] sm:$0xff] %v4892_v26 }
 0x1e2   : > { %6504 = vst [vmem:[#allocation160_spill] sm:$0xff] %v4890_v39  ;;  %1569 = vrot.lane.b32.xlu0 %v1563_v36, %s6426_s13  ;;  %v469_v43 = vpop.f32.mrb[0].mxu0 }
 0x1e3   : > { %1571 = vrot.lane.b32.xlu1 %v1564_v35, %s6426_s13  ;;  %v470_v39 = vadd.f32 %v469_v43, %v3972_v9  ;;  %v3394_v40 = vpop.f32.mrb[1].mxu0  ;;  %v1587_v9 = vmul.f32 %v1585_v49, %v4041_v31  ;;  %v1606_v43 = vstv %s3289_s25  ;;  %s3688_s25 = smov 126  }
 0x1e4   : > { %v4903_v26 = vpop.permute.xlu0 %1061  ;;  %v476_v40 = vld [vmem:[%s6186_s3 + $0x10] sm:$0xff] }
 0x1e5   : > { %v4898_v45 = vpop.permute.xlu1 %1081  ;;  %6507 = vst [vmem:[#allocation163_spill] sm:$0xff] %v4903_v26  ;;  %v473_v35 = vmax.f32 %v470_v39, 0.0 }
 0x1e6   : > { %6506 = vst [vmem:[#allocation162_spill] sm:$0xff] %v4898_v45  ;;  %1573 = vrot.lane.b32.xlu0 %v1565_v37, %s6426_s13  ;;  %v1588_v45 = vmul.f32 %v1585_v49, %v4098_v48  ;;  %v477_v49 = vld [vmem:[%s6186_s3 + $0x18] sm:$0xff] }
 0x1e7   : > { %1592 = vrot.lane.b32.xlu1 %v1586_v42, %s6387_s24  ;;  %3395 = vmatprep.subr.msk.mxu1 %vm555_vm5, %v473_v35  ;;  %v1608_v42 = vmul.f32 %v1606_v43, %v4000_v23 }
 0x1e8   : > { %v4913_v19 = vpop.permute.xlu0 %1065  ;;  %3396 = vmatpush3.msk.msra.mxu1 %vm555_vm5, %v473_v35  ;;  %v1607_v35 = vmul.f32 %v1606_v43, %v3981_v15 }
 0x1e9   : > { %v4907_v36 = vpop.permute.xlu1 %1085  ;;  %6509 = vst [vmem:[#allocation165_spill] sm:$0xff] %v4913_v19  ;;  %3398 = vmatmul.mubr.msk.f32.vlgmr.msra.gmra.mrb[0].mxu1 %vm530_vm4, %v475_v17  ;;  %v1609_v19 = vmul.f32 %v1606_v43, %v4003_v24  ;;  %v481_v43 = vld [vmem:[%s6186_s3 + $0x38] sm:$0xff] }
 0x1ea   : > { %6508 = vst [vmem:[#allocation164_spill] sm:$0xff] %v4907_v36  ;;  %1594 = vrot.lane.b32.xlu0 %v1587_v9, %s6387_s24  ;;  %3400 = vmatprep.mubr.msk.f32.mxu1 %vm530_vm4, %v476_v40  ;;  %v1629_v9 = vstv %s3290_s22  ;;  %v479_v36 = vld [vmem:[%s6186_s3 + $0x28] sm:$0xff]  ;;  %s3689_s22 = smov 125  }
 0x1eb   : > { %1596 = vrot.lane.b32.xlu1 %v1588_v45, %s6387_s24  ;;  %v478_v45 = vld [vmem:[%s6186_s3 + $0x20] sm:$0xff]  ;;  %v1630_v40 = vmul.f32 %v1629_v9, %v4163_v6  ;;  %v1631_v26 = vmul.f32 %v1629_v9, %v4041_v31 }
 0x1ec   : > { %v4929_v37 = vpop.permute.xlu0 %1083 }
 0x1ed   : > { %v4922_v39 = vpop.permute.xlu1 %1144  ;;  %6510 = vst [vmem:[#allocation166_spill] sm:$0xff] %v4929_v37  ;;  %3401 = vmatmul.mubr.msk.f32.gmra.mrb[2].mxu1 %vm530_vm4, %v477_v49 }
 0x1ee   : > { %1613 = vrot.lane.b32.xlu0 %v1607_v35, %s6387_s24  ;;  %3403 = vmatprep.mubr.msk.f32.mxu1 %vm530_vm4, %v478_v45  ;;  %v1632_v35 = vmul.f32 %v1629_v9, %v4098_v48  ;;  %v1674_v9 = vmul.f32 %v1673_v8, %v4163_v6 }
 0x1ef   : > { %1615 = vrot.lane.b32.xlu1 %v1608_v42, %s6387_s24  ;;  %v480_v42 = vld [vmem:[%s6186_s3 + $0x30] sm:$0xff] }
 0x1f0   : > { %v1143_v37 = vpop.permute.xlu0 %1142 }
 0x1f1   : > { %v4938_v17 = vpop.permute.xlu1 %1163  ;;  %3404 = vmatmul.mubr.msk.f32.gmra.mrb[4].mxu1 %vm530_vm4, %v479_v36  ;;  %v1652_v36 = vmul.f32 %v1650_v56, %v4000_v23 }
 0x1f2   : > { %1617 = vrot.lane.b32.xlu0 %v1609_v19, %s6387_s24  ;;  %3406 = vmatprep.mubr.msk.f32.mxu1 %vm530_vm4, %v480_v42  ;;  %v1651_v42 = vmul.f32 %v1650_v56, %v3981_v15 }
 0x1f3   : > { %1636 = vrot.lane.b32.xlu1 %v1630_v40, %s6400_s26 }
 0x1f4   : > { %v1147_v45 = vpop.permute.xlu0 %1146 }
 0x1f5   : > { %v1168_v49 = vpop.permute.xlu1 %1167  ;;  %3407 = vmatmul.mubr.msk.f32.gmra.mrb[6].mxu1 %vm530_vm4, %v481_v43  ;;  %v1676_v43 = vmul.f32 %v1673_v8, %v4098_v48  ;;  %v1155_v8 = vadd.f32 %v1147_v45, %v4165_v1  ;;  %v1149_v1 = vsel %vm863_vm6, %v4922_v39, %v1147_v45 }
 0x1f6   : > { %1638 = vrot.lane.b32.xlu0 %v1631_v26, %s6400_s26 }
 0x1f7   : > { %1640 = vrot.lane.b32.xlu1 %v1632_v35, %s6400_s26  ;;  %v1653_v35 = vmul.f32 %v1650_v56, %v4003_v24  ;;  %v1176_v11 = vadd.f32 %v1168_v49, %v1155_v8  ;;  %v1148_v24 = vsel %vm863_vm6, %v1143_v37, %v4922_v39 }
 0x1f8   : > { %v1166_v40 = vpop.permute.xlu0 %1165  ;;  %v1153_v47 = vadd.f32 %v1148_v24, %v1130_v60 }
 0x1f9   : > { %v1189_v19 = vpop.permute.xlu1 %1188  ;;  %v1169_v8 = vsel %vm863_vm6, %v4938_v17, %v1166_v40  ;;  %v1170_v46 = vsel %vm863_vm6, %v1166_v40, %v1168_v49 }
 0x1fa   : > { %1657 = vrot.lane.b32.xlu0 %v1651_v42, %s6400_s26  ;;  %v1696_v42 = vmul.f32 %v4110_v52, %v4000_v23  ;;  %v1174_v61 = vadd.f32 %v1169_v8, %v1153_v47 }
 0x1fb   : > { %1659 = vrot.lane.b32.xlu1 %v1652_v36, %s6400_s26 }
 0x1fc   : > { %v1187_v2 = vpop.permute.xlu0 %1186 }
 0x1fd   : > { %v1208_v12 = vpop.permute.xlu1 %1207  ;;  %v1192_v57 = vsel %vm904_vm7, %v1187_v2, %v1189_v19 }
 0x1fe   : > { %1661 = vrot.lane.b32.xlu0 %v1653_v35, %s6400_s26  ;;  %v1197_v49 = vadd.f32 %v1192_v57, %v1174_v61 }
 0x1ff   : > { %1680 = vrot.lane.b32.xlu1 %v1674_v9, %s3685_s14 }
 0x200   : > { %v1191_v27 = vpop.permute.xlu0 %1190 }
 0x201   : > { %v1212_v26 = vpop.permute.xlu1 %1211  ;;  %v1193_v37 = vsel %vm904_vm7, %v1189_v19, %v1191_v27 }
 0x202   : > { %1682 = vrot.lane.b32.xlu0 %v1675_v5, %s3685_s14 }
 0x203   : > { %1684 = vrot.lane.b32.xlu1 %v1676_v43, %s3685_s14 }
 0x204   : > { %v1210_v7 = vpop.permute.xlu0 %1209 }
 0x205   : > { %v1233_v36 = vpop.permute.xlu1 %1232  ;;  %v1213_v41 = vsel %vm904_vm7, %v1208_v12, %v1210_v7  ;;  %v1214_v10 = vsel %vm904_vm7, %v1210_v7, %v1212_v26 }
 0x206   : > { %v1218_v60 = vadd.f32 %v1213_v41, %v1197_v49  ;;  %v3686_v41 = vmov 1966171168  }
 0x207   : > { %1703 = vrot.lane.b32.xlu1 %v1696_v42, %s3685_s14  ;;  %v1199_v42 = vadd.f32 %v1191_v27, %v1176_v11  ;;  %v1154_v11 = vadd.f32 %v1149_v1, %v4152_v3 }
 0x208   : > { %v1231_v9 = vpop.permute.xlu0 %1230 }
 0x209   : > { %v1252_v56 = vpop.permute.xlu1 %1251  ;;  %v1220_v31 = vadd.f32 %v1212_v26, %v1199_v42  ;;  %v1175_v39 = vadd.f32 %v1170_v46, %v1154_v11  ;;  %v1236_v3 = vsel %vm945_vm8, %v1231_v9, %v1233_v36 }
 0x20a   : > { %v1241_v12 = vadd.f32 %v1236_v3, %v1218_v60 }
 0x20b   : > { %v1198_v45 = vadd.f32 %v1193_v37, %v1175_v39 }
 0x20c   : > { %v1235_v50 = vpop.permute.xlu0 %1234 }
 0x20d   : > { %v1256_v35 = vpop.permute.xlu1 %1255  ;;  %v1243_v51 = vadd.f32 %v1235_v50, %v1220_v31  ;;  %v1237_v31 = vsel %vm945_vm8, %v1233_v36, %v1235_v50  ;;  %v1219_v2 = vadd.f32 %v1214_v10, %v1198_v45 }
 0x20f   : > { %v1264_v40 = vadd.f32 %v1256_v35, %v1243_v51  ;;  %v1242_v1 = vadd.f32 %v1237_v31, %v1219_v2 }
 0x210   : > { %v1254_v44 = vpop.permute.xlu0 %1253 }
 0x211   : > { %v1277_v18 = vpop.permute.xlu1 %1276  ;;  %v1257_v27 = vsel %vm945_vm8, %v1252_v56, %v1254_v44  ;;  %v1258_v19 = vsel %vm945_vm8, %v1254_v44, %v1256_v35 }
 0x212   : > { %v1262_v61 = vadd.f32 %v1257_v27, %v1241_v12  ;;  %v1263_v8 = vadd.f32 %v1258_v19, %v1242_v1 }
 0x214   : > { %v1275_v0 = vpop.permute.xlu0 %1274 }
 0x215   : > { %v1296_v20 = vpop.permute.xlu1 %1295  ;;  %v1280_v57 = vsel %vm399_vm2, %v1275_v0, %v1277_v18 }
 0x216   : > { %v1285_v46 = vadd.f32 %v1280_v57, %v1262_v61 }
 0x218   : > { %v1279_v5 = vpop.permute.xlu0 %1278 }
 0x219   : > { %v1300_v43 = vpop.permute.xlu1 %1299  ;;  %v1287_v42 = vadd.f32 %v1279_v5, %v1264_v40  ;;  %v1281_v51 = vsel %vm399_vm2, %v1277_v18, %v1279_v5  ;;  %v1099_v18 = vlaneseq }
 0x21a   : > { %v1286_v56 = vadd.f32 %v1281_v51, %v1263_v8 }
 0x21b   : > { %v1308_v9 = vadd.f32 %v1300_v43, %v1287_v42  ;;  %v5007_v60 = vshrl.u32 %v1099_v18, 7 }
 0x21c   : > { %v1298_v38 = vpop.permute.xlu0 %1297 }
 0x21d   : > { %v1321_v28 = vpop.permute.xlu1 %1320  ;;  %v1301_v50 = vsel %vm399_vm2, %v1296_v20, %v1298_v38  ;;  %v1302_v36 = vsel %vm399_vm2, %v1298_v38, %v1300_v43  ;;  %v1097_v38 = vunpack.c.l.s4 %v3686_v41  ;;  %6511 = vst [vmem:[#allocation167_spill] sm:$0xff] %v5007_v60  ;;  %v1881_v41 = vmul.f32 %v4195_v22, %v4000_v23 }
 0x21e   : > { %v1306_v37 = vadd.f32 %v1301_v50, %v1285_v46  ;;  %v1307_v0 = vadd.f32 %v1302_v36, %v1286_v56  ;;  %v1695_v50 = vmul.f32 %v4110_v52, %v3981_v15  ;;  %v1771_v36 = vmul.f32 %v4119_v55, %v4163_v6 }
 0x21f   : > { %v1098_v31 = vunpack.c.0.s8 %v1097_v38  ;;  %v1773_v46 = vmul.f32 %v4119_v55, %v4098_v48  ;;  %v1793_v52 = vmul.f32 %v4155_v4, %v4000_v23  ;;  %v1817_v55 = vmul.f32 %v4132_v58, %v4098_v48 }
 0x220   : > { %v1319_v32 = vpop.permute.xlu0 %1318 }
 0x221   : > { %v1340_v13 = vpop.permute.xlu1 %1339  ;;  %v1324_v35 = vsel %vm1026_vm9, %v1319_v32, %v1321_v28  ;;  %v5012_v57 = vsub.s32 %v1098_v31, %v5007_v60  ;;  %v1949_v31 = vmul.f32 %v4147_v63, %v4098_v48  ;;  %v6547_v60 = vld [vmem:[#allocation58_spill] sm:$0xff] }
 0x222   : > { %v1329_v43 = vadd.f32 %v1324_v35, %v1306_v37  ;;  %v1837_v37 = vmul.f32 %v4186_v16, %v4000_v23 }
 0x223   : > { %6512 = vst [vmem:[#allocation168_spill] sm:$0xff] %v5012_v57 }
 0x224   : > { %v1323_v24 = vpop.permute.xlu0 %1322 }
 0x225   : > { %v1344_v17 = vpop.permute.xlu1 %1343  ;;  %v1331_v47 = vadd.f32 %v1323_v24, %v1308_v9  ;;  %v1325_v11 = vsel %vm1026_vm9, %v1321_v28, %v1323_v24 }
 0x226   : > { %v1330_v10 = vadd.f32 %v1325_v11, %v1307_v0 }
 0x227   : > { %v1352_v49 = vadd.f32 %v1344_v17, %v1331_v47 }
 0x228   : > { %v1342_v26 = vpop.permute.xlu0 %1341 }
 0x229   : > { %v1365_v7 = vpop.permute.xlu1 %1364  ;;  %v1345_v5 = vsel %vm1026_vm9, %v1340_v13, %v1342_v26  ;;  %v1346_v20 = vsel %vm1026_vm9, %v1342_v26, %v1344_v17 }
 0x22a   : > { %v1350_v28 = vadd.f32 %v1345_v5, %v1329_v43  ;;  %v1351_v24 = vadd.f32 %v1346_v20, %v1330_v10  ;;  %v1903_v43 = vmul.f32 %v4144_v62, %v4163_v6 }
 0x22c   : > { %v1363_v44 = vpop.permute.xlu0 %1362 }
 0x22d   : > { %v1384_v39 = vpop.permute.xlu1 %1383  ;;  %v1368_v40 = vsel %vm1067_vm10, %v1363_v44, %v1365_v7 }
 0x22e   : > { %v1373_v2 = vadd.f32 %v1368_v40, %v1350_v28  ;;  %v1925_v40 = vmul.f32 %v4214_v30, %v4000_v23  ;;  %v1947_v28 = vmul.f32 %v4147_v63, %v4163_v6 }
 0x230   : > { %v1367_v45 = vpop.permute.xlu0 %1366 }
 0x231   : > { %v1369_v32 = vsel %vm1067_vm10, %v1365_v7, %v1367_v45  ;;  %v1375_v3 = vadd.f32 %v1367_v45, %v1352_v49  ;;  %v1388_v13 = vpop.permute.xlu1 %1387  ;;  %v1905_v45 = vmul.f32 %v4144_v62, %v4098_v48 }
 0x232   : > { %v1374_v42 = vadd.f32 %v1369_v32, %v1351_v24 }
 0x233   : > { %v1396_v17 = vadd.f32 %v1388_v13, %v1375_v3 }
 0x234   : > { %v1386_v27 = vpop.permute.xlu0 %1385 }
 0x235   : > { %v1389_v19 = vsel %vm1067_vm10, %v1384_v39, %v1386_v27  ;;  %v1390_v12 = vsel %vm1067_vm10, %v1386_v27, %v1388_v13  ;;  %v1414_v51 = vrot.slane %v1396_v17, %v5012_v57  ;;  %v5029_v56 = vpop.permute.xlu1 %1460  ;;  %v1859_v39 = vmul.f32 %v4135_v59, %v4163_v6 }
 0x236   : > { %v1394_v1 = vadd.f32 %v1389_v19, %v1373_v2  ;;  %v1395_v26 = vadd.f32 %v1390_v12, %v1374_v42  ;;  %v1969_v2 = vmul.f32 %v4221_v33, %v4000_v23  ;;  %v1991_v42 = vmul.f32 %v4198_v25, %v4163_v6 }
 0x237   : > { %v1993_v12 = vmul.f32 %v4198_v25, %v4098_v48  ;;  %v2013_v17 = vmul.f32 %v4224_v34, %v4000_v23 }
 0x238   : > { %v1400_v7 = vcombine.low %v1394_v1, %v1395_v26  ;;  %v1463_v47 = vpop.permute.xlu0 %1462 }
 0x239   : > { %v5036_v44 = vpop.permute.xlu1 %1464 }
 0x23a   : > { %v1407_v61 = vrot.slane %v1400_v7, %v5012_v57 }
 0x23c   : > { %v1415_v8 = vcombine.low %v1407_v61, %v1414_v51  ;;  %v1482_v35 = vpop.permute.xlu0 %1481 }
 0x23d   : > { %v1484_v11 = vpop.permute.xlu1 %1483 }
 0x23e   : > { %v1422_v9 = vrot.slane %v1415_v8, %v5012_v57  ;;  %v1438_v8 = vmul.f32 %v4113_v53, %v4163_v6  ;;  %v1473_v53 = vadd.f32 %v5036_v44, %v4192_v21 }
 0x240   : > { %1423 = vrot.lane.b32.xlu0 %v1422_v9, %s3687_s4  ;;  %v5044_v0 = vpop.permute.xlu0 %1485  ;;  %v1445_v9 = vmul.f32 %v4116_v54, %v3981_v15 }
 0x241   : > { %v1505_v18 = vpop.permute.xlu1 %1504 }
 0x244   : > { %1701 = vrot.lane.b32.xlu0 %v1695_v50, %s3685_s14  ;;  %v1507_v5 = vpop.permute.xlu0 %1506 }
 0x245   : > { %v1509_v20 = vpop.permute.xlu1 %1508 }
 0x248   : > { %1705 = vrot.lane.b32.xlu0 %v4183_v14, %s3685_s14  ;;  %v1815_v14 = vmul.f32 %v4132_v58, %v4163_v6  ;;  %v1861_v58 = vmul.f32 %v4135_v59, %v4098_v48  ;;  %v1526_v38 = vpop.permute.xlu0 %1525 }
 0x249   : > { %v1528_v10 = vpop.permute.xlu1 %1527 }
 0x24c   : > { %1777 = vrot.lane.b32.xlu0 %v1771_v36, %s6374_s21  ;;  %v1530_v49 = vpop.permute.xlu0 %1529  ;;  %v1466_v36 = vsel %vm863_vm6, %v5029_v56, %v1463_v47  ;;  %v1511_v56 = vsel %vm904_vm7, %v1507_v5, %v1509_v20 }
 0x24d   : > { %v1549_v59 = vpop.permute.xlu1 %1548 }
 0x250   : > { %1781 = vrot.lane.b32.xlu0 %v1773_v46, %s6374_s21  ;;  %v1551_v32 = vpop.permute.xlu0 %1550  ;;  %v1467_v46 = vsel %vm863_vm6, %v1463_v47, %v5036_v44  ;;  %v1494_v47 = vadd.f32 %v5044_v0, %v1473_v53 }
 0x251   : > { %v1553_v24 = vpop.permute.xlu1 %1552  ;;  %v1472_v54 = vadd.f32 %v1467_v46, %v4211_v29  ;;  %v1554_v44 = vsel %vm945_vm8, %v1549_v59, %v1551_v32 }
 0x252   : > { %v1555_v29 = vsel %vm945_vm8, %v1551_v32, %v1553_v24 }
 0x254   : > { %1800 = vrot.lane.b32.xlu0 %v1793_v52, %s6374_s21  ;;  %v1570_v3 = vpop.permute.xlu0 %1569  ;;  %v1448_v52 = vadd.f32 %v1445_v9, %v1438_v8 }
 0x255   : > { %v1572_v62 = vpop.permute.xlu1 %1571 }
 0x258   : > { %1821 = vrot.lane.b32.xlu0 %v1815_v14, %s6369_s27  ;;  %v1574_v13 = vpop.permute.xlu0 %1573  ;;  %v1487_v14 = vsel %vm863_vm6, %v1482_v35, %v1484_v11  ;;  %v1531_v35 = vsel %vm904_vm7, %v1526_v38, %v1528_v10 }
 0x259   : > { %v1593_v27 = vpop.permute.xlu1 %1592 }
 0x25c   : > { %1825 = vrot.lane.b32.xlu0 %v1817_v55, %s6369_s27  ;;  %v1595_v19 = vpop.permute.xlu0 %1594  ;;  %v1488_v55 = vsel %vm863_vm6, %v1484_v11, %v5044_v0  ;;  %v1532_v11 = vsel %vm904_vm7, %v1528_v10, %v1530_v49  ;;  %v1576_v0 = vsel %vm945_vm8, %v1572_v62, %v1574_v13 }
 0x25d   : > { %v1597_v63 = vpop.permute.xlu1 %1596 }
 0x25e   : > { %v1599_v10 = vsel %vm399_vm2, %v1595_v19, %v1597_v63 }
 0x260   : > { %1844 = vrot.lane.b32.xlu0 %v1837_v37, %s6369_s27  ;;  %v1614_v1 = vpop.permute.xlu0 %1613  ;;  %v1471_v37 = vadd.f32 %v1466_v36, %v1448_v52 }
 0x261   : > { %v1616_v26 = vpop.permute.xlu1 %1615 }
 0x262   : > { %v1619_v32 = vsel %vm399_vm2, %v1614_v1, %v1616_v26 }
 0x264   : > { %1865 = vrot.lane.b32.xlu0 %v1859_v39, %s6426_s13  ;;  %v1618_v7 = vpop.permute.xlu0 %1617 }
 0x265   : > { %v1637_v51 = vpop.permute.xlu1 %1636 }
 0x268   : > { %1869 = vrot.lane.b32.xlu0 %v1861_v58, %s6426_s13  ;;  %v1639_v61 = vpop.permute.xlu0 %1638  ;;  %v1510_v58 = vsel %vm904_vm7, %v1505_v18, %v1507_v5 }
 0x269   : > { %v1641_v25 = vpop.permute.xlu1 %1640 }
 0x26c   : > { %1888 = vrot.lane.b32.xlu0 %v1881_v41, %s6426_s13  ;;  %v1658_v50 = vpop.permute.xlu0 %1657  ;;  %v1492_v41 = vadd.f32 %v1487_v14, %v1471_v37 }
 0x26d   : > { %v1660_v39 = vpop.permute.xlu1 %1659 }
 0x26e   : > { %v1663_v37 = vsel %vm1026_vm9, %v1658_v50, %v1660_v39 }
 0x270   : > { %1909 = vrot.lane.b32.xlu0 %v1903_v43, %s6387_s24  ;;  %v1493_v43 = vadd.f32 %v1488_v55, %v1472_v54  ;;  %v1643_v55 = vsel %vm1026_vm9, %v1639_v61, %v1641_v25 }
 0x271   : > { %v1681_v5 = vpop.permute.xlu1 %1680 }
 0x272   : > { %v1516_v21 = vadd.f32 %v1511_v56, %v1493_v43 }
 0x274   : > { %1913 = vrot.lane.b32.xlu0 %v1905_v45, %s6387_s24  ;;  %v1662_v45 = vpop.permute.xlu0 %1661  ;;  %v1537_v18 = vadd.f32 %v1532_v11, %v1516_v21 }
 0x275   : > { %v1685_v14 = vpop.permute.xlu1 %1684 }
 0x276   : > { %v1560_v38 = vadd.f32 %v1555_v29, %v1537_v18 }
 0x278   : > { %1932 = vrot.lane.b32.xlu0 %v1925_v40, %s6387_s24  ;;  %v1517_v40 = vadd.f32 %v1509_v20, %v1494_v47  ;;  %v1683_v8 = vpop.permute.xlu0 %1682  ;;  %v1598_v20 = vsel %vm399_vm2, %v1593_v27, %v1595_v19  ;;  %v1581_v59 = vadd.f32 %v1576_v0, %v1560_v38  ;;  %v6514_v38 = vld [vmem:[#allocation35_spill] sm:$0xff] }
 0x279   : > { %v1687_v56 = vsel %vm1067_vm10, %v1683_v8, %v1685_v14  ;;  %v1704_v47 = vpop.permute.xlu1 %1703 }
 0x27c   : > { %1953 = vrot.lane.b32.xlu0 %v1947_v28, %s6400_s26  ;;  %v1515_v28 = vadd.f32 %v1510_v58, %v1492_v41  ;;  %v1686_v58 = vsel %vm1067_vm10, %v1681_v5, %v1683_v8 }
 0x280   : > { %1957 = vrot.lane.b32.xlu0 %v1949_v31, %s6400_s26  ;;  %v1536_v31 = vadd.f32 %v1531_v35, %v1515_v28 }
 0x284   : > { %1976 = vrot.lane.b32.xlu0 %v1969_v2, %s6400_s26  ;;  %v1538_v2 = vadd.f32 %v1530_v49, %v1517_v40  ;;  %v1620_v49 = vsel %vm399_vm2, %v1616_v26, %v1618_v7 }
 0x288   : > { %1997 = vrot.lane.b32.xlu0 %v1991_v42, %s3685_s14  ;;  %v1575_v42 = vsel %vm945_vm8, %v1570_v3, %v1572_v62  ;;  %v1604_v3 = vadd.f32 %v1599_v10, %v1581_v59  ;;  %v6515_v10 = vld [vmem:[#allocation36_spill] sm:$0xff]  ;;  %v1836_v59 = vmul.f32 %v4186_v16, %v3981_v15  ;;  %v1924_v16 = vmul.f32 %v4214_v30, %v3981_v15 }
 0x289   : > { %v2012_v30 = vmul.f32 %v4224_v34, %v3981_v15 }
 0x28a   : > { %v1625_v53 = vadd.f32 %v1620_v49, %v1604_v3  ;;  %v6519_v49 = vld [vmem:[#allocation40_spill] sm:$0xff] }
 0x28b   : > { %v6522_v3 = vld [vmem:[#allocation44_spill] sm:$0xff] }
 0x28c   : > { %2001 = vrot.lane.b32.xlu0 %v1993_v12, %s3685_s14  ;;  %v1561_v12 = vadd.f32 %v1553_v24, %v1538_v2  ;;  %v1642_v24 = vsel %vm1026_vm9, %v1637_v51, %v1639_v61  ;;  %v1648_v26 = vadd.f32 %v1643_v55, %v1625_v53  ;;  %v6525_v55 = vld [vmem:[#allocation47_spill] sm:$0xff] }
 0x28e   : > { %v1582_v36 = vadd.f32 %v1574_v13, %v1561_v12  ;;  %v1664_v13 = vsel %vm1026_vm9, %v1660_v39, %v1662_v45 }
 0x28f   : > { %v1669_v43 = vadd.f32 %v1664_v13, %v1648_v26  ;;  %v6528_v13 = vld [vmem:[#allocation34_spill] sm:$0xff] }
 0x290   : > { %2020 = vrot.lane.b32.xlu0 %v2013_v17, %s3685_s14  ;;  %v1559_v17 = vadd.f32 %v1554_v44, %v1536_v31  ;;  %v1605_v46 = vadd.f32 %v1597_v63, %v1582_v36  ;;  %v6517_v36 = vld [vmem:[#allocation38_spill] sm:$0xff]  ;;  %v2135_v26 = vmul.f32 %v6528_v13, %v4098_v48 }
 0x291   : > { %v1692_v11 = vadd.f32 %v1687_v56, %v1669_v43 }
 0x292   : > { %v1580_v9 = vadd.f32 %v1575_v42, %v1559_v17  ;;  %v1626_v19 = vadd.f32 %v1618_v7, %v1605_v46  ;;  %v6520_v46 = vld [vmem:[#allocation41_spill] sm:$0xff] }
 0x294   : > { %v1603_v52 = vadd.f32 %v1598_v20, %v1580_v9  ;;  %v1649_v1 = vadd.f32 %v1641_v25, %v1626_v19  ;;  %v1792_v20 = vmul.f32 %v4155_v4, %v3981_v15  ;;  %v6516_v9 = vld [vmem:[#allocation37_spill] sm:$0xff]  ;;  %v1880_v4 = vmul.f32 %v4195_v22, %v3981_v15 }
 0x295   : > { %v1968_v22 = vmul.f32 %v4221_v33, %v3981_v15 }
 0x296   : > { %v1624_v27 = vadd.f32 %v1619_v32, %v1603_v52  ;;  %v1670_v51 = vadd.f32 %v1662_v45, %v1649_v1  ;;  %v6518_v32 = vld [vmem:[#allocation39_spill] sm:$0xff]  ;;  %v2133_v1 = vmul.f32 %v6528_v13, %v4163_v6 }
 0x297   : > { %v6521_v52 = vld [vmem:[#allocation43_spill] sm:$0xff] }
 0x298   : > { %v1647_v54 = vadd.f32 %v1642_v24, %v1624_v27  ;;  %v1693_v35 = vadd.f32 %v1685_v14, %v1670_v51  ;;  %v6523_v14 = vld [vmem:[#allocation45_spill] sm:$0xff]  ;;  %v6524_v24 = vld [vmem:[#allocation46_spill] sm:$0xff] }
 0x299   : > { %v6526_v27 = vld [vmem:[#allocation33_spill] sm:$0xff] }
 0x29a   : > { %v1668_v41 = vadd.f32 %v1663_v37, %v1647_v54  ;;  %v2089_v53 = vmul.f32 %v6526_v27, %v4163_v6  ;;  %v2091_v33 = vmul.f32 %v6526_v27, %v4098_v48  ;;  %v6527_v37 = vld [vmem:[#allocation50_spill] sm:$0xff] }
 0x29b   : > { %v2111_v34 = vmul.f32 %v6527_v37, %v4000_v23 }
 0x29c   : > { %v1691_v7 = vadd.f32 %v1686_v58, %v1668_v41  ;;  %v6529_v58 = vld [vmem:[#allocation51_spill] sm:$0xff]  ;;  %v6530_v41 = vld [vmem:[#allocation48_spill] sm:$0xff] }
 0x29d   : > { %v2155_v56 = vmul.f32 %v6529_v58, %v4000_v23  ;;  %v2177_v43 = vmul.f32 %v6530_v41, %v4163_v6 }
 0x2b2   : > { %v5110_v62 = vpop.permute.xlu0 %1423 }
 0x2b3   : > { %6513 = vst [vmem:[#allocation169_spill] sm:$0xff] %v5110_v62 }
 0x2b6   : > { %v1702_v63 = vpop.permute.xlu0 %1701 }
 0x2b7   : > { %v1707_v61 = vsel %vm1067_vm10, %v1702_v63, %v1704_v47 }
 0x2b8   : > { %v1712_v25 = vadd.f32 %v1707_v61, %v1691_v7 }
 0x2ba   : > { %v1706_v50 = vpop.permute.xlu0 %1705 }
 0x2bb   : > { %v1708_v39 = vsel %vm1067_vm10, %v1704_v47, %v1706_v50  ;;  %v1714_v28 = vadd.f32 %v1706_v50, %v1693_v35  ;;  %v2179_v47 = vmul.f32 %v6530_v41, %v4098_v48  ;;  %v6531_v35 = vld [vmem:[#allocation52_spill] sm:$0xff] }
 0x2bc   : > { %v1713_v40 = vadd.f32 %v1708_v39, %v1692_v11  ;;  %v5120_v21 = vpop.f32.mrb[0].mxu1  ;;  %v2199_v7 = vmul.f32 %v6531_v35, %v4000_v23  ;;  %v6532_v11 = vld [vmem:[#allocation49_spill] sm:$0xff] }
 0x2bd   : > { %v5122_v29 = vpop.f32.mrb[1].mxu1  ;;  %v1732_v45 = vrot.slane %v1714_v28, %v5012_v57  ;;  %v2221_v50 = vmul.f32 %v6532_v11, %v4163_v6 }
 0x2be   : > { %v1718_v44 = vcombine.low %v1712_v25, %v1713_v40  ;;  %v5187_v19 = vpop.permute.xlu0 %1777  ;;  %v2223_v40 = vmul.f32 %v6532_v11, %v4098_v48  ;;  %v6543_v11 = vld [vmem:[#allocation42_spill] sm:$0xff] }
 0x2c0   : > { %v1725_v31 = vrot.slane %v1718_v44, %v5012_v57  ;;  %v5126_v18 = vpop.f32.mrb[2].mxu1 }
 0x2c1   : > { %v5128_v5 = vpop.f32.mrb[3].mxu1 }
 0x2c2   : > { %v1733_v2 = vcombine.low %v1725_v31, %v1732_v45  ;;  %v5194_v54 = vpop.permute.xlu0 %1781  ;;  %v6534_v31 = vld [vmem:[#allocation54_spill] sm:$0xff] }
 0x2c3   : > { %v2243_v45 = vmul.f32 %v6534_v31, %v4000_v23 }
 0x2c4   : > { %v1740_v42 = vrot.slane %v1733_v2, %v5012_v57  ;;  %v5131_v0 = vpop.f32.mrb[4].mxu1 }
 0x2c5   : > { %v5133_v12 = vpop.f32.mrb[5].mxu1 }
 0x2c6   : > { %1741 = vrot.lane.b32.xlu1 %v1740_v42, %s3688_s25  ;;  %v5200_v63 = vpop.permute.xlu0 %1800  ;;  %v6535_v42 = vld [vmem:[#allocation53_spill] sm:$0xff] }
 0x2c8   : > { %v5135_v17 = vpop.f32.mrb[6].mxu1 }
 0x2c9   : > { %v5139_v8 = vpop.f32.mrb[7].mxu1 }
 0x2ca   : > { %1779 = vrot.lane.b32.xlu1 %v6514_v38, %s6374_s21  ;;  %v5207_v51 = vpop.permute.xlu0 %1821  ;;  %v2265_v38 = vmul.f32 %v6535_v42, %v4163_v6 }
 0x2ce   : > { %1798 = vrot.lane.b32.xlu1 %v1792_v20, %s6374_s21  ;;  %v5213_v61 = vpop.permute.xlu0 %1825 }
 0x2d2   : > { %1802 = vrot.lane.b32.xlu1 %v6515_v10, %s6374_s21  ;;  %v5220_v39 = vpop.permute.xlu0 %1844 }
 0x2d6   : > { %1823 = vrot.lane.b32.xlu1 %v6516_v9, %s6369_s27  ;;  %v5228_v28 = vpop.permute.xlu0 %1865  ;;  %v2267_v9 = vmul.f32 %v6535_v42, %v4098_v48  ;;  %v6544_v42 = vld [vmem:[#allocation62_spill] sm:$0xff] }
 0x2da   : > { %1842 = vrot.lane.b32.xlu1 %v1836_v59, %s6369_s27  ;;  %v5235_v20 = vpop.permute.xlu0 %1869 }
 0x2de   : > { %1846 = vrot.lane.b32.xlu1 %v6517_v36, %s6369_s27  ;;  %v5241_v59 = vpop.permute.xlu0 %1888 }
 0x2e2   : > { %1867 = vrot.lane.b32.xlu1 %v6518_v32, %s6426_s13  ;;  %v6536_v32 = vld [vmem:[#allocation55_spill] sm:$0xff] }
 0x2e6   : > { %1886 = vrot.lane.b32.xlu1 %v1880_v4, %s6426_s13  ;;  %v2287_v4 = vmul.f32 %v6536_v32, %v4000_v23 }
 0x2ea   : > { %1890 = vrot.lane.b32.xlu1 %v6519_v49, %s6426_s13 }
 0x2ee   : > { %1911 = vrot.lane.b32.xlu1 %v6520_v46, %s6387_s24  ;;  %v6537_v46 = vld [vmem:[#allocation56_spill] sm:$0xff] }
 0x2f2   : > { %1930 = vrot.lane.b32.xlu1 %v1924_v16, %s6387_s24  ;;  %v2309_v16 = vmul.f32 %v6537_v46, %v4163_v6 }
 0x2f6   : > { %1934 = vrot.lane.b32.xlu1 %v6521_v52, %s6387_s24  ;;  %v5248_v52 = vpop.permute.xlu0 %1909 }
 0x2fa   : > { %1955 = vrot.lane.b32.xlu1 %v6522_v3, %s6400_s26 }
 0x2fe   : > { %1974 = vrot.lane.b32.xlu1 %v1968_v22, %s6400_s26  ;;  %v2311_v22 = vmul.f32 %v6537_v46, %v4098_v48 }
 0x302   : > { %1978 = vrot.lane.b32.xlu1 %v6523_v14, %s6400_s26  ;;  %v5254_v14 = vpop.permute.xlu0 %1913 }
 0x306   : > { %1999 = vrot.lane.b32.xlu1 %v6524_v24, %s3685_s14  ;;  %v5261_v13 = vpop.permute.xlu0 %1932 }
 0x30a   : > { %2018 = vrot.lane.b32.xlu1 %v2012_v30, %s3685_s14  ;;  %v6538_v30 = vld [vmem:[#allocation29_spill] sm:$0xff]  ;;  %v5267_v41 = vpop.permute.xlu0 %1953 }
 0x30e   : > { %2022 = vrot.lane.b32.xlu1 %v6525_v55, %s3685_s14  ;;  %v6539_v55 = vld [vmem:[#allocation57_spill] sm:$0xff] }
 0x30f   : > { %v2408_v27 = vmul.f32 %v6539_v55, %v6538_v30 }
 0x312   : > { %2095 = vrot.lane.b32.xlu1 %v2089_v53, %s6374_s21 }
 0x316   : > { %2099 = vrot.lane.b32.xlu1 %v2091_v33, %s6374_s21  ;;  %v6540_v33 = vld [vmem:[#allocation59_spill] sm:$0xff] }
 0x31a   : > { %2118 = vrot.lane.b32.xlu1 %v2111_v34, %s6374_s21  ;;  %v2428_v34 = vmul.f32 %v6540_v33, %v3981_v15 }
 0x31e   : > { %2139 = vrot.lane.b32.xlu1 %v2133_v1, %s6369_s27 }
 0x322   : > { %2143 = vrot.lane.b32.xlu1 %v2135_v26, %s6369_s27  ;;  %v6541_v26 = vld [vmem:[#allocation28_spill] sm:$0xff] }
 0x326   : > { %2162 = vrot.lane.b32.xlu1 %v2155_v56, %s6369_s27  ;;  %v2430_v56 = vmul.f32 %v6540_v33, %v6541_v26 }
 0x32a   : > { %2183 = vrot.lane.b32.xlu1 %v2177_v43, %s6426_s13 }
 0x32e   : > { %2187 = vrot.lane.b32.xlu1 %v2179_v47, %s6426_s13  ;;  %v6542_v47 = vld [vmem:[#allocation61_spill] sm:$0xff] }
 0x332   : > { %2206 = vrot.lane.b32.xlu1 %v2199_v7, %s6426_s13  ;;  %v2726_v7 = vmul.f32 %v6542_v47, %v6538_v30 }
 0x336   : > { %2227 = vrot.lane.b32.xlu1 %v2221_v50, %s6387_s24  ;;  %v1790_v50 = vadd.f32 %v5194_v54, %v6543_v11 }
 0x338   : > { %v5223_v25 = vpop.permute.xlu1 %1741 }
 0x339   : > { %6533 = vst [vmem:[#allocation35_spill] sm:$0xff] %v5223_v25 }
 0x33a   : > { %2231 = vrot.lane.b32.xlu1 %v2223_v40, %s6387_s24 }
 0x33c   : > { %v1780_v44 = vpop.permute.xlu1 %1779 }
 0x33e   : > { %2250 = vrot.lane.b32.xlu1 %v2243_v45, %s6387_s24 }
 0x340   : > { %v1799_v2 = vpop.permute.xlu1 %1798 }
 0x342   : > { %2271 = vrot.lane.b32.xlu1 %v2265_v38, %s6400_s26  ;;  %v2451_v38 = vmul.f32 %v6544_v42, %v4163_v6 }
 0x344   : > { %v1803_v10 = vpop.permute.xlu1 %1802 }
 0x345   : > { %v1811_v40 = vadd.f32 %v1803_v10, %v1790_v50 }
 0x346   : > { %2275 = vrot.lane.b32.xlu1 %v2267_v9, %s6400_s26  ;;  %v1958_v9 = vpop.permute.xlu0 %1957 }
 0x348   : > { %v1824_v36 = vpop.permute.xlu1 %1823 }
 0x34a   : > { %2294 = vrot.lane.b32.xlu1 %v2287_v4, %s6400_s26  ;;  %v6545_v4 = vld [vmem:[#allocation31_spill] sm:$0xff] }
 0x34b   : > { %v1755_v46 = vmul.f32 %v6545_v4, %v4163_v6  ;;  %v1804_v4 = vsel %vm863_vm6, %v1799_v2, %v5200_v63 }
 0x34c   : > { %v1843_v49 = vpop.permute.xlu1 %1842 }
 0x34e   : > { %2315 = vrot.lane.b32.xlu1 %v2309_v16, %s3685_s14  ;;  %v6546_v16 = vld [vmem:[#allocation32_spill] sm:$0xff] }
 0x350   : > { %v1847_v3 = vpop.permute.xlu1 %1846 }
 0x352   : > { %2319 = vrot.lane.b32.xlu1 %v2311_v22, %s3685_s14  ;;  %v1762_v22 = vmul.f32 %v6546_v16, %v3981_v15 }
 0x354   : > { %v1868_v24 = vpop.permute.xlu1 %1867  ;;  %v1765_v11 = vadd.f32 %v1762_v22, %v1755_v46 }
 0x356   : > { %2415 = vrot.lane.b32.xlu1 %v2408_v27, %s6374_s21  ;;  %v1834_v27 = vadd.f32 %v5213_v61, %v1811_v40  ;;  %v1805_v40 = vsel %vm863_vm6, %v5200_v63, %v1803_v10  ;;  %v1848_v63 = vsel %vm904_vm7, %v1843_v49, %v5220_v39 }
 0x358   : > { %v1887_v53 = vpop.permute.xlu1 %1886  ;;  %v1855_v50 = vadd.f32 %v1847_v3, %v1834_v27 }
 0x35a   : > { %2434 = vrot.lane.b32.xlu1 %v2428_v34, %s6374_s21  ;;  %v2453_v34 = vmul.f32 %v6544_v42, %v4098_v48  ;;  %v1878_v2 = vadd.f32 %v5235_v20, %v1855_v50 }
 0x35c   : > { %v1891_v1 = vpop.permute.xlu1 %1890 }
 0x35d   : > { %v1893_v49 = vsel %vm945_vm8, %v5241_v59, %v1891_v1 }
 0x35e   : > { %2438 = vrot.lane.b32.xlu1 %v2430_v56, %s6374_s21  ;;  %v1783_v56 = vsel %vm863_vm6, %v5187_v19, %v1780_v44  ;;  %v6548_v19 = vld [vmem:[#allocation63_spill] sm:$0xff] }
 0x35f   : > { %v1788_v16 = vadd.f32 %v1783_v56, %v1765_v11  ;;  %v2747_v62 = vmul.f32 %v6548_v19, %v4000_v23 }
 0x360   : > { %v1912_v43 = vpop.permute.xlu1 %1911 }
 0x361   : > { %v1809_v46 = vadd.f32 %v1804_v4, %v1788_v16 }
 0x362   : > { %2733 = vrot.lane.b32.xlu1 %v2726_v7, %s6374_s21  ;;  %v1784_v7 = vsel %vm863_vm6, %v1780_v44, %v5194_v54  ;;  %v1827_v54 = vsel %vm904_vm7, %v5207_v51, %v1824_v36  ;;  %v1828_v44 = vsel %vm904_vm7, %v1824_v36, %v5213_v61  ;;  %v6549_v51 = vld [vmem:[#allocation64_spill] sm:$0xff]  ;;  %v1871_v61 = vsel %vm945_vm8, %v5228_v28, %v1868_v24 }
 0x363   : > { %v1789_v42 = vadd.f32 %v1784_v7, %v6547_v60  ;;  %v1849_v60 = vsel %vm904_vm7, %v5220_v39, %v1847_v3  ;;  %v1832_v10 = vadd.f32 %v1827_v54, %v1809_v46  ;;  %v2472_v7 = vmul.f32 %v6549_v51, %v3981_v15 }
 0x364   : > { %v1931_v45 = vpop.permute.xlu1 %1930  ;;  %v1872_v36 = vsel %vm945_vm8, %v1868_v24, %v5235_v20  ;;  %v1892_v39 = vsel %vm945_vm8, %v1887_v53, %v5241_v59  ;;  %v2474_v28 = vmul.f32 %v6549_v51, %v6541_v26  ;;  %v1915_v20 = vsel %vm399_vm2, %v5248_v52, %v1912_v43  ;;  %v6550_v52 = vld [vmem:[#allocation65_spill] sm:$0xff] }
 0x365   : > { %v1810_v22 = vadd.f32 %v1805_v40, %v1789_v42  ;;  %v1853_v11 = vadd.f32 %v1848_v63, %v1832_v10  ;;  %v1916_v24 = vsel %vm399_vm2, %v1912_v43, %v5254_v14  ;;  %v1936_v59 = vsel %vm399_vm2, %v1931_v45, %v5261_v13 }
 0x366   : > { %2457 = vrot.lane.b32.xlu1 %v2451_v38, %s6369_s27  ;;  %v1977_v38 = vpop.permute.xlu0 %1976  ;;  %v2770_v63 = vmul.f32 %v6550_v52, %v6538_v30 }
 0x367   : > { %v1833_v27 = vadd.f32 %v1828_v44, %v1810_v22  ;;  %v1876_v3 = vadd.f32 %v1871_v61, %v1853_v11  ;;  %v6551_v61 = vld [vmem:[#allocation67_spill] sm:$0xff] }
 0x368   : > { %v1935_v33 = vpop.permute.xlu1 %1934 }
 0x369   : > { %v1854_v50 = vadd.f32 %v1849_v60, %v1833_v27  ;;  %v1897_v42 = vadd.f32 %v1892_v39, %v1876_v3 }
 0x36a   : > { %2461 = vrot.lane.b32.xlu1 %v2453_v34, %s6369_s27  ;;  %v1899_v34 = vadd.f32 %v1891_v1, %v1878_v2  ;;  %v1937_v1 = vsel %vm399_vm2, %v5261_v13, %v1935_v33 }
 0x36b   : > { %v1877_v4 = vadd.f32 %v1872_v36, %v1854_v50  ;;  %v1920_v46 = vadd.f32 %v1915_v20, %v1897_v42  ;;  %v2495_v36 = vmul.f32 %v6551_v61, %v4163_v6 }
 0x36c   : > { %v1956_v25 = vpop.permute.xlu1 %1955  ;;  %v1922_v40 = vadd.f32 %v5254_v14, %v1899_v34 }
 0x36d   : > { %v1898_v54 = vadd.f32 %v1893_v49, %v1877_v4  ;;  %v1959_v14 = vsel %vm1026_vm9, %v5267_v41, %v1956_v25  ;;  %v1960_v43 = vsel %vm1026_vm9, %v1956_v25, %v1958_v9  ;;  %v1941_v60 = vadd.f32 %v1936_v59, %v1920_v46 }
 0x36e   : > { %2754 = vrot.lane.b32.xlu1 %v2747_v62, %s6374_s21  ;;  %v1998_v62 = vpop.permute.xlu0 %1997  ;;  %v1943_v53 = vadd.f32 %v1935_v33, %v1922_v40  ;;  %v2497_v4 = vmul.f32 %v6551_v61, %v4098_v48 }
 0x36f   : > { %v1921_v22 = vadd.f32 %v1916_v24, %v1898_v54  ;;  %v1964_v33 = vadd.f32 %v1959_v14, %v1941_v60  ;;  %v6552_v24 = vld [vmem:[#allocation69_spill] sm:$0xff]  ;;  %v6554_v14 = vld [vmem:[#allocation68_spill] sm:$0xff] }
 0x370   : > { %v1975_v56 = vpop.permute.xlu1 %1974  ;;  %v1966_v27 = vadd.f32 %v1958_v9, %v1943_v53  ;;  %v2791_v42 = vmul.f32 %v6552_v24, %v4000_v23 }
 0x371   : > { %v1942_v10 = vadd.f32 %v1937_v1, %v1921_v22  ;;  %v1980_v45 = vsel %vm1026_vm9, %v1975_v56, %v1977_v38  ;;  %v6553_v1 = vld [vmem:[#allocation70_spill] sm:$0xff] }
 0x372   : > { %2478 = vrot.lane.b32.xlu1 %v2472_v7, %s6369_s27  ;;  %v2002_v44 = vpop.permute.xlu0 %2001  ;;  %v1985_v50 = vadd.f32 %v1980_v45, %v1964_v33  ;;  %v6557_v33 = vld [vmem:[#allocation71_spill] sm:$0xff] }
 0x373   : > { %v1965_v34 = vadd.f32 %v1960_v43, %v1942_v10  ;;  %v6555_v43 = vld [vmem:[#allocation74_spill] sm:$0xff]  ;;  %v2110_v10 = vmul.f32 %v6527_v37, %v3981_v15  ;;  %v6558_v37 = vld [vmem:[#allocation72_spill] sm:$0xff] }
 0x374   : > { %v1979_v16 = vpop.permute.xlu1 %1978  ;;  %v2814_v60 = vmul.f32 %v6555_v43, %v6538_v30 }
 0x375   : > { %v1981_v13 = vsel %vm1026_vm9, %v1977_v38, %v1979_v16  ;;  %v1987_v51 = vadd.f32 %v1979_v16, %v1966_v27  ;;  %v6556_v27 = vld [vmem:[#allocation75_spill] sm:$0xff] }
 0x376   : > { %2482 = vrot.lane.b32.xlu1 %v2474_v28, %s6369_s27  ;;  %v2021_v11 = vpop.permute.xlu0 %2020  ;;  %v1986_v9 = vadd.f32 %v1981_v13, %v1965_v34  ;;  %v2539_v45 = vmul.f32 %v6556_v27, %v4163_v6  ;;  %v2541_v34 = vmul.f32 %v6556_v27, %v4098_v48  ;;  %v6572_v27 = vld [vmem:[#allocation97_spill] sm:$0xff] }
 0x377   : > { %v2010_v3 = vadd.f32 %v2002_v44, %v1987_v51 }
 0x378   : > { %v2000_v2 = vpop.permute.xlu1 %1999 }
 0x379   : > { %v2003_v41 = vsel %vm1067_vm10, %v1998_v62, %v2000_v2  ;;  %v2004_v25 = vsel %vm1067_vm10, %v2000_v2, %v2002_v44  ;;  %v2516_v44 = vmul.f32 %v6553_v1, %v3981_v15  ;;  %v2518_v2 = vmul.f32 %v6553_v1, %v6541_v26 }
 0x37a   : > { %2777 = vrot.lane.b32.xlu1 %v2770_v63, %s6369_s27  ;;  %v2008_v39 = vadd.f32 %v2003_v41, %v1985_v50  ;;  %v2009_v38 = vadd.f32 %v2004_v25, %v1986_v9  ;;  %v6560_v41 = vld [vmem:[#allocation80_spill] sm:$0xff] }
 0x37b   : > { %v2560_v25 = vmul.f32 %v6560_v41, %v3981_v15  ;;  %v6561_v50 = vld [vmem:[#allocation76_spill] sm:$0xff]  ;;  %v2562_v9 = vmul.f32 %v6560_v41, %v6541_v26 }
 0x37c   : > { %v2019_v7 = vpop.permute.xlu1 %2018 }
 0x37d   : > { %v2024_v56 = vsel %vm1067_vm10, %v2019_v7, %v2021_v11  ;;  %v6559_v7 = vld [vmem:[#allocation79_spill] sm:$0xff] }
 0x37e   : > { %2501 = vrot.lane.b32.xlu1 %v2495_v36, %s6426_s13  ;;  %v2029_v16 = vadd.f32 %v2024_v56, %v2008_v39  ;;  %v2835_v61 = vmul.f32 %v6559_v7, %v4000_v23  ;;  %v2154_v36 = vmul.f32 %v6529_v58, %v3981_v15  ;;  %v6562_v58 = vld [vmem:[#allocation77_spill] sm:$0xff]  ;;  %v6563_v39 = vld [vmem:[#allocation83_spill] sm:$0xff] }
 0x380   : > { %v2023_v49 = vpop.permute.xlu1 %2022 }
 0x381   : > { %v2025_v40 = vsel %vm1067_vm10, %v2021_v11, %v2023_v49  ;;  %v2031_v28 = vadd.f32 %v2023_v49, %v2010_v3  ;;  %v2198_v49 = vmul.f32 %v6531_v35, %v3981_v15  ;;  %v6564_v3 = vld [vmem:[#allocation84_spill] sm:$0xff]  ;;  %v6566_v35 = vld [vmem:[#allocation81_spill] sm:$0xff] }
 0x382   : > { %v2030_v62 = vadd.f32 %v2025_v40, %v2009_v38  ;;  %2505 = vrot.lane.b32.xlu1 %v2497_v4, %s6426_s13  ;;  %v2858_v38 = vmul.f32 %v6563_v39, %v6538_v30  ;;  %v2583_v4 = vmul.f32 %v6564_v3, %v4163_v6 }
 0x383   : > { %v2049_v53 = vrot.slane %v2031_v28, %v5012_v57 }
 0x384   : > { %v2035_v20 = vcombine.low %v2029_v16, %v2030_v62  ;;  %v5354_v46 = vpop.permute.xlu1 %2095  ;;  %v6565_v16 = vld [vmem:[#allocation78_spill] sm:$0xff]  ;;  %v2585_v62 = vmul.f32 %v6564_v3, %v4098_v48  ;;  %v6579_v3 = vld [vmem:[#allocation109_spill] sm:$0xff] }
 0x386   : > { %v2042_v54 = vrot.slane %v2035_v20, %v5012_v57  ;;  %2798 = vrot.lane.b32.xlu1 %v2791_v42, %s6369_s27  ;;  %v6567_v20 = vld [vmem:[#allocation87_spill] sm:$0xff] }
 0x387   : > { %v2879_v42 = vmul.f32 %v6567_v20, %v4000_v23 }
 0x388   : > { %v2050_v59 = vcombine.low %v2042_v54, %v2049_v53  ;;  %v5361_v63 = vpop.permute.xlu1 %2099  ;;  %v2242_v54 = vmul.f32 %v6534_v31, %v3981_v15  ;;  %v6568_v53 = vld [vmem:[#allocation88_spill] sm:$0xff]  ;;  %v6570_v31 = vld [vmem:[#allocation85_spill] sm:$0xff] }
 0x38a   : > { %2522 = vrot.lane.b32.xlu1 %v2516_v44, %s6426_s13  ;;  %v2057_v22 = vrot.slane %v2050_v59, %v5012_v57  ;;  %v2604_v59 = vmul.f32 %v6568_v53, %v3981_v15  ;;  %v6569_v44 = vld [vmem:[#allocation82_spill] sm:$0xff] }
 0x38c   : > { %2058 = vrot.lane.b32.xlu0 %v2057_v22, %s3689_s22  ;;  %v5373_v13 = vpop.permute.xlu1 %2118  ;;  %v2606_v22 = vmul.f32 %v6568_v53, %v6541_v26  ;;  %v6582_v53 = vld [vmem:[#allocation21_spill] sm:$0xff] }
 0x38e   : > { %2526 = vrot.lane.b32.xlu1 %v2518_v2, %s6426_s13 }
 0x390   : > { %2097 = vrot.lane.b32.xlu0 %v6554_v14, %s6374_s21  ;;  %v5381_v51 = vpop.permute.xlu1 %2139  ;;  %v6571_v14 = vld [vmem:[#allocation93_spill] sm:$0xff] }
 0x392   : > { %2821 = vrot.lane.b32.xlu1 %v2814_v60, %s6426_s13  ;;  %v2902_v60 = vmul.f32 %v6571_v14, %v6538_v30 }
 0x394   : > { %2116 = vrot.lane.b32.xlu0 %v2110_v10, %s6374_s21  ;;  %v5393_v11 = vpop.permute.xlu1 %2143  ;;  %v2286_v10 = vmul.f32 %v6536_v32, %v3981_v15  ;;  %v6574_v32 = vld [vmem:[#allocation89_spill] sm:$0xff] }
 0x396   : > { %2545 = vrot.lane.b32.xlu1 %v2539_v45, %s6387_s24  ;;  %v2330_v45 = vmul.f32 %v6572_v27, %v3981_v15 }
 0x398   : > { %2120 = vrot.lane.b32.xlu0 %v6557_v33, %s6374_s21  ;;  %v5401_v56 = vpop.permute.xlu1 %2162 }
 0x39a   : > { %2549 = vrot.lane.b32.xlu1 %v2541_v34, %s6387_s24  ;;  %v6573_v34 = vld [vmem:[#allocation86_spill] sm:$0xff] }
 0x39c   : > { %2141 = vrot.lane.b32.xlu0 %v6558_v37, %s6369_s27  ;;  %v5413_v40 = vpop.permute.xlu1 %2183  ;;  %v2332_v37 = vmul.f32 %v6572_v27, %v6541_v26  ;;  %v6590_v27 = vld [vmem:[#allocation95_spill] sm:$0xff] }
 0x39e   : > { %2842 = vrot.lane.b32.xlu1 %v2835_v61, %s6426_s13 }
 0x3a0   : > { %2160 = vrot.lane.b32.xlu0 %v2154_v36, %s6369_s27  ;;  %v5421_v28 = vpop.permute.xlu1 %2187  ;;  %v6575_v36 = vld [vmem:[#allocation98_spill] sm:$0xff] }
 0x3a1   : > { %v2628_v41 = vmul.f32 %v6575_v36, %v6538_v30 }
 0x3a2   : > { %2566 = vrot.lane.b32.xlu1 %v2560_v25, %s6387_s24  ;;  %v2407_v25 = vmul.f32 %v6539_v55, %v4163_v6  ;;  %v6578_v55 = vld [vmem:[#allocation91_spill] sm:$0xff] }
 0x3a4   : > { %2164 = vrot.lane.b32.xlu0 %v6561_v50, %s6369_s27  ;;  %v5433_v1 = vpop.permute.xlu1 %2206  ;;  %v6576_v50 = vld [vmem:[#allocation105_spill] sm:$0xff] }
 0x3a5   : > { %v2924_v30 = vmul.f32 %v6576_v50, %v6541_v26 }
 0x3a6   : > { %2570 = vrot.lane.b32.xlu1 %v2562_v9, %s6387_s24  ;;  %v2922_v9 = vmul.f32 %v6576_v50, %v3981_v15  ;;  %v6596_v50 = vld [vmem:[#allocation100_spill] sm:$0xff] }
 0x3a8   : > { %2185 = vrot.lane.b32.xlu0 %v6562_v58, %s6426_s13  ;;  %v5441_v2 = vpop.permute.xlu1 %2227 }
 0x3aa   : > { %2865 = vrot.lane.b32.xlu1 %v2858_v38, %s6387_s24  ;;  %v6577_v38 = vld [vmem:[#allocation90_spill] sm:$0xff] }
 0x3ac   : > { %2204 = vrot.lane.b32.xlu0 %v2198_v49, %s6426_s13  ;;  %v5453_v33 = vpop.permute.xlu1 %2231 }
 0x3ae   : > { %2589 = vrot.lane.b32.xlu1 %v2583_v4, %s6400_s26  ;;  %v2649_v4 = vmul.f32 %v6579_v3, %v4000_v23 }
 0x3b0   : > { %2208 = vrot.lane.b32.xlu0 %v6565_v16, %s6426_s13  ;;  %v5461_v61 = vpop.permute.xlu1 %2250  ;;  %v2725_v16 = vmul.f32 %v6542_v47, %v4163_v6  ;;  %v5503_v47 = vadd.f32 %v5120_v21, %v6582_v53  ;;  %v6588_v21 = vld [vmem:[#allocation25_spill] sm:$0xff] }
 0x3b2   : > { %2593 = vrot.lane.b32.xlu1 %v2585_v62, %s6400_s26  ;;  %v6580_v62 = vld [vmem:[#allocation119_spill] sm:$0xff]  ;;  %6583 = vst [vmem:[#allocation36_spill] sm:$0xff] %v5503_v47 }
 0x3b3   : > { %v2945_v26 = vmul.f32 %v6580_v62, %v4163_v6 }
 0x3b4   : > { %2229 = vrot.lane.b32.xlu0 %v6566_v35, %s6387_s24  ;;  %v5473_v58 = vpop.permute.xlu1 %2271 }
 0x3b6   : > { %2886 = vrot.lane.b32.xlu1 %v2879_v42, %s6387_s24  ;;  %v6581_v42 = vld [vmem:[#allocation92_spill] sm:$0xff] }
 0x3b8   : > { %2248 = vrot.lane.b32.xlu0 %v2242_v54, %s6387_s24  ;;  %v5481_v49 = vpop.permute.xlu1 %2275  ;;  %v2947_v54 = vmul.f32 %v6580_v62, %v4098_v48 }
 0x3ba   : > { %2610 = vrot.lane.b32.xlu1 %v2604_v59, %s6400_s26 }
 0x3bc   : > { %2252 = vrot.lane.b32.xlu0 %v6569_v44, %s6387_s24  ;;  %v5493_v35 = vpop.permute.xlu1 %2294  ;;  %v6584_v44 = vld [vmem:[#allocation94_spill] sm:$0xff] }
 0x3be   : > { %2614 = vrot.lane.b32.xlu1 %v2606_v22, %s6400_s26  ;;  %v2746_v22 = vmul.f32 %v6548_v19, %v3981_v15  ;;  %v6591_v19 = vld [vmem:[#allocation27_spill] sm:$0xff] }
 0x3c0   : > { %2273 = vrot.lane.b32.xlu0 %v6570_v31, %s6400_s26  ;;  %v5505_v59 = vpop.permute.xlu1 %2315  ;;  %v6585_v31 = vld [vmem:[#allocation23_spill] sm:$0xff] }
 0x3c1   : > { %v5515_v48 = vadd.f32 %v5126_v18, %v6585_v31  ;;  %v5532_v18 = vadd.f32 %v5135_v17, %v6591_v19  ;;  %v6595_v17 = vld [vmem:[#allocation99_spill] sm:$0xff] }
 0x3c2   : > { %2909 = vrot.lane.b32.xlu1 %v2902_v60, %s6400_s26  ;;  %v6602_v19 = vld [vmem:[#allocation107_spill] sm:$0xff] }
 0x3c3   : > { %6586 = vst [vmem:[#allocation37_spill] sm:$0xff] %v5515_v48  ;;  %6592 = vst [vmem:[#allocation40_spill] sm:$0xff] %v5532_v18 }
 0x3c4   : > { %2292 = vrot.lane.b32.xlu0 %v2286_v10, %s6400_s26  ;;  %v5518_v60 = vpop.permute.xlu1 %2319  ;;  %v5524_v10 = vadd.f32 %v5131_v0, %v6588_v21  ;;  %v2769_v0 = vmul.f32 %v6550_v52, %v4163_v6  ;;  %v2790_v52 = vmul.f32 %v6552_v24, %v3981_v15  ;;  %v2813_v24 = vmul.f32 %v6555_v43, %v4163_v6 }
 0x3c5   : > { %6587 = vst [vmem:[#allocation38_spill] sm:$0xff] %v5518_v60  ;;  %v2834_v43 = vmul.f32 %v6559_v7, %v3981_v15 }
 0x3c6   : > { %2336 = vrot.lane.b32.xlu1 %v2330_v45, %s3685_s14  ;;  %6589 = vst [vmem:[#allocation39_spill] sm:$0xff] %v5524_v10 }
 0x3c8   : > { %2296 = vrot.lane.b32.xlu0 %v6573_v34, %s6400_s26  ;;  %v5534_v45 = vpop.permute.xlu1 %2415  ;;  %v6593_v34 = vld [vmem:[#allocation96_spill] sm:$0xff] }
 0x3ca   : > { %2340 = vrot.lane.b32.xlu1 %v2332_v37, %s3685_s14  ;;  %v6594_v37 = vld [vmem:[#allocation120_spill] sm:$0xff] }
 0x3cc   : > { %2317 = vrot.lane.b32.xlu0 %v6574_v32, %s3685_s14  ;;  %v2967_v32 = vmul.f32 %v6594_v37, %v4000_v23 }
 0x3ce   : > { %2635 = vrot.lane.b32.xlu1 %v2628_v41, %s3685_s14  ;;  %v5545_v41 = vpop.permute.xlu1 %2434 }
 0x3d0   : > { %2413 = vrot.lane.b32.xlu0 %v2407_v25, %s6374_s21 }
 0x3d2   : > { %2928 = vrot.lane.b32.xlu1 %v2922_v9, %s6400_s26  ;;  %v5550_v25 = vpop.permute.xlu1 %2438 }
 0x3d4   : > { %2417 = vrot.lane.b32.xlu0 %v6577_v38, %s6374_s21 }
 0x3d6   : > { %2932 = vrot.lane.b32.xlu1 %v2924_v30, %s6400_s26  ;;  %v5559_v23 = vpop.permute.xlu1 %2733  ;;  %v6598_v30 = vld [vmem:[#allocation101_spill] sm:$0xff] }
 0x3d8   : > { %2436 = vrot.lane.b32.xlu0 %v6578_v55, %s6374_s21 }
 0x3da   : > { %2656 = vrot.lane.b32.xlu1 %v2649_v4, %s3685_s14  ;;  %v5567_v4 = vpop.permute.xlu1 %2457 }
 0x3dc   : > { %2731 = vrot.lane.b32.xlu0 %v2725_v16, %s6374_s21  ;;  %v6599_v16 = vld [vmem:[#allocation102_spill] sm:$0xff] }
 0x3de   : > { %2951 = vrot.lane.b32.xlu1 %v2945_v26, %s3685_s14  ;;  %v5574_v26 = vpop.permute.xlu1 %2461 }
 0x3e0   : > { %2735 = vrot.lane.b32.xlu0 %v6581_v42, %s6374_s21 }
 0x3e2   : > { %2955 = vrot.lane.b32.xlu1 %v2947_v54, %s3685_s14  ;;  %v6600_v54 = vld [vmem:[#allocation103_spill] sm:$0xff] }
 0x3e4   : > { %2459 = vrot.lane.b32.xlu0 %v6584_v44, %s6369_s27  ;;  %v5582_v44 = vpop.permute.xlu1 %2754 }
 0x3e6   : > { %674 = vrot.lane.b32.xlu1 %v5503_v47, %s3687_s4 }
 0x3e8   : > { %2752 = vrot.lane.b32.xlu0 %v2746_v22, %s6374_s21  ;;  %v6601_v22 = vld [vmem:[#allocation104_spill] sm:$0xff]  ;;  %v5589_v21 = vpop.permute.xlu1 %2478 }
 0x3ea   : > { %678 = vrot.lane.b32.xlu1 %v5515_v48, %s3687_s4  ;;  %v6616_v48 = vld [vmem:[#allocation122_spill] sm:$0xff] }
 0x3ec   : > { %2756 = vrot.lane.b32.xlu0 %v6590_v27, %s6374_s21  ;;  %s3692_s21 = smov 122  }
 0x3ee   : > { %682 = vrot.lane.b32.xlu1 %v5524_v10, %s3687_s4 }
 0x3f0   : > { %2480 = vrot.lane.b32.xlu0 %v6593_v34, %s6369_s27 }
 0x3f2   : > { %686 = vrot.lane.b32.xlu1 %v5532_v18, %s3687_s4 }
 0x3f4   : > { %2775 = vrot.lane.b32.xlu0 %v2769_v0, %s6369_s27  ;;  %v5597_v0 = vpop.permute.xlu1 %2482 }
 0x3f6   : > { %2974 = vrot.lane.b32.xlu1 %v2967_v32, %s3685_s14  ;;  %v6603_v32 = vld [vmem:[#allocation108_spill] sm:$0xff] }
 0x3f8   : > { %2779 = vrot.lane.b32.xlu0 %v6595_v17, %s6369_s27  ;;  %v6604_v17 = vld [vmem:[#allocation73_spill] sm:$0xff] }
 0x3fc   : > { %2503 = vrot.lane.b32.xlu0 %v6596_v50, %s6426_s13  ;;  %v2108_v50 = vadd.f32 %v5361_v63, %v6604_v17 }
 0x3fe   : > { %v5554_v9 = vpop.permute.xlu0 %2058 }
 0x3ff   : > { %6597 = vst [vmem:[#allocation41_spill] sm:$0xff] %v5554_v9 }
 0x400   : > { %2796 = vrot.lane.b32.xlu0 %v2790_v52, %s6369_s27  ;;  %v2857_v52 = vmul.f32 %v6563_v39, %v4163_v6 }
 0x402   : > { %v5561_v38 = vpop.permute.xlu0 %2097 }
 0x404   : > { %2800 = vrot.lane.b32.xlu0 %v6598_v30, %s6369_s27  ;;  %s3691_s27 = smov 123  }
 0x406   : > { %v5565_v55 = vpop.permute.xlu0 %2116 }
 0x408   : > { %2524 = vrot.lane.b32.xlu0 %v6599_v16, %s6426_s13  ;;  %v5606_v16 = vpop.permute.xlu1 %2777 }
 0x40a   : > { %v2121_v62 = vpop.permute.xlu0 %2120 }
 0x40b   : > { %v2129_v30 = vadd.f32 %v2121_v62, %v2108_v50 }
 0x40c   : > { %2819 = vrot.lane.b32.xlu0 %v2813_v24, %s6426_s13  ;;  %v5624_v9 = vpop.permute.xlu1 %2501 }
 0x40e   : > { %v5576_v42 = vpop.permute.xlu0 %2141 }
 0x410   : > { %2823 = vrot.lane.b32.xlu0 %v6600_v54, %s6426_s13  ;;  %v2102_v54 = vsel %vm863_vm6, %v5561_v38, %v5361_v63 }
 0x412   : > { %v5580_v53 = vpop.permute.xlu0 %2160 }
 0x414   : > { %2547 = vrot.lane.b32.xlu0 %v6601_v22, %s6387_s24  ;;  %v2152_v22 = vadd.f32 %v5393_v11, %v2129_v30  ;;  %v6607_v30 = vld [vmem:[#allocation111_spill] sm:$0xff] }
 0x416   : > { %v2165_v31 = vpop.permute.xlu0 %2164 }
 0x417   : > { %v2173_v39 = vadd.f32 %v2165_v31, %v2152_v22 }
 0x418   : > { %2840 = vrot.lane.b32.xlu0 %v2834_v43, %s6426_s13  ;;  %v6605_v43 = vld [vmem:[#allocation110_spill] sm:$0xff] }
 0x41a   : > { %v5591_v27 = vpop.permute.xlu0 %2185 }
 0x41c   : > { %2844 = vrot.lane.b32.xlu0 %v6602_v19, %s6426_s13  ;;  %v2123_v19 = vsel %vm863_vm6, %v5373_v13, %v2121_v62  ;;  %v2196_v62 = vadd.f32 %v5421_v28, %v2173_v39  ;;  %s3357_s13 = sshll.u32 %s3757_s28, 11 }
 0x41d   : > { %s6125_s18 = scalar_lea.hbm %s6698_s30, %s3357_s13 }
 0x41e   : > { %v5595_v34 = vpop.permute.xlu0 %2204 }
 0x420   : > { %2568 = vrot.lane.b32.xlu0 %v6603_v32, %s6387_s24  ;;  %v6606_v32 = vld [vmem:[#allocation106_spill] sm:$0xff] }
 0x421   : > { %v2107_v17 = vadd.f32 %v2102_v54, %v6606_v32  ;;  %v2878_v54 = vmul.f32 %v6567_v20, %v3981_v15 }
 0x422   : > { %v2209_v7 = vpop.permute.xlu0 %2208 }
 0x423   : > { %v2128_v63 = vadd.f32 %v2123_v19, %v2107_v17  ;;  %v2217_v32 = vadd.f32 %v2209_v7, %v2196_v62  ;;  %v2211_v19 = vsel %vm945_vm8, %v5433_v1, %v2209_v7  ;;  %v5639_v17 = vpop.permute.xlu1 %2505 }
 0x424   : > { %2863 = vrot.lane.b32.xlu0 %v2857_v52, %s6387_s24  ;;  %v2146_v52 = vsel %vm904_vm7, %v5576_v42, %v5393_v11  ;;  %v2190_v11 = vsel %vm945_vm8, %v5591_v27, %v5421_v28  ;;  %v6608_v28 = vld [vmem:[#allocation113_spill] sm:$0xff] }
 0x425   : > { %v2151_v22 = vadd.f32 %v2146_v52, %v2128_v63  ;;  %v2240_v52 = vadd.f32 %v5453_v33, %v2217_v32 }
 0x426   : > { %v5608_v24 = vpop.permute.xlu0 %2229 }
 0x427   : > { %v2234_v20 = vsel %vm399_vm2, %v5608_v24, %v5453_v33  ;;  %v6609_v33 = vld [vmem:[#allocation114_spill] sm:$0xff] }
 0x428   : > { %2867 = vrot.lane.b32.xlu0 %v6605_v43, %s6387_s24  ;;  %v2167_v43 = vsel %vm904_vm7, %v5401_v56, %v2165_v31 }
 0x429   : > { %v2172_v10 = vadd.f32 %v2167_v43, %v2151_v22  ;;  %v5656_v22 = vpop.permute.xlu1 %2798 }
 0x42a   : > { %v5619_v50 = vpop.permute.xlu0 %2248 }
 0x42b   : > { %v2195_v31 = vadd.f32 %v2190_v11, %v2172_v10 }
 0x42c   : > { %2591 = vrot.lane.b32.xlu0 %v6607_v30, %s6400_s26 }
 0x42d   : > { %v2216_v63 = vadd.f32 %v2211_v19, %v2195_v31 }
 0x42e   : > { %v2253_v18 = vpop.permute.xlu0 %2252 }
 0x42f   : > { %v2255_v30 = vsel %vm399_vm2, %v5461_v61, %v2253_v18  ;;  %v2261_v43 = vadd.f32 %v2253_v18, %v2240_v52  ;;  %v2239_v7 = vadd.f32 %v2234_v20, %v2216_v63  ;;  %v2901_v18 = vmul.f32 %v6571_v14, %v4163_v6  ;;  %v5668_v63 = vpop.permute.xlu1 %2522  ;;  %v6611_v14 = vld [vmem:[#allocation115_spill] sm:$0xff] }
 0x430   : > { %2884 = vrot.lane.b32.xlu0 %v2878_v54, %s6387_s24 }
 0x431   : > { %v2260_v54 = vadd.f32 %v2255_v30, %v2239_v7  ;;  %v2284_v11 = vadd.f32 %v5481_v49, %v2261_v43 }
 0x432   : > { %v5641_v39 = vpop.permute.xlu0 %2273 }
 0x433   : > { %v2278_v10 = vsel %vm1026_vm9, %v5641_v39, %v5481_v49  ;;  %v5679_v7 = vpop.permute.xlu1 %2526 }
 0x434   : > { %2888 = vrot.lane.b32.xlu0 %v6608_v28, %s6387_s24  ;;  %v2283_v32 = vadd.f32 %v2278_v10, %v2260_v54  ;;  %v6612_v10 = vld [vmem:[#allocation112_spill] sm:$0xff]  ;;  %s3690_s24 = smov 124  }
 0x435   : > { %v2391_v54 = vmul.f32 %v6612_v10, %v4163_v6 }
 0x436   : > { %v5651_v62 = vpop.permute.xlu0 %2292 }
 0x438   : > { %2612 = vrot.lane.b32.xlu0 %v6609_v33, %s6400_s26  ;;  %v6613_v33 = vld [vmem:[#allocation116_spill] sm:$0xff] }
 0x43a   : > { %v2297_v19 = vpop.permute.xlu0 %2296 }
 0x43b   : > { %v2299_v31 = vsel %vm1026_vm9, %v5493_v35, %v2297_v19  ;;  %v5665_v20 = vadd.f32 %v2297_v19, %v2284_v11  ;;  %v2398_v11 = vmul.f32 %v6613_v33, %v3981_v15  ;;  %v5698_v33 = vpop.permute.xlu1 %2821 }
 0x43c   : > { %v2304_v52 = vadd.f32 %v2299_v31, %v2283_v32  ;;  %2907 = vrot.lane.b32.xlu0 %v2901_v18, %s6400_s26  ;;  %v6614_v32 = vld [vmem:[#allocation117_spill] sm:$0xff]  ;;  %v2627_v18 = vmul.f32 %v6575_v36, %v4163_v6 }
 0x43d   : > { %v2401_v10 = vadd.f32 %v2398_v11, %v2391_v54 }
 0x43e   : > { %v5670_v28 = vpop.permute.xlu0 %2317 }
 0x43f   : > { %v2322_v49 = vsel %vm1067_vm10, %v5670_v28, %v5518_v60  ;;  %v5706_v11 = vpop.permute.xlu1 %2545 }
 0x440   : > { %v5675_v30 = vadd.f32 %v2322_v49, %v2304_v52  ;;  %2911 = vrot.lane.b32.xlu0 %v6611_v14, %s6400_s26  ;;  %v6615_v49 = vld [vmem:[#allocation123_spill] sm:$0xff]  ;;  %6618 = vst [vmem:[#allocation44_spill] sm:$0xff] %v5706_v11 }
 0x442   : > { %6610 = vst [vmem:[#allocation43_spill] sm:$0xff] %v5675_v30  ;;  %v2414_v43 = vpop.permute.xlu0 %2413 }
 0x443   : > { %v2419_v31 = vsel %vm863_vm6, %v2414_v43, %v5534_v45 }
 0x444   : > { %2338 = vrot.lane.b32.xlu0 %v6614_v32, %s3685_s14  ;;  %v2424_v32 = vadd.f32 %v2419_v31, %v2401_v10  ;;  %v2648_v31 = vmul.f32 %v6579_v3, %v3981_v15  ;;  %v6622_v10 = vld [vmem:[#allocation124_spill] sm:$0xff] }
 0x446   : > { %v2418_v19 = vpop.permute.xlu0 %2417 }
 0x447   : > { %v2420_v52 = vsel %vm863_vm6, %v5534_v45, %v2418_v19  ;;  %v5694_v14 = vadd.f32 %v2418_v19, %v6615_v49  ;;  %v6617_v19 = vld [vmem:[#allocation121_spill] sm:$0xff] }
 0x448   : > { %v2425_v47 = vadd.f32 %v2420_v52, %v6616_v48  ;;  %2633 = vrot.lane.b32.xlu0 %v2627_v18, %s3685_s14  ;;  %v6619_v48 = vld [vmem:[#allocation125_spill] sm:$0xff] }
 0x449   : > { %v6620_v52 = vld [vmem:[#allocation129_spill] sm:$0xff] }
 0x44a   : > { %v2437_v57 = vpop.permute.xlu0 %2436 }
 0x44b   : > { %v2440_v36 = vsel %vm863_vm6, %v5545_v41, %v2437_v57  ;;  %v2441_v43 = vsel %vm863_vm6, %v2437_v57, %v5550_v25 }
 0x44c   : > { %v2445_v30 = vadd.f32 %v2440_v36, %v2424_v32  ;;  %v2446_v45 = vadd.f32 %v2441_v43, %v2425_v47  ;;  %2637 = vrot.lane.b32.xlu0 %v6617_v19, %s3685_s14  ;;  %v6621_v47 = vld [vmem:[#allocation118_spill] sm:$0xff]  ;;  %v2716_v32 = vmul.f32 %v6622_v10, %v3981_v15  ;;  %v6623_v36 = vld [vmem:[#allocation127_spill] sm:$0xff]  ;;  %v5721_v19 = vpop.permute.xlu1 %2549 }
 0x44d   : > { %v2709_v49 = vmul.f32 %v6621_v47, %v4163_v6  ;;  %6624 = vst [vmem:[#allocation45_spill] sm:$0xff] %v5721_v19  ;;  %v6625_v10 = vld [vmem:[#allocation126_spill] sm:$0xff] }
 0x44e   : > { %v2732_v54 = vpop.permute.xlu0 %2731 }
 0x44f   : > { %v2737_v3 = vsel %vm863_vm6, %v2732_v54, %v5559_v23  ;;  %v6626_v54 = vld [vmem:[#allocation128_spill] sm:$0xff] }
 0x450   : > { %2930 = vrot.lane.b32.xlu0 %v6619_v48, %s6400_s26  ;;  %v5733_v19 = vpop.permute.xlu1 %2842  ;;  %s6696_s26 = sld [smem:[#allocation19_spill]] }
 0x452   : > { %v2736_v18 = vpop.permute.xlu0 %2735 }
 0x453   : > { %v2738_v41 = vsel %vm863_vm6, %v5559_v23, %v2736_v18  ;;  %v2744_v57 = vadd.f32 %v2736_v18, %v6620_v52  ;;  %v2719_v52 = vadd.f32 %v2716_v32, %v2709_v49  ;;  %v2966_v49 = vmul.f32 %v6594_v37, %v3981_v15  ;;  %v6627_v32 = vld [vmem:[#allocation20_spill] sm:$0xff] }
 0x454   : > { %v2743_v43 = vadd.f32 %v2738_v41, %v6623_v36  ;;  %2654 = vrot.lane.b32.xlu0 %v2648_v31, %s3685_s14 }
 0x455   : > { %v2742_v41 = vadd.f32 %v2737_v3, %v2719_v52  ;;  %v5746_v3 = vpop.permute.xlu1 %2566 }
 0x456   : > { %v2460_v48 = vpop.permute.xlu0 %2459  ;;  %s3126_s7 = scalar_lea.sflag [#allocation4], %s6696_s26 }
 0x457   : > { %v2463_v11 = vsel %vm904_vm7, %v5567_v4, %v2460_v48  ;;  %v2464_v18 = vsel %vm904_vm7, %v2460_v48, %v5574_v26  ;;  %v5744_v48 = vadd.f32 %v5122_v29, %v6627_v32 }
 0x458   : > { %v2468_v47 = vadd.f32 %v2463_v11, %v2445_v30  ;;  %v2469_v60 = vadd.f32 %v2464_v18, %v2446_v45  ;;  %2658 = vrot.lane.b32.xlu0 %v6625_v10, %s3685_s14 }
 0x45a   : > { %v2753_v31 = vpop.permute.xlu0 %2752 }
 0x45b   : > { %v2758_v36 = vsel %vm863_vm6, %v2753_v31, %v5582_v44  ;;  %v5760_v31 = vpop.permute.xlu1 %2570 }
 0x45c   : > { %v2763_v23 = vadd.f32 %v2758_v36, %v2742_v41  ;;  %2953 = vrot.lane.b32.xlu0 %v6626_v54, %s3685_s14 }
 0x45e   : > { %v2757_v4 = vpop.permute.xlu0 %2756 }
 0x45f   : > { %v2759_v30 = vsel %vm863_vm6, %v5582_v44, %v2757_v4  ;;  %v2765_v45 = vadd.f32 %v2757_v4, %v2744_v57  ;;  %v6628_v44 = vld [vmem:[#allocation22_spill] sm:$0xff] }
 0x460   : > { %v2764_v11 = vadd.f32 %v2759_v30, %v2743_v43  ;;  %2972 = vrot.lane.b32.xlu0 %v2966_v49, %s3685_s14  ;;  %v5756_v57 = vadd.f32 %v5128_v5, %v6628_v44  ;;  %v6630_v49 = vld [vmem:[#allocation26_spill] sm:$0xff] }
 0x461   : > { %v5774_v30 = vadd.f32 %v5139_v8, %v6630_v49  ;;  %v6632_v44 = vld [vmem:[#allocation130_spill] sm:$0xff] }
 0x462   : > { %v2481_v18 = vpop.permute.xlu0 %2480 }
 0x463   : > { %v2484_v52 = vsel %vm904_vm7, %v5589_v21, %v2481_v18  ;;  %v2485_v37 = vsel %vm904_vm7, %v2481_v18, %v5597_v0  ;;  %v6629_v21 = vld [vmem:[#allocation24_spill] sm:$0xff]  ;;  %6631 = vst [vmem:[#allocation46_spill] sm:$0xff] %v5774_v30 }
 0x464   : > { %v2489_v10 = vadd.f32 %v2484_v52, %v2468_v47  ;;  %v2490_v41 = vadd.f32 %v2485_v37, %v2469_v60  ;;  %672 = vrot.lane.b32.xlu0 %v5744_v48, %s3687_s4  ;;  %v5766_v60 = vadd.f32 %v5133_v12, %v6629_v21 }
 0x466   : > { %v2776_v29 = vpop.permute.xlu0 %2775 }
 0x467   : > { %v2781_v43 = vsel %vm904_vm7, %v2776_v29, %v5606_v16 }
 0x468   : > { %v2786_v36 = vadd.f32 %v2781_v43, %v2763_v23  ;;  %676 = vrot.lane.b32.xlu0 %v5756_v57, %s3687_s4  ;;  %v2866_v23 = vpop.permute.xlu1 %2865 }
 0x46a   : > { %v2780_v47 = vpop.permute.xlu0 %2779 }
 0x46b   : > { %v2782_v54 = vsel %vm904_vm7, %v5606_v16, %v2780_v47  ;;  %v2788_v5 = vadd.f32 %v2780_v47, %v2765_v45 }
 0x46c   : > { %v2787_v4 = vadd.f32 %v2782_v54, %v2764_v11  ;;  %680 = vrot.lane.b32.xlu0 %v5766_v60, %s3687_s4  ;;  %v5784_v11 = vpop.permute.xlu1 %2589 }
 0x46e   : > { %v2504_v32 = vpop.permute.xlu0 %2503 }
 0x46f   : > { %v2507_v18 = vsel %vm945_vm8, %v5624_v9, %v2504_v32  ;;  %v2508_v12 = vsel %vm945_vm8, %v2504_v32, %v5639_v17 }
 0x470   : > { %v2512_v52 = vadd.f32 %v2507_v18, %v2489_v10  ;;  %v2513_v37 = vadd.f32 %v2508_v12, %v2490_v41  ;;  %684 = vrot.lane.b32.xlu0 %v5774_v30, %s3687_s4  ;;  %v5790_v41 = vpop.permute.xlu1 %2593 }
 0x472   : > { %v2797_v16 = vpop.permute.xlu0 %2796 }
 0x473   : > { %v2802_v45 = vsel %vm904_vm7, %v2797_v16, %v5656_v22 }
 0x474   : > { %v2807_v8 = vadd.f32 %v2802_v45, %v2786_v36  ;;  %2976 = vrot.lane.b32.xlu0 %v6632_v44, %s3685_s14  ;;  %s6697_s14 = sshll.u32 %s6696_s26, 7 }
 0x475   : > { %s6115_s9 = scalar_lea.vmem [#allocation7], %s6697_s14 }
 0x476   : > { %v2801_v29 = vpop.permute.xlu0 %2800  ;;  %s3139_s5 = sshll.u32 %s6115_s9, 4  ;;  %s6127_s5 = int_to_ptr.vmem [resolvable:$true] %s3139_s5 }
 0x477   : > { %v2803_v9 = vsel %vm904_vm7, %v5656_v22, %v2801_v29  ;;  %v2809_v43 = vadd.f32 %v2801_v29, %v2788_v5  ;;  %v5802_v22 = vpop.permute.xlu1 %2886  ;;  %s3599_s29 = scalar_lea.vmem %s6127_s5, 2048  ;;  %p3606_p10 = scmp.lt.s32.totalorder %s6127_s5, %s3604_s15 }
 0x478   : > { %v2808_v10 = vadd.f32 %v2803_v9, %v2787_v4  ;;  %p3600_p5 = scmp.ne.s32.totalorder %s6127_s5, %s3599_s29  ;;  %p3607_p1 = scmp.lt.s32.totalorder %s3605_s11, %s3599_s29 }
 0x47a   : > { %v2525_v21 = vpop.permute.xlu0 %2524  ;;  %p3601_p8 = pnand %p3600_p5, %p6700_p12  ;;  %p3608_p4 = por %p3607_p1, %p3606_p10 }
 0x47b   : > { %v2528_v47 = vsel %vm945_vm8, %v5668_v63, %v2525_v21  ;;  %v2529_v54 = vsel %vm945_vm8, %v2525_v21, %v5679_v7  ;;  %v5806_v45 = vpop.permute.xlu1 %2610 }
 0x47c   : > { %v5796_v49 = vadd.f32 %v2528_v47, %v2512_v52  ;;  %v5798_v36 = vadd.f32 %v2529_v54, %v2513_v37  ;;  %p3602_p9 = pneg %p3601_p8 }
 0x47e   : > { %v2820_v32 = vpop.permute.xlu0 %2819  ;;  %p3609_p11 = pnand %p3608_p4, %p3602_p9 }
 0x47f   : > { %v2825_v18 = vsel %vm945_vm8, %v2820_v32, %v5698_v33  ;;  %v5812_v29 = vpop.permute.xlu1 %2614 }
 0x480   : > { %v2830_v5 = vadd.f32 %v2825_v18, %v2807_v8 }
 0x482   : > { %v2824_v4 = vpop.permute.xlu0 %2823 }
 0x483   : > { %v2826_v12 = vsel %vm945_vm8, %v5698_v33, %v2824_v4  ;;  %v2832_v16 = vadd.f32 %v2824_v4, %v2809_v43  ;;  %v5816_v33 = vpop.permute.xlu1 %2909 }
 0x484   : > { %v2831_v63 = vadd.f32 %v2826_v12, %v2808_v10 }
 0x486   : > { %v5808_v44 = vpop.permute.xlu0 %2547 }
 0x487   : > { %v2337_v18 = vpop.permute.xlu1 %2336 }
 0x48a   : > { %v2841_v52 = vpop.permute.xlu0 %2840 }
 0x48b   : > { %v2846_v37 = vsel %vm945_vm8, %v2841_v52, %v5733_v19 }
 0x48c   : > { %v2851_v9 = vadd.f32 %v2846_v37, %v2830_v5  ;;  %v6633_v37 = vld [vmem:[#allocation60_spill] sm:$0xff] }
 0x48e   : > { %v2845_v21 = vpop.permute.xlu0 %2844 }
 0x48f   : > { %v2847_v8 = vsel %vm945_vm8, %v5733_v19, %v2845_v21  ;;  %v2853_v47 = vadd.f32 %v2845_v21, %v2832_v16  ;;  %v2073_v19 = vmul.f32 %v6633_v37, %v4163_v6  ;;  %v6634_v16 = vld [vmem:[#allocation66_spill] sm:$0xff]  ;;  %v2166_v37 = vsel %vm904_vm7, %v5580_v53, %v5401_v56 }
 0x490   : > { %v2852_v54 = vadd.f32 %v2847_v8, %v2831_v63  ;;  %v2080_v63 = vmul.f32 %v6634_v16, %v3981_v15  ;;  %v2341_v8 = vpop.permute.xlu1 %2340  ;;  %v2233_v56 = vsel %vm399_vm2, %v5441_v2, %v5608_v24  ;;  %v2298_v2 = vsel %vm1026_vm9, %v5651_v62, %v5493_v35 }
 0x492   : > { %v5818_v43 = vpop.permute.xlu0 %2568 }
 0x496   : > { %v2864_v10 = vpop.permute.xlu0 %2863 }
 0x497   : > { %v2869_v32 = vsel %vm399_vm2, %v2864_v10, %v2866_v23  ;;  %v2083_v10 = vadd.f32 %v2080_v63, %v2073_v19  ;;  %v2447_v19 = vadd.f32 %v5550_v25, %v5694_v14 }
 0x498   : > { %v5821_v4 = vadd.f32 %v2869_v32, %v2851_v9  ;;  %v2101_v9 = vsel %vm863_vm6, %v5354_v46, %v5561_v38 }
 0x49a   : > { %v2868_v12 = vpop.permute.xlu0 %2867 }
 0x49b   : > { %v2870_v52 = vsel %vm399_vm2, %v2866_v23, %v2868_v12  ;;  %v5824_v5 = vadd.f32 %v2868_v12, %v2853_v47  ;;  %v2122_v23 = vsel %vm863_vm6, %v5565_v55, %v5373_v13  ;;  %v2106_v47 = vadd.f32 %v2101_v9, %v2083_v10 }
 0x49c   : > { %v5830_v21 = vadd.f32 %v2870_v52, %v2852_v54  ;;  %v2145_v54 = vsel %vm904_vm7, %v5381_v51, %v5576_v42  ;;  %v5845_v52 = vpop.permute.xlu1 %2635  ;;  %v2189_v13 = vsel %vm945_vm8, %v5413_v40, %v5591_v27  ;;  %v2210_v51 = vsel %vm945_vm8, %v5595_v34, %v5433_v1 }
 0x49d   : > { %v2127_v12 = vadd.f32 %v2122_v23, %v2106_v47  ;;  %v2470_v9 = vadd.f32 %v5574_v26, %v2447_v19  ;;  %v2254_v40 = vsel %vm399_vm2, %v5619_v50, %v5461_v61  ;;  %v2277_v1 = vsel %vm1026_vm9, %v5473_v58, %v5641_v39  ;;  %v6635_v23 = vld [vmem:[#allocation38_spill] sm:$0xff]  ;;  %v6637_v19 = vld [vmem:[#allocation168_spill] sm:$0xff] }
 0x49e   : > { %v5832_v30 = vpop.permute.xlu0 %2591  ;;  %v2321_v61 = vsel %vm1067_vm10, %v5505_v59, %v5670_v28  ;;  %v2328_v58 = vadd.f32 %v6635_v23, %v5665_v20 }
 0x49f   : > { %v2150_v46 = vadd.f32 %v2145_v54, %v2127_v12  ;;  %v2491_v14 = vadd.f32 %v5597_v0, %v2470_v9  ;;  %v6639_v9 = vld [vmem:[#allocation44_spill] sm:$0xff] }
 0x4a0   : > { %v5860_v16 = vpop.permute.xlu1 %2928  ;;  %v2349_v62 = vadd.f32 %v2341_v8, %v2328_v58 }
 0x4a1   : > { %v2171_v55 = vadd.f32 %v2166_v37, %v2150_v46  ;;  %v2514_v39 = vadd.f32 %v5639_v17, %v2491_v14  ;;  %v6636_v46 = vld [vmem:[#allocation43_spill] sm:$0xff] }
 0x4a2   : > { %v5840_v32 = vpop.permute.xlu0 %2884 }
 0x4a3   : > { %v2194_v42 = vadd.f32 %v2189_v13, %v2171_v55  ;;  %v2535_v55 = vadd.f32 %v5679_v7, %v2514_v39 }
 0x4a4   : > { %v5875_v10 = vpop.permute.xlu1 %2932 }
 0x4a5   : > { %v2215_v53 = vadd.f32 %v2210_v51, %v2194_v42  ;;  %v2367_v51 = vrot.slane %v2349_v62, %v6637_v19  ;;  %v6638_v42 = vld [vmem:[#allocation45_spill] sm:$0xff] }
 0x4a6   : > { %v5850_v38 = vpop.permute.xlu0 %2888  ;;  %v2552_v7 = vsel %vm399_vm2, %v5808_v44, %v6638_v42 }
 0x4a7   : > { %v2238_v25 = vadd.f32 %v2233_v56, %v2215_v53  ;;  %v2558_v56 = vadd.f32 %v6638_v42, %v2535_v55 }
 0x4a8   : > { %v2657_v47 = vpop.permute.xlu1 %2656 }
 0x4a9   : > { %v2259_v34 = vadd.f32 %v2254_v40, %v2238_v25  ;;  %v2579_v40 = vadd.f32 %v5760_v31, %v2558_v56  ;;  %v6640_v56 = vld [vmem:[#allocation36_spill] sm:$0xff] }
 0x4aa   : > { %v2613_v63 = vpop.permute.xlu0 %2612 }
 0x4ab   : > { %v2282_v26 = vadd.f32 %v2277_v1, %v2259_v34  ;;  %v2572_v1 = vsel %vm399_vm2, %v5746_v3, %v5818_v43  ;;  %v2573_v34 = vsel %vm399_vm2, %v5818_v43, %v5760_v31  ;;  %v2596_v3 = vsel %vm1026_vm9, %v5832_v30, %v5790_v41 }
 0x4ac   : > { %v5893_v20 = vpop.permute.xlu1 %2951  ;;  %v2602_v43 = vadd.f32 %v5790_v41, %v2579_v40  ;;  %v6641_v40 = vld [vmem:[#allocation37_spill] sm:$0xff] }
 0x4ad   : > { %v2303_v50 = vadd.f32 %v2298_v2, %v2282_v26  ;;  %v2557_v26 = vadd.f32 %v2552_v7, %v5798_v36  ;;  %v2617_v36 = vsel %vm1026_vm9, %v2613_v63, %v5812_v29 }
 0x4ae   : > { %v5869_v27 = vpop.permute.xlu0 %2907  ;;  %v2623_v41 = vadd.f32 %v5812_v29, %v2602_v43  ;;  %v2897_v43 = vadd.f32 %v5850_v38, %v5824_v5 }
 0x4af   : > { %v2326_v0 = vadd.f32 %v2321_v61, %v2303_v50  ;;  %v2595_v61 = vsel %vm1026_vm9, %v5784_v11, %v5832_v30  ;;  %v2578_v31 = vadd.f32 %v2573_v34, %v2557_v26  ;;  %v6642_v26 = vld [vmem:[#allocation39_spill] sm:$0xff] }
 0x4b0   : > { %v5911_v14 = vpop.permute.xlu1 %2955 }
 0x4b1   : > { %v2601_v58 = vadd.f32 %v2596_v3, %v2578_v31 }
 0x4b2   : > { %v5880_v24 = vpop.permute.xlu0 %2911 }
 0x4b3   : > { %v2914_v5 = vsel %vm1026_vm9, %v5816_v33, %v5880_v24 }
 0x4b4   : > { %v675_v30 = vpop.permute.xlu1 %674 }
 0x4b5   : > { %v697_v29 = vadd.f32 %v675_v30, %v6640_v56 }
 0x4b6   : > { %v2339_v54 = vpop.permute.xlu0 %2338 }
 0x4b7   : > { %v2342_v12 = vsel %vm1067_vm10, %v2337_v18, %v2339_v54  ;;  %v2343_v35 = vsel %vm1067_vm10, %v2339_v54, %v2341_v8  ;;  %v2551_v8 = vsel %vm399_vm2, %v6639_v9, %v5808_v44  ;;  %v3246_v7 = vmul.f32 -1.442695, %v697_v29 }
 0x4b8   : > { %v2347_v37 = vadd.f32 %v2342_v12, %v2326_v0  ;;  %v2348_v13 = vadd.f32 %v2343_v35, %v6636_v46  ;;  %v2556_v2 = vadd.f32 %v2551_v8, %v5796_v49  ;;  %v2616_v49 = vsel %vm1026_vm9, %v5806_v45, %v2613_v63 }
 0x4b9   : > { %v2622_v12 = vadd.f32 %v2617_v36, %v2601_v58  ;;  %3502 = vpow2.f32 %v3246_v7 }
 0x4ba   : > { %v2353_v59 = vcombine.low %v2347_v37, %v2348_v13  ;;  %v2634_v28 = vpop.permute.xlu0 %2633  ;;  %v2577_v50 = vadd.f32 %v2572_v1, %v2556_v2 }
 0x4bb   : > { %v2639_v11 = vsel %vm1067_vm10, %v2634_v28, %v5845_v52  ;;  %v679_v28 = vpop.permute.xlu1 %678 }
 0x4bc   : > { %v2360_v17 = vrot.slane %v2353_v59, %v6637_v19  ;;  %v2600_v23 = vadd.f32 %v2595_v61, %v2577_v50 }
 0x4be   : > { %v2368_v53 = vcombine.low %v2360_v17, %v2367_v51  ;;  %v2638_v18 = vpop.permute.xlu0 %2637  ;;  %v2621_v54 = vadd.f32 %v2616_v49, %v2600_v23  ;;  %v6643_v49 = vld [vmem:[#allocation40_spill] sm:$0xff]  ;;  %v2890_v23 = vsel %vm399_vm2, %v5840_v32, %v5802_v22 }
 0x4bf   : > { %v2640_v0 = vsel %vm1067_vm10, %v5845_v52, %v2638_v18  ;;  %v2646_v37 = vadd.f32 %v2638_v18, %v2623_v41  ;;  %v683_v8 = vpop.permute.xlu1 %682  ;;  %v2895_v30 = vadd.f32 %v2890_v23, %v5821_v4 }
 0x4c0   : > { %v2375_v25 = vrot.slane %v2368_v53, %v6637_v19  ;;  %v2644_v45 = vadd.f32 %v2639_v11, %v2621_v54  ;;  %v2645_v62 = vadd.f32 %v2640_v0, %v2622_v12  ;;  %v701_v61 = vadd.f32 %v683_v8, %v6642_v26 }
 0x4c1   : > { %v2920_v11 = vadd.f32 %v5880_v24, %v2897_v43 }
 0x4c2   : > { %2376 = vrot.lane.b32.xlu1 %v2375_v25, %s3690_s24  ;;  %v5915_v44 = vpop.permute.xlu0 %2930 }
 0x4c3   : > { %v687_v3 = vpop.permute.xlu1 %686  ;;  %v2934_v54 = vsel %vm1026_vm9, %v5860_v16, %v5915_v44  ;;  %v2941_v24 = vadd.f32 %v5875_v10, %v2920_v11  ;;  %v6645_v11 = vstv %s4007_s23 }
 0x4c4   : > { %v703_v36 = vadd.f32 %v687_v3, %v6643_v49 }
 0x4c6   : > { %v2655_v39 = vpop.permute.xlu0 %2654 }
 0x4c7   : > { %v2660_v35 = vsel %vm1067_vm10, %v2655_v39, %v2657_v47  ;;  %v3250_v39 = vmul.f32 -1.442695, %v701_v61 }
 0x4c8   : > { %v2665_v13 = vadd.f32 %v2660_v35, %v2644_v45  ;;  %v6644_v35 = vld [vmem:[#allocation46_spill] sm:$0xff]  ;;  %v3503_v45 = vpop.eup %3502 }
 0x4ca   : > { %v2659_v63 = vpop.permute.xlu0 %2658 }
 0x4cb   : > { %v2661_v46 = vsel %vm1067_vm10, %v2657_v47, %v2659_v63  ;;  %v2667_v59 = vadd.f32 %v2659_v63, %v2646_v37  ;;  %v699_v47 = vadd.f32 %v679_v28, %v6641_v40 }
 0x4cc   : > { %v2666_v55 = vadd.f32 %v2661_v46, %v2645_v62  ;;  %v2975_v62 = vpop.permute.xlu1 %2974 }
 0x4cd   : > { %v2685_v42 = vrot.slane %v2667_v59, %v6637_v19  ;;  %v3248_v2 = vmul.f32 -1.442695, %v699_v47 }
 0x4ce   : > { %v2671_v51 = vcombine.low %v2665_v13, %v2666_v55  ;;  %v2954_v17 = vpop.permute.xlu0 %2953 }
 0x4cf   : > { %v2957_v4 = vsel %vm1067_vm10, %v5893_v20, %v2954_v17  ;;  %v2964_v20 = vadd.f32 %v5911_v14, %v2941_v24  ;;  %v6651_v24 = vld [vmem:[#allocation133_spill] sm:$0xff] }
 0x4d0   : > { %v2678_v52 = vrot.slane %v2671_v51, %v6637_v19  ;;  %v729_v51 = vadd.f32 1.0, %v3503_v45 }
 0x4d2   : > { %v2686_v53 = vcombine.low %v2678_v52, %v2685_v42  ;;  %v2973_v9 = vpop.permute.xlu0 %2972 }
 0x4d3   : > { %v2978_v46 = vsel %vm1067_vm10, %v2973_v9, %v2975_v62 }
 0x4d4   : > { %v2693_v18 = vrot.slane %v2686_v53, %v6637_v19 }
 0x4d6   : > { %2694 = vrot.lane.b32.xlu0 %v2693_v18, %s3691_s27  ;;  %v673_v25 = vpop.permute.xlu0 %672 }
 0x4d7   : > { %v696_v1 = vadd.f32 %v673_v25, %v5744_v48  ;;  %v2891_v48 = vsel %vm399_vm2, %v5802_v22, %v5850_v38  ;;  %v3252_v38 = vmul.f32 -1.442695, %v703_v36 }
 0x4d8   : > { %v2896_v22 = vadd.f32 %v2891_v48, %v5830_v21  ;;  %v2958_v21 = vsel %vm1067_vm10, %v2954_v17, %v5911_v14 }
 0x4d9   : > { %v3245_v34 = vmul.f32 -1.442695, %v696_v1 }
 0x4da   : > { %v677_v50 = vpop.permute.xlu0 %676 }
 0x4db   : > { %3504 = vpow2.f32 %v3245_v34  ;;  %v698_v31 = vadd.f32 %v677_v50, %v5756_v57  ;;  %v2913_v57 = vsel %vm1026_vm9, %v5869_v27, %v5816_v33  ;;  %v2935_v27 = vsel %vm1026_vm9, %v5915_v44, %v5875_v10 }
 0x4dc   : > { %3506 = vpow2.f32 %v3248_v2  ;;  %v2918_v41 = vadd.f32 %v2913_v57, %v2895_v30  ;;  %v2919_v33 = vadd.f32 %v2914_v5, %v2896_v22  ;;  %v6646_v57 = vstv %s4015_s19  ;;  %v6648_v30 = vld [vmem:[#allocation143_spill] sm:$0xff] }
 0x4dd   : > { %v3247_v58 = vmul.f32 -1.442695, %v698_v31  ;;  %v844_v5 = vmul.f32 %v6646_v57, %v3981_v15 }
 0x4de   : > { %v681_v0 = vpop.permute.xlu0 %680  ;;  %v2939_v37 = vadd.f32 %v2934_v54, %v2918_v41  ;;  %v2940_v44 = vadd.f32 %v2935_v27, %v2919_v33  ;;  %v6649_v54 = vld [vmem:[#allocation145_spill] sm:$0xff]  ;;  %v6650_v41 = vld [vmem:[#allocation30_spill] sm:$0xff] }
 0x4df   : > { %3508 = vpow2.f32 %v3247_v58  ;;  %v700_v32 = vadd.f32 %v681_v0, %v5766_v60  ;;  %v839_v0 = vmul.f32 %v6645_v11, %v4163_v6 }
 0x4e0   : > { %3510 = vpow2.f32 %v3250_v39  ;;  %v2962_v10 = vadd.f32 %v2957_v4, %v2939_v37  ;;  %v2963_v55 = vadd.f32 %v2958_v21, %v2940_v44  ;;  %v6653_v21 = vld [vmem:[#allocation132_spill] sm:$0xff]  ;;  %v6656_v37 = vld [vmem:[#allocation149_spill] sm:$0xff] }
 0x4e1   : > { %v3249_v12 = vmul.f32 -1.442695, %v700_v32  ;;  %v6647_v32 = vld [vmem:[#allocation150_spill] sm:$0xff]  ;;  %v884_v15 = vsel %vm863_vm6, %v6651_v24, %v6653_v21 }
 0x4e2   : > { %v685_v60 = vpop.permute.xlu0 %684  ;;  %v2983_v42 = vadd.f32 %v2978_v46, %v2962_v10  ;;  %v864_v22 = vsel %vm863_vm6, %v6648_v30, %v6647_v32  ;;  %v865_v27 = vsel %vm863_vm6, %v6647_v32, %v6649_v54  ;;  %v6658_v10 = vld [vmem:[#allocation134_spill] sm:$0xff] }
 0x4e3   : > { %3512 = vpow2.f32 %v3249_v12  ;;  %v702_v16 = vadd.f32 %v685_v60, %v6644_v35  ;;  %v869_v33 = vadd.f32 %v865_v27, %v6650_v41  ;;  %v6652_v60 = vld [vmem:[#allocation131_spill] sm:$0xff]  ;;  %v6654_v35 = vld [vmem:[#allocation152_spill] sm:$0xff] }
 0x4e4   : > { %3514 = vpow2.f32 %v3252_v38  ;;  %v846_v38 = vadd.f32 %v844_v5, %v839_v0  ;;  %v883_v4 = vsel %vm863_vm6, %v6652_v60, %v6651_v24  ;;  %v906_v44 = vsel %vm904_vm7, %v6654_v35, %v6656_v37  ;;  %v6674_v0 = vld [vmem:[#allocation161_spill] sm:$0xff]  ;;  %v6677_v27 = vld [vmem:[#allocation148_spill] sm:$0xff] }
 0x4e5   : > { %v3505_v63 = vpop.eup %3504  ;;  %v3251_v13 = vmul.f32 -1.442695, %v702_v16  ;;  %v6655_v16 = vld [vmem:[#allocation147_spill] sm:$0xff]  ;;  %v6678_v41 = vld [vmem:[#allocation160_spill] sm:$0xff]  ;;  %v6680_v60 = vld [vmem:[#allocation165_spill] sm:$0xff] }
 0x4e6   : > { %v728_v59 = vadd.f32 1.0, %v3505_v63  ;;  %v2977_v28 = vpop.permute.xlu0 %2976  ;;  %v3507_v52 = vpop.eup %3506  ;;  %v868_v12 = vadd.f32 %v864_v22, %v846_v38  ;;  %v905_v45 = vsel %vm904_vm7, %v6655_v16, %v6654_v35  ;;  %v6675_v22 = vld [vmem:[#allocation141_spill] sm:$0xff]  ;;  %v6676_v38 = vld [vmem:[#allocation146_spill] sm:$0xff] }
 0x4e7   : > { %3516 = vpow2.f32 %v3251_v13  ;;  %v2979_v17 = vsel %vm1067_vm10, %v2975_v62, %v2977_v28  ;;  %v2985_v29 = vadd.f32 %v2977_v28, %v2964_v20  ;;  %v731_v9 = vadd.f32 1.0, %v3507_v52  ;;  %v6657_v13 = vld [vmem:[#allocation135_spill] sm:$0xff]  ;;  %v6659_v20 = vld [vmem:[#allocation136_spill] sm:$0xff]  ;;  %v6682_v35 = vld [vmem:[#allocation162_spill] sm:$0xff] }
 0x4e8   : > { %3518 = vrcp.f32 %v728_v59  ;;  %v2984_v56 = vadd.f32 %v2979_v17, %v2963_v55  ;;  %v887_v6 = vadd.f32 %v883_v4, %v868_v12  ;;  %v888_v62 = vadd.f32 %v884_v15, %v869_v33  ;;  %v6661_v17 = vld [vmem:[#allocation151_spill] sm:$0xff]  ;;  %v6681_v15 = vld [vmem:[#allocation166_spill] sm:$0xff] }
 0x4e9   : > { %v3509_v53 = vpop.eup %3508  ;;  %3520 = vrcp.f32 %v729_v51  ;;  %v3003_v14 = vrot.slane %v2985_v29, %v6637_v19  ;;  %v924_v55 = vsel %vm904_vm7, %v6658_v10, %v6657_v13  ;;  %v925_v28 = vsel %vm904_vm7, %v6657_v13, %v6659_v20  ;;  %v6660_v51 = vld [vmem:[#allocation154_spill] sm:$0xff]  ;;  %v6679_v33 = vld [vmem:[#allocation163_spill] sm:$0xff]  ;;  %v806_v13 = vld [vmem:[%s6189_s6] sm:$0x3] }
 0x4ea   : > { %v730_v8 = vadd.f32 1.0, %v3509_v53  ;;  %v2989_v18 = vcombine.low %v2983_v42, %v2984_v56  ;;  %v3511_v7 = vpop.eup %3510  ;;  %v909_v63 = vadd.f32 %v905_v45, %v887_v6  ;;  %v910_v46 = vadd.f32 %v906_v44, %v888_v62  ;;  %v6662_v56 = vld [vmem:[#allocation153_spill] sm:$0xff]  ;;  %v6683_v45 = vld [vmem:[#allocation164_spill] sm:$0xff] }
 0x4eb   : > { %v733_v2 = vadd.f32 1.0, %v3511_v7  ;;  %v946_v52 = vsel %vm945_vm8, %v6661_v17, %v6660_v51  ;;  %v947_v29 = vsel %vm945_vm8, %v6660_v51, %v6662_v56  ;;  %v1046_v54 = vsel %vm1026_vm9, %v6676_v38, %v6675_v22  ;;  %v6684_v51 = vld [vmem:[#allocation169_spill] sm:$0xff]  ;;  %v3545_v56 = vld [vmem:[%s3869_s20 + $0x38] sm:$0xff] }
 0x4ec   : > { %3522 = vrcp.f32 %v730_v8  ;;  %v2996_v40 = vrot.slane %v2989_v18, %v6637_v19  ;;  %v928_v59 = vadd.f32 %v924_v55, %v909_v63  ;;  %v929_v42 = vadd.f32 %v925_v28, %v910_v46  ;;  %v6663_v18 = vld [vmem:[#allocation137_spill] sm:$0xff] }
 0x4ed   : > { %v3513_v47 = vpop.eup %3512  ;;  %3524 = vrcp.f32 %v731_v9  ;;  %v6664_v9 = vld [vmem:[#allocation138_spill] sm:$0xff]  ;;  %v1047_v12 = vsel %vm1026_vm9, %v6675_v22, %v6677_v27  ;;  %v1068_v24 = vsel %vm1067_vm10, %v6679_v33, %v6678_v41  ;;  %v1069_v4 = vsel %vm1067_vm10, %v6678_v41, %v6680_v60 }
 0x4ee   : > { %v732_v25 = vadd.f32 1.0, %v3513_v47  ;;  %v3004_v1 = vcombine.low %v2996_v40, %v3003_v14  ;;  %v3515_v34 = vpop.eup %3514  ;;  %v950_v53 = vadd.f32 %v946_v52, %v928_v59  ;;  %v951_v8 = vadd.f32 %v947_v29, %v929_v42  ;;  %v6665_v14 = vld [vmem:[#allocation140_spill] sm:$0xff]  ;;  %v6685_v52 = vld [vmem:[#allocation35_spill] sm:$0xff] }
 0x4ef   : > { %v735_v31 = vadd.f32 1.0, %v3515_v34  ;;  %v965_v7 = vsel %vm945_vm8, %v6664_v9, %v6663_v18  ;;  %v966_v47 = vsel %vm945_vm8, %v6663_v18, %v6665_v14  ;;  %v1087_v16 = vsel %vm1067_vm10, %v6682_v35, %v6681_v15 }
 0x4f0   : > { %3526 = vrcp.f32 %v732_v25  ;;  %v3011_v26 = vrot.slane %v3004_v1, %v6637_v19  ;;  %v969_v40 = vadd.f32 %v965_v7, %v950_v53  ;;  %v6666_v25 = vld [vmem:[#allocation156_spill] sm:$0xff]  ;;  %v6667_v1 = vld [vmem:[#allocation155_spill] sm:$0xff]  ;;  %v1088_v62 = vsel %vm1067_vm10, %v6681_v15, %v6683_v45 }
 0x4f1   : > { %v3517_v61 = vpop.eup %3516  ;;  %3528 = vrcp.f32 %v733_v2  ;;  %v986_v34 = vsel %vm399_vm2, %v6667_v1, %v6666_v25  ;;  %v970_v2 = vadd.f32 %v966_v47, %v951_v8  ;;  %v832_v10 = vadd.s32 4294967293, %v806_v13 }
 0x4f2   : > { %v3519_v3 = vpop.eup %3518  ;;  %v734_v50 = vadd.f32 1.0, %v3517_v61  ;;  %3012 = vrot.lane.b32.xlu1 %v3011_v26, %s3692_s21  ;;  %v6668_v26 = vld [vmem:[#allocation157_spill] sm:$0xff]  ;;  %v1113_v59 = vadd.s32 4294967294, %v806_v13  ;;  %v1431_v20 = vadd.s32 4294967295, %v806_v13  ;;  %v1425_v17 = vrot.slane %v6684_v51, 1 }
 0x4f3   : > { %3028 = vperm.xlu0 %3500, %v3519_v3   ;;  %v3521_v43 = vpop.eup %3520  ;;  %v987_v61 = vsel %vm399_vm2, %v6666_v25, %v6668_v26  ;;  %v990_v3 = vadd.f32 %v986_v34, %v969_v40  ;;  %vm833_vm11 = vcmp.ge.s32.totalorder %v832_v10, 0  ;;  %vm834_vm12 = vcmp.lt.s32.totalorder %v832_v10, 16  ;;  %v6690_v40 = vld [vmem:[#allocation41_spill] sm:$0xff]  ;;  %v3542_v10 = vld [vmem:[%s3869_s20 + $0x20] sm:$0xff] }
 0x4f4   : > { %3530 = vrcp.f32 %v734_v50  ;;  %v991_v50 = vadd.f32 %v987_v61, %v970_v2  ;;  %v1743_v42 = vrot.slane %v6685_v52, 1  ;;  %vm1114_vm13 = vcmp.ge.s32.totalorder %v1113_v59, 0  ;;  %vm6065_vm3 = vmand %vm833_vm11, %vm834_vm12  ;;  %v3552_v61 = vld [vmem:[%s3869_s20 + $0x70] sm:$0xff] }
 0x4f5   : > { %3532 = vrcp.f32 %v735_v31  ;;  %v6669_v31 = vld [vmem:[#allocation139_spill] sm:$0xff]  ;;  %vm1115_vm14 = vcmp.lt.s32.totalorder %v1113_v59, 16  ;;  %vm1432_vm1 = vcmp.ge.s32.totalorder %v1431_v20, 0  ;;  %v2066_v29 = vadd.s32 1, %v806_v13  ;;  %v3543_v59 = vld [vmem:[%s3869_s20 + $0x28] sm:$0xff] }
 0x4f6   : > { %v3523_v49 = vpop.eup %3522  ;;  %3033 = vperm.xlu1 %3501, %v3521_v43   ;;  %v6670_v43 = vld [vmem:[#allocation142_spill] sm:$0xff]  ;;  %vm6069_vm4 = vmand %vm1114_vm13, %vm1115_vm14  ;;  %v1427_v9 = vsel %vm1426_vm15, %v6684_v51, %v1425_v17  ;;  %v1745_v7 = vsel %vm1744_vm0, %v6685_v52, %v1743_v42  ;;  %v2060_v14 = vrot.slane %v6690_v40, 1  ;;  %vm1749_vm6 = vcmp.ge.s32.totalorder %v806_v13, 0 }
 0x4f7   : > { %3038 = vperm.xlu0 %3500, %v3523_v49   ;;  %v3525_v36 = vpop.eup %3524  ;;  %v1005_v49 = vsel %vm399_vm2, %v6670_v43, %v6669_v31  ;;  %vm1750_vm7 = vcmp.lt.s32.totalorder %v806_v13, 16  ;;  %vm2061_vm8 = vcmask 1022976   ;;  %v2384_v25 = vadd.s32 2, %v806_v13  ;;  %v3544_v52 = vld [vmem:[%s3869_s20 + $0x30] sm:$0xff] }
 0x4f8   : > { %v1429_v2 = vsel %vm6069_vm4, %v1427_v9, 0.0  ;;  %vm2068_vm10 = vcmp.lt.s32.totalorder %v2066_v29, 16  ;;  %vm2379_vm11 = vcmask 1014784   ;;  %vm6087_vm12 = vmand %vm1749_vm6, %vm1750_vm7  ;;  %vm2697_vm15 = vcmask 1006592  }
 0x4f9   : > { %vm2385_vm13 = vcmp.ge.s32.totalorder %v2384_v25, 0  ;;  %vm2386_vm14 = vcmp.lt.s32.totalorder %v2384_v25, 16  ;;  %vm3015_vm4 = vcmask 998400   ;;  %v3549_v25 = vld [vmem:[%s3869_s20 + $0x58] sm:$0xff] }
 0x4fa   : > { %v3527_v23 = vpop.eup %3526  ;;  %3043 = vperm.xlu1 %3501, %v3525_v36   ;;  %v1009_v36 = vadd.f32 %v1005_v49, %v990_v3  ;;  %v2062_v3 = vsel %vm2061_vm8, %v6690_v40, %v2060_v14  ;;  %v3548_v14 = vld [vmem:[%s3869_s20 + $0x50] sm:$0xff] }
 0x4fb   : > { %3048 = vperm.xlu0 %3500, %v3527_v23   ;;  %v3529_v48 = vpop.eup %3528  ;;  %v6671_v23 = vld [vmem:[#allocation144_spill] sm:$0xff] }
 0x4fe   : > { %v3531_v58 = vpop.eup %3530  ;;  %3053 = vperm.xlu1 %3501, %v3529_v48   ;;  %v1006_v48 = vsel %vm399_vm2, %v6669_v31, %v6671_v23  ;;  %vm1433_vm2 = vcmp.lt.s32.totalorder %v1431_v20, 16  ;;  %v2702_v31 = vadd.s32 3, %v806_v13 }
 0x4ff   : > { %3058 = vperm.xlu0 %3500, %v3531_v58   ;;  %v3533_v39 = vpop.eup %3532  ;;  %v6672_v58 = vld [vmem:[#allocation158_spill] sm:$0xff]  ;;  %v1010_v5 = vadd.f32 %v1006_v48, %v991_v50  ;;  %vm6077_vm5 = vmand %vm1432_vm1, %vm1433_vm2 }
 0x500   : > { %v1028_v57 = vsel %vm1026_vm9, %v6672_v58, %v6674_v0  ;;  %v1747_v26 = vsel %vm6077_vm5, %v1745_v7, 0.0  ;;  %vm2387_vm1 = vmand %vm2385_vm13, %vm2386_vm14  ;;  %vm2703_vm2 = vcmp.ge.s32.totalorder %v2702_v31, 0 }
 0x501   : > { %v1032_v30 = vadd.f32 %v1028_v57, %v1010_v5 }
 0x502   : > { %3063 = vperm.xlu1 %3501, %v3533_v39   ;;  %v6673_v39 = vld [vmem:[#allocation159_spill] sm:$0xff] }
 0x503   : > { %v1027_v11 = vsel %vm1026_vm9, %v6673_v39, %v6672_v58  ;;  %v1051_v21 = vadd.f32 %v1047_v12, %v1032_v30  ;;  %vm2067_vm9 = vcmp.ge.s32.totalorder %v2066_v29, 0 }
 0x504   : > { %v1031_v32 = vadd.f32 %v1027_v11, %v1009_v36  ;;  %vm2069_vm0 = vmand %vm2067_vm9, %vm2068_vm10  ;;  %v2064_v36 = vsel %vm6087_vm12, %v2062_v3, 0.0 }
 0x505   : > { %v1073_v44 = vadd.f32 %v1069_v4, %v1051_v21  ;;  %v6695_v21 = vld [vmem:[#allocation167_spill] sm:$0xff] }
 0x506   : > { %v1050_v6 = vadd.f32 %v1046_v54, %v1031_v32  ;;  %v3085_v15 = vsub.s32 0, %v6695_v21  ;;  %v3089_v35 = vsub.s32 1, %v6695_v21 }
 0x507   : > { %v1092_v46 = vadd.f32 %v1088_v62, %v1073_v44  ;;  %v3539_v62 = vld [vmem:[%s3869_s20 + $0x8] sm:$0xff]  ;;  %v3540_v44 = vld [vmem:[%s3869_s20 + $0x10] sm:$0xff] }
 0x508   : > { %v1072_v37 = vadd.f32 %v1068_v24, %v1050_v6 }
 0x50a   : > { %v1091_v63 = vadd.f32 %v1087_v16, %v1072_v37  ;;  %v3538_v16 = vld [vmem:[%s3869_s20] sm:$0xff] }
 0x50c   : > { %v1095_v55 = vcombine.low %v1091_v63, %v1092_v46  ;;  %v3541_v46 = vld [vmem:[%s3869_s20 + $0x18] sm:$0xff] }
 0x50e   : > { %v1102_v28 = vrot.slane %v1095_v55, %v6637_v19 }
 0x510   : > { %v1109_v18 = vrot.slane %v1102_v28, %v6637_v19 }
 0x512   : > { %v1111_v19 = vsel %vm6065_vm3, %v1109_v18, 0.0  ;;  %vm2704_vm3 = vcmp.lt.s32.totalorder %v2702_v31, 16  ;;  %v3547_v18 = vld [vmem:[%s3869_s20 + $0x48] sm:$0xff] }
 0x513   : > { %v1430_v43 = vadd.f32 %v1429_v2, %v1111_v19  ;;  %vm2705_vm5 = vmand %vm2703_vm2, %vm2704_vm3  ;;  %v3551_v19 = vld [vmem:[%s3869_s20 + $0x68] sm:$0xff] }
 0x515   : > { %v1748_v23 = vadd.f32 %v1747_v26, %v1430_v43 }
 0x517   : > { %v2065_v39 = vadd.f32 %v2064_v36, %v1748_v23 }
 0x534   : > { %v2377_v53 = vpop.permute.xlu1 %2376 }
 0x535   : > { %v2378_v34 = vrot.slane %v2377_v53, 1 }
 0x537   : > { %v2380_v49 = vsel %vm2379_vm11, %v2377_v53, %v2378_v34  ;;  %v3546_v53 = vld [vmem:[%s3869_s20 + $0x40] sm:$0xff] }
 0x538   : > { %v2382_v58 = vsel %vm2069_vm0, %v2380_v49, 0.0  ;;  %v3550_v34 = vld [vmem:[%s3869_s20 + $0x60] sm:$0xff] }
 0x539   : > { %v2383_v57 = vadd.f32 %v2382_v58, %v2065_v39 }
 0x548   : > { %v2695_v1 = vpop.permute.xlu0 %2694 }
 0x549   : > { %v2696_v50 = vrot.slane %v2695_v1, 1 }
 0x54b   : > { %v2698_v48 = vsel %vm2697_vm15, %v2695_v1, %v2696_v50  ;;  %v3553_v50 = vld [vmem:[%s3869_s20 + $0x78] sm:$0xff] }
 0x54c   : > { %v2700_v11 = vsel %vm2387_vm1, %v2698_v48, 0.0 }
 0x54d   : > { %v2701_v32 = vadd.f32 %v2700_v11, %v2383_v57 }
 0x564   : > { %v3013_v0 = vpop.permute.xlu1 %3012 }
 0x565   : > { %v3014_v5 = vrot.slane %v3013_v0, 1 }
 0x567   : > { %v3016_v30 = vsel %vm3015_vm4, %v3013_v0, %v3014_v5 }
 0x568   : > { %v3018_v22 = vsel %vm2705_vm5, %v3016_v30, 0.0 }
 0x569   : > { %v3019_v38 = vadd.f32 %v3018_v22, %v2701_v32 }
 0x56b   : > { %v3350_v54 = vmul.f32 -1.442695, %v3019_v38 }
 0x56d   : > { %3534 = vpow2.f32 %v3350_v54 }
 0x572   : > { %v3029_v27 = vpop.permute.xlu0 %3028 }
 0x573   : > { %v3066_v45 = vmul.f32 %v3538_v16, %v3029_v27  ;;  %v3067_v37 = vmul.f32 %v3539_v62, %v3029_v27 }
 0x575   : > { %v3034_v12 = vpop.permute.xlu1 %3033 }
 0x576   : > { %v3039_v33 = vpop.permute.xlu0 %3038  ;;  %v3068_v63 = vmul.f32 %v3540_v44, %v3034_v12  ;;  %v3069_v13 = vmul.f32 %v3541_v46, %v3034_v12 }
 0x577   : > { %v3535_v41 = vpop.eup %3534  ;;  %v3070_v55 = vmul.f32 %v3542_v10, %v3039_v33  ;;  %v3071_v20 = vmul.f32 %v3543_v59, %v3039_v33 }
 0x578   : > { %v3023_v24 = vadd.f32 1.0, %v3535_v41 }
 0x579   : > { %v3044_v60 = vpop.permute.xlu1 %3043 }
 0x57a   : > { %3536 = vrcp.f32 %v3023_v24  ;;  %v3049_v4 = vpop.permute.xlu0 %3048  ;;  %v3072_v42 = vmul.f32 %v3544_v52, %v3044_v60  ;;  %v3073_v29 = vmul.f32 %v3545_v56, %v3044_v60 }
 0x57b   : > { %v3074_v8 = vmul.f32 %v3546_v53, %v3049_v4  ;;  %v3075_v9 = vmul.f32 %v3547_v18, %v3049_v4 }
 0x57d   : > { %v3054_v6 = vpop.permute.xlu1 %3053 }
 0x57e   : > { %v3059_v28 = vpop.permute.xlu0 %3058  ;;  %v3076_v47 = vmul.f32 %v3548_v14, %v3054_v6  ;;  %v3077_v1 = vmul.f32 %v3549_v25, %v3054_v6 }
 0x57f   : > { %v3078_v2 = vmul.f32 %v3550_v34, %v3059_v28  ;;  %v3079_v26 = vmul.f32 %v3551_v19, %v3059_v28 }
 0x581   : > { %v3064_v51 = vpop.permute.xlu1 %3063 }
 0x582   : > { %v3080_v3 = vmul.f32 %v3552_v61, %v3064_v51  ;;  %v3081_v31 = vmul.f32 %v3553_v50, %v3064_v51 }
 0x584   : > { %v3537_v17 = vpop.eup %3536 }
 0x585   : > { %v3086_v7 = vrot.slane %v3537_v17, %v3085_v15  ;;  %v3090_v40 = vrot.slane %v3537_v17, %v3089_v35 }
 0x587   : > { %v3093_v43 = vmul.f32 %v3086_v7, %v3066_v45  ;;  %v3094_v49 = vmul.f32 %v3090_v40, %v3067_v37  ;;  %v3095_v36 = vmul.f32 %v3086_v7, %v3068_v63  ;;  %v3096_v23 = vmul.f32 %v3090_v40, %v3069_v13 }
 0x588   : > { %v3097_v48 = vmul.f32 %v3086_v7, %v3070_v55  ;;  %v3098_v58 = vmul.f32 %v3090_v40, %v3071_v20  ;;  %v3099_v39 = vmul.f32 %v3086_v7, %v3072_v42  ;;  %v3100_v11 = vmul.f32 %v3090_v40, %v3073_v29 }
 0x589   : > { %3109 = vst [vmem:[%s6115_s9] sm:$0xff] %v3093_v43  ;;  %3110 = vst [vmem:[%s6115_s9 + $0x8] sm:$0xff] %v3094_v49  ;;  %v3101_v0 = vmul.f32 %v3086_v7, %v3074_v8  ;;  %v3102_v57 = vmul.f32 %v3090_v40, %v3075_v9  ;;  %v3103_v5 = vmul.f32 %v3086_v7, %v3076_v47 }
 0x58a   : > { %3111 = vst [vmem:[%s6115_s9 + $0x10] sm:$0xff] %v3095_v36  ;;  %3112 = vst [vmem:[%s6115_s9 + $0x18] sm:$0xff] %v3096_v23  ;;  %v3104_v32 = vmul.f32 %v3090_v40, %v3077_v1  ;;  %v3105_v30 = vmul.f32 %v3086_v7, %v3078_v2  ;;  %v3106_v22 = vmul.f32 %v3090_v40, %v3079_v26 }
 0x58b   : > { %3113 = vst [vmem:[%s6115_s9 + $0x20] sm:$0xff] %v3097_v48  ;;  %3114 = vst [vmem:[%s6115_s9 + $0x28] sm:$0xff] %v3098_v58  ;;  %v3107_v38 = vmul.f32 %v3086_v7, %v3080_v3  ;;  %v3108_v54 = vmul.f32 %v3090_v40, %v3081_v31 }
 0x58c   : > { %3115 = vst [vmem:[%s6115_s9 + $0x30] sm:$0xff] %v3099_v39  ;;  %3116 = vst [vmem:[%s6115_s9 + $0x38] sm:$0xff] %v3100_v11 }
 0x58d   : > { %3117 = vst [vmem:[%s6115_s9 + $0x40] sm:$0xff] %v3101_v0  ;;  %3118 = vst [vmem:[%s6115_s9 + $0x48] sm:$0xff] %v3102_v57 }
 0x58e   : > { %3119 = vst [vmem:[%s6115_s9 + $0x50] sm:$0xff] %v3103_v5  ;;  %3120 = vst [vmem:[%s6115_s9 + $0x58] sm:$0xff] %v3104_v32 }
 0x58f   : > { %3121 = vst [vmem:[%s6115_s9 + $0x60] sm:$0xff] %v3105_v30  ;;  %3122 = vst [vmem:[%s6115_s9 + $0x68] sm:$0xff] %v3106_v22 }
 0x590   : > { %3123 = vst [vmem:[%s6115_s9 + $0x70] sm:$0xff] %v3107_v38  ;;  %3124 = vst [vmem:[%s6115_s9 + $0x78] sm:$0xff] %v3108_v54 }
 0x591   : > { %3612 = shalt.err (!%p3609_p11)
}
 0x592   : > { %s3613_s8 = scalar_lea.hbm %s6125_s18, 2048  ;;  %s3617_s17 = scalar_lea.hbm %s6698_s30, 4096 }
 0x593   : > { %p3614_p0 = scmp.ne.s32.totalorder %s6125_s18, %s3613_s8  ;;  %p3618_p6 = scmp.lt.u32.totalorder %s6125_s18, %s6698_s30 }
 0x594   : > { %p3619_p3 = scmp.lt.u32.totalorder %s3617_s17, %s3613_s8  ;;  %p3621_p5 = scmp.lt.u32.totalorder %s3613_s8, %s6125_s18 }
 0x595   : > { %p3615_p2 = pnand %p3614_p0, %p6700_p12 }
 0x596   : > { %p3620_p13 = por %p3619_p3, %p3618_p6 }
 0x597   : > { %p3616_p7 = pneg %p3615_p2 }
 0x598   : > { %p3622_p8 = por %p3621_p5, %p3620_p13 }
 0x59a   : > { %p3623_p9 = pnand %p3622_p8, %p3616_p7 }
 0x59c   : > { %3626 = shalt.err (!%p3623_p9)
}
 0x59d   : > { %s3694_s4 = smov 256   ;;  %s3695_s25 = smov 16  }
 0x59e   : > { %3427 = dma.vmem_to_hbm [thread:$0]  (%p6700_p12), %s6127_s5, 2048, %s6125_s18, %s3126_s7, %s3694_s4, %s3694_s4, %s3695_s25  }
 0x59f PF: > { %s6701_s22 = sld [smem:[#allocation11_spill]]  ;;  %s6702_s24 = sld [smem:[#allocation18_spill]] }
 0x5a0   : > { %s6703_s27 = sld [smem:[#allocation14_spill]] }
 0x5a5   : > { %s3154_s21 = sand.u32 1, %s6701_s22   ;;  %p6704_p10 = scmp.ne.s32.totalorder %s6702_s24, 0 }
 0x5a6   : > { %p6705_p1 = scmp.ge.s32.totalorder %s6703_s27, 2  ;;  %s3155_s23 = scalar_lea.sflag [#allocation4], %s3154_s21 }
 0x5a8   : > { %p3438_p4 = pnand %p6705_p1, %p6704_p10 }
 0x5aa   : > { %3652 = dma.done.wait (!%p3438_p4), %s3155_s23, 2048  }
 0x5ab   : > { %3654 = vsyncadd (!%p3438_p4), %s3155_s23, 4294965248  ;;  %s6706_s27 = sld [smem:[#allocation15_spill]]  ;;  %s6707_s24 = sld [smem:[#allocation12_spill]] }
 0x5ac   : > { %s6708_s25 = sld [smem:[#allocation13_spill]]  ;;  %s6709_s26 = sld [smem:[#allocation16_spill]] }
 0x5b1   : > { %p21_p11 = scmp.ge.s32.totalorder %s6706_s27, 4  }
 0x5b3   :  { %23 = sbr.rel (!%p21_p11) target bundleno = 13 (0xd), region = 98 }
 0x5ba   :  { %3160 = vsyncpa [#allocation3], 1 }
 0x5bb   :  { %3162 = vsyncpa [#allocation3 + $0x1], 1 }
 0x5bc   :  { %3163 = vsyncpa [#allocation4], 1 }
 0x5bd   :  { %3165 = vsyncpa [#allocation4 + $0x1], 1 }
 0x5be   :  { %3166 = vsyncpa [#allocation5], 1 }
 0x5bf   :  { %3168 = vsyncpa [#allocation5 + $0x1], 1 }

</bundles_post_ra>
